<compile_context>
chip_gen: v7x
topology: tpu7x:2x2x1
jax: 0.10.0
libtpu: 0.0.40
codegen_flags: <defaults>
</compile_context>

<pallas_src>
import functools

import jax
import jax.numpy as jnp
from jax import lax
from jax.experimental import pallas as pl
from jax.experimental.pallas import tpu as pltpu


def _round_up(x, m):
    return (x + m - 1) // m * m


# ---------------------------------------------------------------------------
# Fused kernel: wavefront over all LSTM layers + FC head, VMEM-resident.
# ---------------------------------------------------------------------------
def _make_fused_kernel(num_layers, T, B_pad, out_size, H, H_pad, G_pad):
    L = num_layers
    n_steps = T + L - 1      # wavefront: layer l processes timestep t at s = t + l

    def kernel(*refs):
        x_ref = refs[0]
        layer_refs = [refs[1 + 3 * l: 4 + 3 * l] for l in range(L)]
        fc_wT_ref = refs[1 + 3 * L]
        fc_b_ref = refs[2 + 3 * L]
        out_ref = refs[3 + 3 * L]
        gx_ref = refs[4 + 3 * L]
        tail_ref = refs[5 + 3 * L]

        # Layer-0 input projection for ALL timesteps: one large bf16 MXU GEMM,
        # hoisted off the serial recurrence (f32 accumulation, bias added in-step).
        gx_ref[...] = jnp.dot(x_ref[...], layer_refs[0][0][...],
                              preferred_element_type=jnp.float32)

        def wave_step(s, carry):
            hs, cs = carry
            new_hs, new_cs = [], []
            for l in range(L):
                w_ihT_ref, w_hhT_ref, b_ref = layer_refs[l]
                t = s - l                        # timestep this layer handles now
                if l == 0:
                    row = pl.multiple_of(jnp.minimum(s, T - 1) * B_pad, B_pad)
                    gx = gx_ref[pl.ds(row, B_pad), :]
                else:
                    # Uses layer l-1's hidden state from the PREVIOUS wavefront
                    # step (incoming carry) -> independent of this layer's chain.
                    gx = jnp.dot(hs[l - 1].astype(jnp.bfloat16), w_ihT_ref[...],
                                 preferred_element_type=jnp.float32)
                gates = (gx + b_ref[...]
                         + jnp.dot(hs[l].astype(jnp.bfloat16), w_hhT_ref[...],
                                   preferred_element_type=jnp.float32))
                # Packed gate layout [i|f|g|o] over 4*H lanes: one sigmoid + one
                # tanh over the whole gate vreg, then XLU rolls align f/g/o with
                # the i/c/h lanes (lanes 0:H).
                sig = jax.nn.sigmoid(gates)
                tng = jnp.tanh(gates)
                i_g = sig[:, :H_pad]
                f_g = pltpu.roll(sig, shift=G_pad - H, axis=1)[:, :H_pad]
                g_g = pltpu.roll(tng, shift=G_pad - 2 * H, axis=1)[:, :H_pad]
                o_g = pltpu.roll(sig, shift=G_pad - 3 * H, axis=1)[:, :H_pad]
                # Lanes >= H of h/c hold bounded junk; every weight row feeding
                # from those lanes is zero-padded, so it never contributes.
                c_new = f_g * cs[l] + i_g * g_g
                h_new = o_g * jnp.tanh(c_new)
                valid = jnp.logical_and(t >= 0, t < T)
                h_new = jnp.where(valid, h_new, hs[l])
                c_new = jnp.where(valid, c_new, cs[l])
                if l == L - 1:
                    # Only the last `out_size` timesteps feed the FC head.
                    @pl.when(jnp.logical_and(t >= T - out_size, t < T))
                    def _(h_new=h_new, t=t):
                        r = pl.multiple_of(
                            jnp.maximum(t - (T - out_size), 0) * B_pad, B_pad)
                        tail_ref[pl.ds(r, B_pad), :] = h_new
                new_hs.append(h_new)
                new_cs.append(c_new)
            return tuple(new_hs), tuple(new_cs)

        zeros = tuple(jnp.zeros((B_pad, H_pad), jnp.float32) for _ in range(L))
        lax.fori_loop(0, n_steps, wave_step, (zeros, zeros),
                      unroll=True if n_steps <= 16 else 8)

        # FC head fused: only the stored tail timesteps are projected.
        out_ref[...] = (jnp.dot(tail_ref[...].astype(jnp.bfloat16),
                                fc_wT_ref[...],
                                preferred_element_type=jnp.float32)
                        + fc_b_ref[...])

    return kernel


# ---------------------------------------------------------------------------
# One-time parameter repacking: packed gate axis, zero-padded, pre-transposed,
# bf16 MXU operands (biases stay f32).
# ---------------------------------------------------------------------------
def prepare_params(params, input_size, hidden_size):
    H = hidden_size
    H_pad = _round_up(H, 128)
    G_pad = _round_up(4 * H, 128)
    D_pad = _round_up(input_size, 128)
    O_pad = _round_up(input_size, 128)

    layers = []
    for l, lp in enumerate(params["lstm"]):
        d_in = input_size if l == 0 else H
        d_in_pad = D_pad if l == 0 else H_pad
        # Gates stay contiguous [i|f|g|o] (PyTorch order); pad only the combined
        # 4*H gate axis to G_pad, and the input axis with zero rows.
        w_ih = jnp.pad(lp["w_ih"], ((0, G_pad - 4 * H), (0, d_in_pad - d_in)))
        w_hh = jnp.pad(lp["w_hh"], ((0, G_pad - 4 * H), (0, H_pad - H)))
        b = jnp.pad(lp["b_ih"] + lp["b_hh"], ((0, G_pad - 4 * H),))
        layers.append({
            "w_ihT": jnp.transpose(w_ih).astype(jnp.bfloat16),   # (d_in_pad, G_pad)
            "w_hhT": jnp.transpose(w_hh).astype(jnp.bfloat16),   # (H_pad, G_pad)
            "b": b.reshape(1, G_pad).astype(jnp.float32),
        })

    fc_w = jnp.pad(params["fc_w"], ((0, O_pad - input_size), (0, H_pad - H)))
    fc_b = jnp.pad(params["fc_b"], ((0, O_pad - input_size),))
    return {
        "layers": layers,
        "fc_wT": jnp.transpose(fc_w).astype(jnp.bfloat16),       # (H_pad, O_pad)
        "fc_b": fc_b.reshape(1, O_pad).astype(jnp.float32),
    }


# ---------------------------------------------------------------------------
# Forward wrapper (matches RNN.forward, batch-first input).
# ---------------------------------------------------------------------------
@functools.partial(jax.jit, static_argnames=("out_size", "hidden_size"))
def rnn_forward(prepared, x, *, out_size, hidden_size):
    B, T, D = x.shape
    assert out_size <= T
    B_pad = _round_up(B, 8)
    num_layers = len(prepared["layers"])
    D_pad = prepared["layers"][0]["w_ihT"].shape[0]
    H_pad = prepared["layers"][0]["w_hhT"].shape[0]
    G_pad = prepared["layers"][0]["w_hhT"].shape[1]
    O_pad = prepared["fc_wT"].shape[1]

    # Time-major, padded to (8, 128)-friendly shapes, flattened to 2D rows
    # (row = t * B_pad + b) so each timestep is a sublane-aligned row block.
    xp = jnp.zeros((T, B_pad, D_pad), jnp.bfloat16)
    xp = xp.at[:, :B, :D].set(jnp.transpose(x, (1, 0, 2)).astype(jnp.bfloat16))
    xp = xp.reshape(T * B_pad, D_pad)

    flat_in = [xp]
    for lp in prepared["layers"]:
        # Pre-tile the bias to B_pad rows so the in-loop add has no broadcast.
        flat_in += [lp["w_ihT"], lp["w_hhT"],
                    jnp.broadcast_to(lp["b"], (B_pad, G_pad))]
    flat_in += [prepared["fc_wT"], prepared["fc_b"]]

    vmem = pl.BlockSpec(memory_space=pltpu.MemorySpace.VMEM)
    kernel = _make_fused_kernel(num_layers, T, B_pad, out_size,
                                hidden_size, H_pad, G_pad)
    out = pl.pallas_call(
        kernel,
        out_shape=jax.ShapeDtypeStruct((out_size * B_pad, O_pad), jnp.float32),
        in_specs=[vmem] * len(flat_in),
        out_specs=vmem,
        scratch_shapes=[
            pltpu.VMEM((T * B_pad, G_pad), jnp.float32),         # layer-0 gx
            pltpu.VMEM((out_size * B_pad, H_pad), jnp.float32),  # last-layer tail
        ],
    )(*flat_in)

    out = out.reshape(out_size, B_pad, O_pad)
    out = jnp.transpose(out, (1, 0, 2))[:B, :, :D - 1]   # drop pad + last feature
    return out


# ---------------------------------------------------------------------------
# Pure-JAX reference (f32) and synthetic init.
# ---------------------------------------------------------------------------
def rnn_forward_ref(params, x, out_size):
    h_seq = jnp.transpose(x, (1, 0, 2)).astype(jnp.float32)   # (T, B, D)
    T, B, _ = h_seq.shape
    for lp in params["lstm"]:
        H = lp["w_hh"].shape[1]
        wihT, whhT = lp["w_ih"].T, lp["w_hh"].T
        b = lp["b_ih"] + lp["b_hh"]
        h = jnp.zeros((B, H), jnp.float32)
        c = jnp.zeros((B, H), jnp.float32)
        outs = []
        for t in range(T):
            gates = h_seq[t] @ wihT + h @ whhT + b
            i = jax.nn.sigmoid(gates[:, 0:H])
            f = jax.nn.sigmoid(gates[:, H:2 * H])
            g = jnp.tanh(gates[:, 2 * H:3 * H])
            o = jax.nn.sigmoid(gates[:, 3 * H:4 * H])
            c = f * c + i * g
            h = o * jnp.tanh(c)
            outs.append(h)
        h_seq = jnp.stack(outs, axis=0)
    out = jnp.transpose(h_seq, (1, 0, 2))[:, -out_size:, :]
    fc = out @ params["fc_w"].T + params["fc_b"]
    return fc[:, :, :-1]


def init_params(key, input_size, hidden_size, num_layers):
    """Deterministic synthetic init mirroring nn.LSTM / kaiming_normal fc."""
    params = {"lstm": []}
    k_lstm = 1.0 / jnp.sqrt(hidden_size)
    for layer in range(num_layers):
        d_in = input_size if layer == 0 else hidden_size
        key, k1, k2, k3, k4 = jax.random.split(key, 5)
        params["lstm"].append({
            "w_ih": jax.random.uniform(k1, (4 * hidden_size, d_in),
                                       jnp.float32, -k_lstm, k_lstm),
            "w_hh": jax.random.uniform(k2, (4 * hidden_size, hidden_size),
                                       jnp.float32, -k_lstm, k_lstm),
            "b_ih": jax.random.uniform(k3, (4 * hidden_size,),
                                       jnp.float32, -k_lstm, k_lstm),
            "b_hh": jax.random.uniform(k4, (4 * hidden_size,),
                                       jnp.float32, -k_lstm, k_lstm),
        })
    key, kf = jax.random.split(key)
    std = jnp.sqrt(2.0 / hidden_size)   # kaiming_normal_(fc.weight), zeros bias
    params["fc_w"] = std * jax.random.normal(kf, (input_size, hidden_size),
                                             jnp.float32)
    params["fc_b"] = jnp.zeros((input_size,), jnp.float32)
    return params


if __name__ == "__main__":
    input_size, hidden_size, num_layers, out_size = 16, 32, 2, 4
    B, T = 2, 8

    key = jax.random.PRNGKey(0)
    key, kx = jax.random.split(key)
    x = jax.random.normal(kx, (B, T, input_size), jnp.float32)

    params = init_params(key, input_size, hidden_size, num_layers)
    prepared = prepare_params(params, input_size, hidden_size)

    y = rnn_forward(prepared, x, out_size=out_size, hidden_size=hidden_size)
    jax.block_until_ready(y)
    assert y.shape == (B, out_size, input_size - 1), y.shape
    assert y.dtype == jnp.float32

    y_ref = rnn_forward_ref(params, x, out_size)
    # bf16 MXU inputs with f32 accumulation -> looser-than-pure-f32 tolerance.
    assert jnp.allclose(y, y_ref, rtol=3e-2, atol=3e-2), \
        float(jnp.max(jnp.abs(y - y_ref)))

    print("KERNEL_OK")
</pallas_src>

<mosaic_0001>
module attributes {stable_mosaic.version = 11 : i64} {
  func.func @kernel(%arg0: memref<64x128xbf16, #tpu.memory_space<vmem>>, %arg1: memref<128x128xbf16, #tpu.memory_space<vmem>>, %arg2: memref<128x128xbf16, #tpu.memory_space<vmem>>, %arg3: memref<8x128xf32, #tpu.memory_space<vmem>>, %arg4: memref<128x128xbf16, #tpu.memory_space<vmem>>, %arg5: memref<128x128xbf16, #tpu.memory_space<vmem>>, %arg6: memref<8x128xf32, #tpu.memory_space<vmem>>, %arg7: memref<128x128xbf16, #tpu.memory_space<vmem>>, %arg8: memref<1x128xf32, #tpu.memory_space<vmem>>, %arg9: memref<32x128xf32, #tpu.memory_space<vmem>>, %arg10: memref<64x128xf32, #tpu.memory_space<vmem>>, %arg11: memref<32x128xf32, #tpu.memory_space<vmem>>) attributes {dimension_semantics = [], scalar_prefetch = 0 : i64, scratch_operands = 2 : i64, tpu.core_type = #tpu.core_type<tc>} {
    %c0 = arith.constant 0 : index
    %c0_0 = arith.constant 0 : index
    %0 = vector.load %arg0[%c0, %c0_0] : memref<64x128xbf16, #tpu.memory_space<vmem>>, vector<64x128xbf16>
    %c0_1 = arith.constant 0 : index
    %c0_2 = arith.constant 0 : index
    %1 = vector.load %arg1[%c0_1, %c0_2] : memref<128x128xbf16, #tpu.memory_space<vmem>>, vector<128x128xbf16>
    %cst = arith.constant dense<0.000000e+00> : vector<64x128xf32>
    %2 = tpu.matmul %0, %1, %cst {dimension_numbers = #tpu.dot_dimension_numbers<[1], [0], [0], [1], [0, 0, 1, 1], [], []>} : vector<64x128xbf16>, vector<128x128xbf16>, vector<64x128xf32> -> vector<64x128xf32>
    %c0_3 = arith.constant 0 : index
    %c0_4 = arith.constant 0 : index
    %3 = vector.load %arg10[%c0_3, %c0_4] : memref<64x128xf32, #tpu.memory_space<vmem>>, vector<64x128xf32>
    tpu.vector_store %arg10[%c0_3, %c0_4], %2 {strides = array<i32>} : memref<64x128xf32, #tpu.memory_space<vmem>>, vector<64x128xf32>,
    %cst_5 = arith.constant 0.000000e+00 : f32
    %4 = vector.broadcast %cst_5 : f32 to vector<8x128xf32>
    %cst_6 = arith.constant 0.000000e+00 : f32
    %5 = vector.broadcast %cst_6 : f32 to vector<8x128xf32>
    %c0_i32 = arith.constant 0 : i32
    %c0_i32_7 = arith.constant 0 : i32
    %6 = arith.subi %c0_i32, %c0_i32_7 : i32
    %c7_i32 = arith.constant 7 : i32
    %7 = arith.minsi %c0_i32, %c7_i32 : i32
    %c8_i32 = arith.constant 8 : i32
    %8 = arith.muli %7, %c8_i32 : i32
    %9 = tpu.assume_multiple %8, 8 : i32
    %10 = arith.index_cast %9 : i32 to index
    %c0_8 = arith.constant 0 : index
    %11 = vector.load %arg10[%10, %c0_8] : memref<64x128xf32, #tpu.memory_space<vmem>>, vector<8x128xf32>
    %c0_9 = arith.constant 0 : index
    %c0_10 = arith.constant 0 : index
    %12 = vector.load %arg3[%c0_9, %c0_10] : memref<8x128xf32, #tpu.memory_space<vmem>>, vector<8x128xf32>
    %13 = arith.addf %11, %12 : vector<8x128xf32>
    %14 = arith.truncf %4 : vector<8x128xf32> to vector<8x128xbf16>
    %c0_11 = arith.constant 0 : index
    %c0_12 = arith.constant 0 : index
    %15 = vector.load %arg2[%c0_11, %c0_12] : memref<128x128xbf16, #tpu.memory_space<vmem>>, vector<128x128xbf16>
    %cst_13 = arith.constant dense<0.000000e+00> : vector<8x128xf32>
    %16 = tpu.matmul %14, %15, %cst_13 {dimension_numbers = #tpu.dot_dimension_numbers<[1], [0], [0], [1], [0, 0, 1, 1], [], []>} : vector<8x128xbf16>, vector<128x128xbf16>, vector<8x128xf32> -> vector<8x128xf32>
    %17 = arith.addf %13, %16 : vector<8x128xf32>
    %18 = arith.negf %17 : vector<8x128xf32>
    %19 = math.exp %18 : vector<8x128xf32>
    %cst_14 = arith.constant 1.000000e+00 : f32
    %20 = vector.broadcast %cst_14 : f32 to vector<8x128xf32>
    %21 = arith.addf %20, %19 : vector<8x128xf32>
    %22 = arith.divf %20, %21 : vector<8x128xf32>
    %23 = math.tanh %17 : vector<8x128xf32>
    %c96_i32 = arith.constant 96 : i32
    %24 = tpu.dynamic_rotate %22 by %c96_i32 dim 1 : vector<8x128xf32>, i32 -> vector<8x128xf32>
    %c64_i32 = arith.constant 64 : i32
    %25 = tpu.dynamic_rotate %23 by %c64_i32 dim 1 : vector<8x128xf32>, i32 -> vector<8x128xf32>
    %c32_i32 = arith.constant 32 : i32
    %26 = tpu.dynamic_rotate %22 by %c32_i32 dim 1 : vector<8x128xf32>, i32 -> vector<8x128xf32>
    %27 = arith.mulf %24, %4 : vector<8x128xf32>
    %28 = arith.mulf %22, %25 : vector<8x128xf32>
    %29 = arith.addf %27, %28 : vector<8x128xf32>
    %30 = math.tanh %29 : vector<8x128xf32>
    %31 = arith.mulf %26, %30 : vector<8x128xf32>
    %c0_i32_15 = arith.constant 0 : i32
    %32 = arith.cmpi sge, %6, %c0_i32_15 : i32
    %c8_i32_16 = arith.constant 8 : i32
    %33 = arith.cmpi slt, %6, %c8_i32_16 : i32
    %34 = arith.andi %32, %33 : i1
    %35 = arith.select %34, %31, %4 : vector<8x128xf32>
    %36 = arith.select %34, %29, %4 : vector<8x128xf32>
    %c1_i32 = arith.constant 1 : i32
    %37 = arith.subi %c0_i32, %c1_i32 : i32
    %38 = arith.truncf %4 : vector<8x128xf32> to vector<8x128xbf16>
    %c0_17 = arith.constant 0 : index
    %c0_18 = arith.constant 0 : index
    %39 = vector.load %arg4[%c0_17, %c0_18] : memref<128x128xbf16, #tpu.memory_space<vmem>>, vector<128x128xbf16>
    %cst_19 = arith.constant dense<0.000000e+00> : vector<8x128xf32>
    %40 = tpu.matmul %38, %39, %cst_19 {dimension_numbers = #tpu.dot_dimension_numbers<[1], [0], [0], [1], [0, 0, 1, 1], [], []>} : vector<8x128xbf16>, vector<128x128xbf16>, vector<8x128xf32> -> vector<8x128xf32>
    %c0_20 = arith.constant 0 : index
    %c0_21 = arith.constant 0 : index
    %41 = vector.load %arg6[%c0_20, %c0_21] : memref<8x128xf32, #tpu.memory_space<vmem>>, vector<8x128xf32>
    %42 = arith.addf %40, %41 : vector<8x128xf32>
    %43 = arith.truncf %5 : vector<8x128xf32> to vector<8x128xbf16>
    %c0_22 = arith.constant 0 : index
    %c0_23 = arith.constant 0 : index
    %44 = vector.load %arg5[%c0_22, %c0_23] : memref<128x128xbf16, #tpu.memory_space<vmem>>, vector<128x128xbf16>
    %cst_24 = arith.constant dense<0.000000e+00> : vector<8x128xf32>
    %45 = tpu.matmul %43, %44, %cst_24 {dimension_numbers = #tpu.dot_dimension_numbers<[1], [0], [0], [1], [0, 0, 1, 1], [], []>} : vector<8x128xbf16>, vector<128x128xbf16>, vector<8x128xf32> -> vector<8x128xf32>
    %46 = arith.addf %42, %45 : vector<8x128xf32>
    %47 = arith.negf %46 : vector<8x128xf32>
    %48 = math.exp %47 : vector<8x128xf32>
    %cst_25 = arith.constant 1.000000e+00 : f32
    %49 = vector.broadcast %cst_25 : f32 to vector<8x128xf32>
    %50 = arith.addf %49, %48 : vector<8x128xf32>
    %51 = arith.divf %49, %50 : vector<8x128xf32>
    %52 = math.tanh %46 : vector<8x128xf32>
    %c96_i32_26 = arith.constant 96 : i32
    %53 = tpu.dynamic_rotate %51 by %c96_i32_26 dim 1 : vector<8x128xf32>, i32 -> vector<8x128xf32>
    %c64_i32_27 = arith.constant 64 : i32
    %54 = tpu.dynamic_rotate %52 by %c64_i32_27 dim 1 : vector<8x128xf32>, i32 -> vector<8x128xf32>
    %c32_i32_28 = arith.constant 32 : i32
    %55 = tpu.dynamic_rotate %51 by %c32_i32_28 dim 1 : vector<8x128xf32>, i32 -> vector<8x128xf32>
    %56 = arith.mulf %53, %5 : vector<8x128xf32>
    %57 = arith.mulf %51, %54 : vector<8x128xf32>
    %58 = arith.addf %56, %57 : vector<8x128xf32>
    %59 = math.tanh %58 : vector<8x128xf32>
    %60 = arith.mulf %55, %59 : vector<8x128xf32>
    %c0_i32_29 = arith.constant 0 : i32
    %61 = arith.cmpi sge, %37, %c0_i32_29 : i32
    %c8_i32_30 = arith.constant 8 : i32
    %62 = arith.cmpi slt, %37, %c8_i32_30 : i32
    %63 = arith.andi %61, %62 : i1
    %64 = arith.select %63, %60, %5 : vector<8x128xf32>
    %65 = arith.select %63, %58, %5 : vector<8x128xf32>
    %c4_i32 = arith.constant 4 : i32
    %66 = arith.cmpi sge, %37, %c4_i32 : i32
    %c8_i32_31 = arith.constant 8 : i32
    %67 = arith.cmpi slt, %37, %c8_i32_31 : i32
    %68 = arith.andi %66, %67 : i1
    %69 = arith.extui %68 : i1 to i32
    %c0_i32_32 = arith.constant 0 : i32
    %70 = arith.cmpi ne, %69, %c0_i32_32 : i32
    scf.if %70 {
      %c4_i32_310 = arith.constant 4 : i32
      %599 = arith.subi %37, %c4_i32_310 : i32
      %c0_i32_311 = arith.constant 0 : i32
      %600 = arith.maxsi %599, %c0_i32_311 : i32
      %c8_i32_312 = arith.constant 8 : i32
      %601 = arith.muli %600, %c8_i32_312 : i32
      %602 = tpu.assume_multiple %601, 8 : i32
      %603 = arith.index_cast %602 : i32 to index
      %c0_313 = arith.constant 0 : index
      %604 = vector.load %arg11[%603, %c0_313] : memref<32x128xf32, #tpu.memory_space<vmem>>, vector<8x128xf32>
      tpu.vector_store %arg11[%603, %c0_313], %64 {strides = array<i32>} : memref<32x128xf32, #tpu.memory_space<vmem>>, vector<8x128xf32>,
    } else {
    }
    %c1_i32_33 = arith.constant 1 : i32
    %c0_i32_34 = arith.constant 0 : i32
    %71 = arith.subi %c1_i32_33, %c0_i32_34 : i32
    %c7_i32_35 = arith.constant 7 : i32
    %72 = arith.minsi %c1_i32_33, %c7_i32_35 : i32
    %c8_i32_36 = arith.constant 8 : i32
    %73 = arith.muli %72, %c8_i32_36 : i32
    %74 = tpu.assume_multiple %73, 8 : i32
    %75 = arith.index_cast %74 : i32 to index
    %c0_37 = arith.constant 0 : index
    %76 = vector.load %arg10[%75, %c0_37] : memref<64x128xf32, #tpu.memory_space<vmem>>, vector<8x128xf32>
    %c0_38 = arith.constant 0 : index
    %c0_39 = arith.constant 0 : index
    %77 = vector.load %arg3[%c0_38, %c0_39] : memref<8x128xf32, #tpu.memory_space<vmem>>, vector<8x128xf32>
    %78 = arith.addf %76, %77 : vector<8x128xf32>
    %79 = arith.truncf %35 : vector<8x128xf32> to vector<8x128xbf16>
    %c0_40 = arith.constant 0 : index
    %c0_41 = arith.constant 0 : index
    %80 = vector.load %arg2[%c0_40, %c0_41] : memref<128x128xbf16, #tpu.memory_space<vmem>>, vector<128x128xbf16>
    %cst_42 = arith.constant dense<0.000000e+00> : vector<8x128xf32>
    %81 = tpu.matmul %79, %80, %cst_42 {dimension_numbers = #tpu.dot_dimension_numbers<[1], [0], [0], [1], [0, 0, 1, 1], [], []>} : vector<8x128xbf16>, vector<128x128xbf16>, vector<8x128xf32> -> vector<8x128xf32>
    %82 = arith.addf %78, %81 : vector<8x128xf32>
    %83 = arith.negf %82 : vector<8x128xf32>
    %84 = math.exp %83 : vector<8x128xf32>
    %cst_43 = arith.constant 1.000000e+00 : f32
    %85 = vector.broadcast %cst_43 : f32 to vector<8x128xf32>
    %86 = arith.addf %85, %84 : vector<8x128xf32>
    %87 = arith.divf %85, %86 : vector<8x128xf32>
    %88 = math.tanh %82 : vector<8x128xf32>
    %c96_i32_44 = arith.constant 96 : i32
    %89 = tpu.dynamic_rotate %87 by %c96_i32_44 dim 1 : vector<8x128xf32>, i32 -> vector<8x128xf32>
    %c64_i32_45 = arith.constant 64 : i32
    %90 = tpu.dynamic_rotate %88 by %c64_i32_45 dim 1 : vector<8x128xf32>, i32 -> vector<8x128xf32>
    %c32_i32_46 = arith.constant 32 : i32
    %91 = tpu.dynamic_rotate %87 by %c32_i32_46 dim 1 : vector<8x128xf32>, i32 -> vector<8x128xf32>
    %92 = arith.mulf %89, %36 : vector<8x128xf32>
    %93 = arith.mulf %87, %90 : vector<8x128xf32>
    %94 = arith.addf %92, %93 : vector<8x128xf32>
    %95 = math.tanh %94 : vector<8x128xf32>
    %96 = arith.mulf %91, %95 : vector<8x128xf32>
    %c0_i32_47 = arith.constant 0 : i32
    %97 = arith.cmpi sge, %71, %c0_i32_47 : i32
    %c8_i32_48 = arith.constant 8 : i32
    %98 = arith.cmpi slt, %71, %c8_i32_48 : i32
    %99 = arith.andi %97, %98 : i1
    %100 = arith.select %99, %96, %35 : vector<8x128xf32>
    %101 = arith.select %99, %94, %36 : vector<8x128xf32>
    %c1_i32_49 = arith.constant 1 : i32
    %102 = arith.subi %c1_i32_33, %c1_i32_49 : i32
    %103 = arith.truncf %35 : vector<8x128xf32> to vector<8x128xbf16>
    %c0_50 = arith.constant 0 : index
    %c0_51 = arith.constant 0 : index
    %104 = vector.load %arg4[%c0_50, %c0_51] : memref<128x128xbf16, #tpu.memory_space<vmem>>, vector<128x128xbf16>
    %cst_52 = arith.constant dense<0.000000e+00> : vector<8x128xf32>
    %105 = tpu.matmul %103, %104, %cst_52 {dimension_numbers = #tpu.dot_dimension_numbers<[1], [0], [0], [1], [0, 0, 1, 1], [], []>} : vector<8x128xbf16>, vector<128x128xbf16>, vector<8x128xf32> -> vector<8x128xf32>
    %c0_53 = arith.constant 0 : index
    %c0_54 = arith.constant 0 : index
    %106 = vector.load %arg6[%c0_53, %c0_54] : memref<8x128xf32, #tpu.memory_space<vmem>>, vector<8x128xf32>
    %107 = arith.addf %105, %106 : vector<8x128xf32>
    %108 = arith.truncf %64 : vector<8x128xf32> to vector<8x128xbf16>
    %c0_55 = arith.constant 0 : index
    %c0_56 = arith.constant 0 : index
    %109 = vector.load %arg5[%c0_55, %c0_56] : memref<128x128xbf16, #tpu.memory_space<vmem>>, vector<128x128xbf16>
    %cst_57 = arith.constant dense<0.000000e+00> : vector<8x128xf32>
    %110 = tpu.matmul %108, %109, %cst_57 {dimension_numbers = #tpu.dot_dimension_numbers<[1], [0], [0], [1], [0, 0, 1, 1], [], []>} : vector<8x128xbf16>, vector<128x128xbf16>, vector<8x128xf32> -> vector<8x128xf32>
    %111 = arith.addf %107, %110 : vector<8x128xf32>
    %112 = arith.negf %111 : vector<8x128xf32>
    %113 = math.exp %112 : vector<8x128xf32>
    %cst_58 = arith.constant 1.000000e+00 : f32
    %114 = vector.broadcast %cst_58 : f32 to vector<8x128xf32>
    %115 = arith.addf %114, %113 : vector<8x128xf32>
    %116 = arith.divf %114, %115 : vector<8x128xf32>
    %117 = math.tanh %111 : vector<8x128xf32>
    %c96_i32_59 = arith.constant 96 : i32
    %118 = tpu.dynamic_rotate %116 by %c96_i32_59 dim 1 : vector<8x128xf32>, i32 -> vector<8x128xf32>
    %c64_i32_60 = arith.constant 64 : i32
    %119 = tpu.dynamic_rotate %117 by %c64_i32_60 dim 1 : vector<8x128xf32>, i32 -> vector<8x128xf32>
    %c32_i32_61 = arith.constant 32 : i32
    %120 = tpu.dynamic_rotate %116 by %c32_i32_61 dim 1 : vector<8x128xf32>, i32 -> vector<8x128xf32>
    %121 = arith.mulf %118, %65 : vector<8x128xf32>
    %122 = arith.mulf %116, %119 : vector<8x128xf32>
    %123 = arith.addf %121, %122 : vector<8x128xf32>
    %124 = math.tanh %123 : vector<8x128xf32>
    %125 = arith.mulf %120, %124 : vector<8x128xf32>
    %c0_i32_62 = arith.constant 0 : i32
    %126 = arith.cmpi sge, %102, %c0_i32_62 : i32
    %c8_i32_63 = arith.constant 8 : i32
    %127 = arith.cmpi slt, %102, %c8_i32_63 : i32
    %128 = arith.andi %126, %127 : i1
    %129 = arith.select %128, %125, %64 : vector<8x128xf32>
    %130 = arith.select %128, %123, %65 : vector<8x128xf32>
    %c4_i32_64 = arith.constant 4 : i32
    %131 = arith.cmpi sge, %102, %c4_i32_64 : i32
    %c8_i32_65 = arith.constant 8 : i32
    %132 = arith.cmpi slt, %102, %c8_i32_65 : i32
    %133 = arith.andi %131, %132 : i1
    %134 = arith.extui %133 : i1 to i32
    %c0_i32_66 = arith.constant 0 : i32
    %135 = arith.cmpi ne, %134, %c0_i32_66 : i32
    scf.if %135 {
      %c4_i32_310 = arith.constant 4 : i32
      %599 = arith.subi %102, %c4_i32_310 : i32
      %c0_i32_311 = arith.constant 0 : i32
      %600 = arith.maxsi %599, %c0_i32_311 : i32
      %c8_i32_312 = arith.constant 8 : i32
      %601 = arith.muli %600, %c8_i32_312 : i32
      %602 = tpu.assume_multiple %601, 8 : i32
      %603 = arith.index_cast %602 : i32 to index
      %c0_313 = arith.constant 0 : index
      %604 = vector.load %arg11[%603, %c0_313] : memref<32x128xf32, #tpu.memory_space<vmem>>, vector<8x128xf32>
      tpu.vector_store %arg11[%603, %c0_313], %129 {strides = array<i32>} : memref<32x128xf32, #tpu.memory_space<vmem>>, vector<8x128xf32>,
    } else {
    }
    %c2_i32 = arith.constant 2 : i32
    %c0_i32_67 = arith.constant 0 : i32
    %136 = arith.subi %c2_i32, %c0_i32_67 : i32
    %c7_i32_68 = arith.constant 7 : i32
    %137 = arith.minsi %c2_i32, %c7_i32_68 : i32
    %c8_i32_69 = arith.constant 8 : i32
    %138 = arith.muli %137, %c8_i32_69 : i32
    %139 = tpu.assume_multiple %138, 8 : i32
    %140 = arith.index_cast %139 : i32 to index
    %c0_70 = arith.constant 0 : index
    %141 = vector.load %arg10[%140, %c0_70] : memref<64x128xf32, #tpu.memory_space<vmem>>, vector<8x128xf32>
    %c0_71 = arith.constant 0 : index
    %c0_72 = arith.constant 0 : index
    %142 = vector.load %arg3[%c0_71, %c0_72] : memref<8x128xf32, #tpu.memory_space<vmem>>, vector<8x128xf32>
    %143 = arith.addf %141, %142 : vector<8x128xf32>
    %144 = arith.truncf %100 : vector<8x128xf32> to vector<8x128xbf16>
    %c0_73 = arith.constant 0 : index
    %c0_74 = arith.constant 0 : index
    %145 = vector.load %arg2[%c0_73, %c0_74] : memref<128x128xbf16, #tpu.memory_space<vmem>>, vector<128x128xbf16>
    %cst_75 = arith.constant dense<0.000000e+00> : vector<8x128xf32>
    %146 = tpu.matmul %144, %145, %cst_75 {dimension_numbers = #tpu.dot_dimension_numbers<[1], [0], [0], [1], [0, 0, 1, 1], [], []>} : vector<8x128xbf16>, vector<128x128xbf16>, vector<8x128xf32> -> vector<8x128xf32>
    %147 = arith.addf %143, %146 : vector<8x128xf32>
    %148 = arith.negf %147 : vector<8x128xf32>
    %149 = math.exp %148 : vector<8x128xf32>
    %cst_76 = arith.constant 1.000000e+00 : f32
    %150 = vector.broadcast %cst_76 : f32 to vector<8x128xf32>
    %151 = arith.addf %150, %149 : vector<8x128xf32>
    %152 = arith.divf %150, %151 : vector<8x128xf32>
    %153 = math.tanh %147 : vector<8x128xf32>
    %c96_i32_77 = arith.constant 96 : i32
    %154 = tpu.dynamic_rotate %152 by %c96_i32_77 dim 1 : vector<8x128xf32>, i32 -> vector<8x128xf32>
    %c64_i32_78 = arith.constant 64 : i32
    %155 = tpu.dynamic_rotate %153 by %c64_i32_78 dim 1 : vector<8x128xf32>, i32 -> vector<8x128xf32>
    %c32_i32_79 = arith.constant 32 : i32
    %156 = tpu.dynamic_rotate %152 by %c32_i32_79 dim 1 : vector<8x128xf32>, i32 -> vector<8x128xf32>
    %157 = arith.mulf %154, %101 : vector<8x128xf32>
    %158 = arith.mulf %152, %155 : vector<8x128xf32>
    %159 = arith.addf %157, %158 : vector<8x128xf32>
    %160 = math.tanh %159 : vector<8x128xf32>
    %161 = arith.mulf %156, %160 : vector<8x128xf32>
    %c0_i32_80 = arith.constant 0 : i32
    %162 = arith.cmpi sge, %136, %c0_i32_80 : i32
    %c8_i32_81 = arith.constant 8 : i32
    %163 = arith.cmpi slt, %136, %c8_i32_81 : i32
    %164 = arith.andi %162, %163 : i1
    %165 = arith.select %164, %161, %100 : vector<8x128xf32>
    %166 = arith.select %164, %159, %101 : vector<8x128xf32>
    %c1_i32_82 = arith.constant 1 : i32
    %167 = arith.subi %c2_i32, %c1_i32_82 : i32
    %168 = arith.truncf %100 : vector<8x128xf32> to vector<8x128xbf16>
    %c0_83 = arith.constant 0 : index
    %c0_84 = arith.constant 0 : index
    %169 = vector.load %arg4[%c0_83, %c0_84] : memref<128x128xbf16, #tpu.memory_space<vmem>>, vector<128x128xbf16>
    %cst_85 = arith.constant dense<0.000000e+00> : vector<8x128xf32>
    %170 = tpu.matmul %168, %169, %cst_85 {dimension_numbers = #tpu.dot_dimension_numbers<[1], [0], [0], [1], [0, 0, 1, 1], [], []>} : vector<8x128xbf16>, vector<128x128xbf16>, vector<8x128xf32> -> vector<8x128xf32>
    %c0_86 = arith.constant 0 : index
    %c0_87 = arith.constant 0 : index
    %171 = vector.load %arg6[%c0_86, %c0_87] : memref<8x128xf32, #tpu.memory_space<vmem>>, vector<8x128xf32>
    %172 = arith.addf %170, %171 : vector<8x128xf32>
    %173 = arith.truncf %129 : vector<8x128xf32> to vector<8x128xbf16>
    %c0_88 = arith.constant 0 : index
    %c0_89 = arith.constant 0 : index
    %174 = vector.load %arg5[%c0_88, %c0_89] : memref<128x128xbf16, #tpu.memory_space<vmem>>, vector<128x128xbf16>
    %cst_90 = arith.constant dense<0.000000e+00> : vector<8x128xf32>
    %175 = tpu.matmul %173, %174, %cst_90 {dimension_numbers = #tpu.dot_dimension_numbers<[1], [0], [0], [1], [0, 0, 1, 1], [], []>} : vector<8x128xbf16>, vector<128x128xbf16>, vector<8x128xf32> -> vector<8x128xf32>
    %176 = arith.addf %172, %175 : vector<8x128xf32>
    %177 = arith.negf %176 : vector<8x128xf32>
    %178 = math.exp %177 : vector<8x128xf32>
    %cst_91 = arith.constant 1.000000e+00 : f32
    %179 = vector.broadcast %cst_91 : f32 to vector<8x128xf32>
    %180 = arith.addf %179, %178 : vector<8x128xf32>
    %181 = arith.divf %179, %180 : vector<8x128xf32>
    %182 = math.tanh %176 : vector<8x128xf32>
    %c96_i32_92 = arith.constant 96 : i32
    %183 = tpu.dynamic_rotate %181 by %c96_i32_92 dim 1 : vector<8x128xf32>, i32 -> vector<8x128xf32>
    %c64_i32_93 = arith.constant 64 : i32
    %184 = tpu.dynamic_rotate %182 by %c64_i32_93 dim 1 : vector<8x128xf32>, i32 -> vector<8x128xf32>
    %c32_i32_94 = arith.constant 32 : i32
    %185 = tpu.dynamic_rotate %181 by %c32_i32_94 dim 1 : vector<8x128xf32>, i32 -> vector<8x128xf32>
    %186 = arith.mulf %183, %130 : vector<8x128xf32>
    %187 = arith.mulf %181, %184 : vector<8x128xf32>
    %188 = arith.addf %186, %187 : vector<8x128xf32>
    %189 = math.tanh %188 : vector<8x128xf32>
    %190 = arith.mulf %185, %189 : vector<8x128xf32>
    %c0_i32_95 = arith.constant 0 : i32
    %191 = arith.cmpi sge, %167, %c0_i32_95 : i32
    %c8_i32_96 = arith.constant 8 : i32
    %192 = arith.cmpi slt, %167, %c8_i32_96 : i32
    %193 = arith.andi %191, %192 : i1
    %194 = arith.select %193, %190, %129 : vector<8x128xf32>
    %195 = arith.select %193, %188, %130 : vector<8x128xf32>
    %c4_i32_97 = arith.constant 4 : i32
    %196 = arith.cmpi sge, %167, %c4_i32_97 : i32
    %c8_i32_98 = arith.constant 8 : i32
    %197 = arith.cmpi slt, %167, %c8_i32_98 : i32
    %198 = arith.andi %196, %197 : i1
    %199 = arith.extui %198 : i1 to i32
    %c0_i32_99 = arith.constant 0 : i32
    %200 = arith.cmpi ne, %199, %c0_i32_99 : i32
    scf.if %200 {
      %c4_i32_310 = arith.constant 4 : i32
      %599 = arith.subi %167, %c4_i32_310 : i32
      %c0_i32_311 = arith.constant 0 : i32
      %600 = arith.maxsi %599, %c0_i32_311 : i32
      %c8_i32_312 = arith.constant 8 : i32
      %601 = arith.muli %600, %c8_i32_312 : i32
      %602 = tpu.assume_multiple %601, 8 : i32
      %603 = arith.index_cast %602 : i32 to index
      %c0_313 = arith.constant 0 : index
      %604 = vector.load %arg11[%603, %c0_313] : memref<32x128xf32, #tpu.memory_space<vmem>>, vector<8x128xf32>
      tpu.vector_store %arg11[%603, %c0_313], %194 {strides = array<i32>} : memref<32x128xf32, #tpu.memory_space<vmem>>, vector<8x128xf32>,
    } else {
    }
    %c3_i32 = arith.constant 3 : i32
    %c0_i32_100 = arith.constant 0 : i32
    %201 = arith.subi %c3_i32, %c0_i32_100 : i32
    %c7_i32_101 = arith.constant 7 : i32
    %202 = arith.minsi %c3_i32, %c7_i32_101 : i32
    %c8_i32_102 = arith.constant 8 : i32
    %203 = arith.muli %202, %c8_i32_102 : i32
    %204 = tpu.assume_multiple %203, 8 : i32
    %205 = arith.index_cast %204 : i32 to index
    %c0_103 = arith.constant 0 : index
    %206 = vector.load %arg10[%205, %c0_103] : memref<64x128xf32, #tpu.memory_space<vmem>>, vector<8x128xf32>
    %c0_104 = arith.constant 0 : index
    %c0_105 = arith.constant 0 : index
    %207 = vector.load %arg3[%c0_104, %c0_105] : memref<8x128xf32, #tpu.memory_space<vmem>>, vector<8x128xf32>
    %208 = arith.addf %206, %207 : vector<8x128xf32>
    %209 = arith.truncf %165 : vector<8x128xf32> to vector<8x128xbf16>
    %c0_106 = arith.constant 0 : index
    %c0_107 = arith.constant 0 : index
    %210 = vector.load %arg2[%c0_106, %c0_107] : memref<128x128xbf16, #tpu.memory_space<vmem>>, vector<128x128xbf16>
    %cst_108 = arith.constant dense<0.000000e+00> : vector<8x128xf32>
    %211 = tpu.matmul %209, %210, %cst_108 {dimension_numbers = #tpu.dot_dimension_numbers<[1], [0], [0], [1], [0, 0, 1, 1], [], []>} : vector<8x128xbf16>, vector<128x128xbf16>, vector<8x128xf32> -> vector<8x128xf32>
    %212 = arith.addf %208, %211 : vector<8x128xf32>
    %213 = arith.negf %212 : vector<8x128xf32>
    %214 = math.exp %213 : vector<8x128xf32>
    %cst_109 = arith.constant 1.000000e+00 : f32
    %215 = vector.broadcast %cst_109 : f32 to vector<8x128xf32>
    %216 = arith.addf %215, %214 : vector<8x128xf32>
    %217 = arith.divf %215, %216 : vector<8x128xf32>
    %218 = math.tanh %212 : vector<8x128xf32>
    %c96_i32_110 = arith.constant 96 : i32
    %219 = tpu.dynamic_rotate %217 by %c96_i32_110 dim 1 : vector<8x128xf32>, i32 -> vector<8x128xf32>
    %c64_i32_111 = arith.constant 64 : i32
    %220 = tpu.dynamic_rotate %218 by %c64_i32_111 dim 1 : vector<8x128xf32>, i32 -> vector<8x128xf32>
    %c32_i32_112 = arith.constant 32 : i32
    %221 = tpu.dynamic_rotate %217 by %c32_i32_112 dim 1 : vector<8x128xf32>, i32 -> vector<8x128xf32>
    %222 = arith.mulf %219, %166 : vector<8x128xf32>
    %223 = arith.mulf %217, %220 : vector<8x128xf32>
    %224 = arith.addf %222, %223 : vector<8x128xf32>
    %225 = math.tanh %224 : vector<8x128xf32>
    %226 = arith.mulf %221, %225 : vector<8x128xf32>
    %c0_i32_113 = arith.constant 0 : i32
    %227 = arith.cmpi sge, %201, %c0_i32_113 : i32
    %c8_i32_114 = arith.constant 8 : i32
    %228 = arith.cmpi slt, %201, %c8_i32_114 : i32
    %229 = arith.andi %227, %228 : i1
    %230 = arith.select %229, %226, %165 : vector<8x128xf32>
    %231 = arith.select %229, %224, %166 : vector<8x128xf32>
    %c1_i32_115 = arith.constant 1 : i32
    %232 = arith.subi %c3_i32, %c1_i32_115 : i32
    %233 = arith.truncf %165 : vector<8x128xf32> to vector<8x128xbf16>
    %c0_116 = arith.constant 0 : index
    %c0_117 = arith.constant 0 : index
    %234 = vector.load %arg4[%c0_116, %c0_117] : memref<128x128xbf16, #tpu.memory_space<vmem>>, vector<128x128xbf16>
    %cst_118 = arith.constant dense<0.000000e+00> : vector<8x128xf32>
    %235 = tpu.matmul %233, %234, %cst_118 {dimension_numbers = #tpu.dot_dimension_numbers<[1], [0], [0], [1], [0, 0, 1, 1], [], []>} : vector<8x128xbf16>, vector<128x128xbf16>, vector<8x128xf32> -> vector<8x128xf32>
    %c0_119 = arith.constant 0 : index
    %c0_120 = arith.constant 0 : index
    %236 = vector.load %arg6[%c0_119, %c0_120] : memref<8x128xf32, #tpu.memory_space<vmem>>, vector<8x128xf32>
    %237 = arith.addf %235, %236 : vector<8x128xf32>
    %238 = arith.truncf %194 : vector<8x128xf32> to vector<8x128xbf16>
    %c0_121 = arith.constant 0 : index
    %c0_122 = arith.constant 0 : index
    %239 = vector.load %arg5[%c0_121, %c0_122] : memref<128x128xbf16, #tpu.memory_space<vmem>>, vector<128x128xbf16>
    %cst_123 = arith.constant dense<0.000000e+00> : vector<8x128xf32>
    %240 = tpu.matmul %238, %239, %cst_123 {dimension_numbers = #tpu.dot_dimension_numbers<[1], [0], [0], [1], [0, 0, 1, 1], [], []>} : vector<8x128xbf16>, vector<128x128xbf16>, vector<8x128xf32> -> vector<8x128xf32>
    %241 = arith.addf %237, %240 : vector<8x128xf32>
    %242 = arith.negf %241 : vector<8x128xf32>
    %243 = math.exp %242 : vector<8x128xf32>
    %cst_124 = arith.constant 1.000000e+00 : f32
    %244 = vector.broadcast %cst_124 : f32 to vector<8x128xf32>
    %245 = arith.addf %244, %243 : vector<8x128xf32>
    %246 = arith.divf %244, %245 : vector<8x128xf32>
    %247 = math.tanh %241 : vector<8x128xf32>
    %c96_i32_125 = arith.constant 96 : i32
    %248 = tpu.dynamic_rotate %246 by %c96_i32_125 dim 1 : vector<8x128xf32>, i32 -> vector<8x128xf32>
    %c64_i32_126 = arith.constant 64 : i32
    %249 = tpu.dynamic_rotate %247 by %c64_i32_126 dim 1 : vector<8x128xf32>, i32 -> vector<8x128xf32>
    %c32_i32_127 = arith.constant 32 : i32
    %250 = tpu.dynamic_rotate %246 by %c32_i32_127 dim 1 : vector<8x128xf32>, i32 -> vector<8x128xf32>
    %251 = arith.mulf %248, %195 : vector<8x128xf32>
    %252 = arith.mulf %246, %249 : vector<8x128xf32>
    %253 = arith.addf %251, %252 : vector<8x128xf32>
    %254 = math.tanh %253 : vector<8x128xf32>
    %255 = arith.mulf %250, %254 : vector<8x128xf32>
    %c0_i32_128 = arith.constant 0 : i32
    %256 = arith.cmpi sge, %232, %c0_i32_128 : i32
    %c8_i32_129 = arith.constant 8 : i32
    %257 = arith.cmpi slt, %232, %c8_i32_129 : i32
    %258 = arith.andi %256, %257 : i1
    %259 = arith.select %258, %255, %194 : vector<8x128xf32>
    %260 = arith.select %258, %253, %195 : vector<8x128xf32>
    %c4_i32_130 = arith.constant 4 : i32
    %261 = arith.cmpi sge, %232, %c4_i32_130 : i32
    %c8_i32_131 = arith.constant 8 : i32
    %262 = arith.cmpi slt, %232, %c8_i32_131 : i32
    %263 = arith.andi %261, %262 : i1
    %264 = arith.extui %263 : i1 to i32
    %c0_i32_132 = arith.constant 0 : i32
    %265 = arith.cmpi ne, %264, %c0_i32_132 : i32
    scf.if %265 {
      %c4_i32_310 = arith.constant 4 : i32
      %599 = arith.subi %232, %c4_i32_310 : i32
      %c0_i32_311 = arith.constant 0 : i32
      %600 = arith.maxsi %599, %c0_i32_311 : i32
      %c8_i32_312 = arith.constant 8 : i32
      %601 = arith.muli %600, %c8_i32_312 : i32
      %602 = tpu.assume_multiple %601, 8 : i32
      %603 = arith.index_cast %602 : i32 to index
      %c0_313 = arith.constant 0 : index
      %604 = vector.load %arg11[%603, %c0_313] : memref<32x128xf32, #tpu.memory_space<vmem>>, vector<8x128xf32>
      tpu.vector_store %arg11[%603, %c0_313], %259 {strides = array<i32>} : memref<32x128xf32, #tpu.memory_space<vmem>>, vector<8x128xf32>,
    } else {
    }
    %c4_i32_133 = arith.constant 4 : i32
    %c0_i32_134 = arith.constant 0 : i32
    %266 = arith.subi %c4_i32_133, %c0_i32_134 : i32
    %c7_i32_135 = arith.constant 7 : i32
    %267 = arith.minsi %c4_i32_133, %c7_i32_135 : i32
    %c8_i32_136 = arith.constant 8 : i32
    %268 = arith.muli %267, %c8_i32_136 : i32
    %269 = tpu.assume_multiple %268, 8 : i32
    %270 = arith.index_cast %269 : i32 to index
    %c0_137 = arith.constant 0 : index
    %271 = vector.load %arg10[%270, %c0_137] : memref<64x128xf32, #tpu.memory_space<vmem>>, vector<8x128xf32>
    %c0_138 = arith.constant 0 : index
    %c0_139 = arith.constant 0 : index
    %272 = vector.load %arg3[%c0_138, %c0_139] : memref<8x128xf32, #tpu.memory_space<vmem>>, vector<8x128xf32>
    %273 = arith.addf %271, %272 : vector<8x128xf32>
    %274 = arith.truncf %230 : vector<8x128xf32> to vector<8x128xbf16>
    %c0_140 = arith.constant 0 : index
    %c0_141 = arith.constant 0 : index
    %275 = vector.load %arg2[%c0_140, %c0_141] : memref<128x128xbf16, #tpu.memory_space<vmem>>, vector<128x128xbf16>
    %cst_142 = arith.constant dense<0.000000e+00> : vector<8x128xf32>
    %276 = tpu.matmul %274, %275, %cst_142 {dimension_numbers = #tpu.dot_dimension_numbers<[1], [0], [0], [1], [0, 0, 1, 1], [], []>} : vector<8x128xbf16>, vector<128x128xbf16>, vector<8x128xf32> -> vector<8x128xf32>
    %277 = arith.addf %273, %276 : vector<8x128xf32>
    %278 = arith.negf %277 : vector<8x128xf32>
    %279 = math.exp %278 : vector<8x128xf32>
    %cst_143 = arith.constant 1.000000e+00 : f32
    %280 = vector.broadcast %cst_143 : f32 to vector<8x128xf32>
    %281 = arith.addf %280, %279 : vector<8x128xf32>
    %282 = arith.divf %280, %281 : vector<8x128xf32>
    %283 = math.tanh %277 : vector<8x128xf32>
    %c96_i32_144 = arith.constant 96 : i32
    %284 = tpu.dynamic_rotate %282 by %c96_i32_144 dim 1 : vector<8x128xf32>, i32 -> vector<8x128xf32>
    %c64_i32_145 = arith.constant 64 : i32
    %285 = tpu.dynamic_rotate %283 by %c64_i32_145 dim 1 : vector<8x128xf32>, i32 -> vector<8x128xf32>
    %c32_i32_146 = arith.constant 32 : i32
    %286 = tpu.dynamic_rotate %282 by %c32_i32_146 dim 1 : vector<8x128xf32>, i32 -> vector<8x128xf32>
    %287 = arith.mulf %284, %231 : vector<8x128xf32>
    %288 = arith.mulf %282, %285 : vector<8x128xf32>
    %289 = arith.addf %287, %288 : vector<8x128xf32>
    %290 = math.tanh %289 : vector<8x128xf32>
    %291 = arith.mulf %286, %290 : vector<8x128xf32>
    %c0_i32_147 = arith.constant 0 : i32
    %292 = arith.cmpi sge, %266, %c0_i32_147 : i32
    %c8_i32_148 = arith.constant 8 : i32
    %293 = arith.cmpi slt, %266, %c8_i32_148 : i32
    %294 = arith.andi %292, %293 : i1
    %295 = arith.select %294, %291, %230 : vector<8x128xf32>
    %296 = arith.select %294, %289, %231 : vector<8x128xf32>
    %c1_i32_149 = arith.constant 1 : i32
    %297 = arith.subi %c4_i32_133, %c1_i32_149 : i32
    %298 = arith.truncf %230 : vector<8x128xf32> to vector<8x128xbf16>
    %c0_150 = arith.constant 0 : index
    %c0_151 = arith.constant 0 : index
    %299 = vector.load %arg4[%c0_150, %c0_151] : memref<128x128xbf16, #tpu.memory_space<vmem>>, vector<128x128xbf16>
    %cst_152 = arith.constant dense<0.000000e+00> : vector<8x128xf32>
    %300 = tpu.matmul %298, %299, %cst_152 {dimension_numbers = #tpu.dot_dimension_numbers<[1], [0], [0], [1], [0, 0, 1, 1], [], []>} : vector<8x128xbf16>, vector<128x128xbf16>, vector<8x128xf32> -> vector<8x128xf32>
    %c0_153 = arith.constant 0 : index
    %c0_154 = arith.constant 0 : index
    %301 = vector.load %arg6[%c0_153, %c0_154] : memref<8x128xf32, #tpu.memory_space<vmem>>, vector<8x128xf32>
    %302 = arith.addf %300, %301 : vector<8x128xf32>
    %303 = arith.truncf %259 : vector<8x128xf32> to vector<8x128xbf16>
    %c0_155 = arith.constant 0 : index
    %c0_156 = arith.constant 0 : index
    %304 = vector.load %arg5[%c0_155, %c0_156] : memref<128x128xbf16, #tpu.memory_space<vmem>>, vector<128x128xbf16>
    %cst_157 = arith.constant dense<0.000000e+00> : vector<8x128xf32>
    %305 = tpu.matmul %303, %304, %cst_157 {dimension_numbers = #tpu.dot_dimension_numbers<[1], [0], [0], [1], [0, 0, 1, 1], [], []>} : vector<8x128xbf16>, vector<128x128xbf16>, vector<8x128xf32> -> vector<8x128xf32>
    %306 = arith.addf %302, %305 : vector<8x128xf32>
    %307 = arith.negf %306 : vector<8x128xf32>
    %308 = math.exp %307 : vector<8x128xf32>
    %cst_158 = arith.constant 1.000000e+00 : f32
    %309 = vector.broadcast %cst_158 : f32 to vector<8x128xf32>
    %310 = arith.addf %309, %308 : vector<8x128xf32>
    %311 = arith.divf %309, %310 : vector<8x128xf32>
    %312 = math.tanh %306 : vector<8x128xf32>
    %c96_i32_159 = arith.constant 96 : i32
    %313 = tpu.dynamic_rotate %311 by %c96_i32_159 dim 1 : vector<8x128xf32>, i32 -> vector<8x128xf32>
    %c64_i32_160 = arith.constant 64 : i32
    %314 = tpu.dynamic_rotate %312 by %c64_i32_160 dim 1 : vector<8x128xf32>, i32 -> vector<8x128xf32>
    %c32_i32_161 = arith.constant 32 : i32
    %315 = tpu.dynamic_rotate %311 by %c32_i32_161 dim 1 : vector<8x128xf32>, i32 -> vector<8x128xf32>
    %316 = arith.mulf %313, %260 : vector<8x128xf32>
    %317 = arith.mulf %311, %314 : vector<8x128xf32>
    %318 = arith.addf %316, %317 : vector<8x128xf32>
    %319 = math.tanh %318 : vector<8x128xf32>
    %320 = arith.mulf %315, %319 : vector<8x128xf32>
    %c0_i32_162 = arith.constant 0 : i32
    %321 = arith.cmpi sge, %297, %c0_i32_162 : i32
    %c8_i32_163 = arith.constant 8 : i32
    %322 = arith.cmpi slt, %297, %c8_i32_163 : i32
    %323 = arith.andi %321, %322 : i1
    %324 = arith.select %323, %320, %259 : vector<8x128xf32>
    %325 = arith.select %323, %318, %260 : vector<8x128xf32>
    %c4_i32_164 = arith.constant 4 : i32
    %326 = arith.cmpi sge, %297, %c4_i32_164 : i32
    %c8_i32_165 = arith.constant 8 : i32
    %327 = arith.cmpi slt, %297, %c8_i32_165 : i32
    %328 = arith.andi %326, %327 : i1
    %329 = arith.extui %328 : i1 to i32
    %c0_i32_166 = arith.constant 0 : i32
    %330 = arith.cmpi ne, %329, %c0_i32_166 : i32
    scf.if %330 {
      %c4_i32_310 = arith.constant 4 : i32
      %599 = arith.subi %297, %c4_i32_310 : i32
      %c0_i32_311 = arith.constant 0 : i32
      %600 = arith.maxsi %599, %c0_i32_311 : i32
      %c8_i32_312 = arith.constant 8 : i32
      %601 = arith.muli %600, %c8_i32_312 : i32
      %602 = tpu.assume_multiple %601, 8 : i32
      %603 = arith.index_cast %602 : i32 to index
      %c0_313 = arith.constant 0 : index
      %604 = vector.load %arg11[%603, %c0_313] : memref<32x128xf32, #tpu.memory_space<vmem>>, vector<8x128xf32>
      tpu.vector_store %arg11[%603, %c0_313], %324 {strides = array<i32>} : memref<32x128xf32, #tpu.memory_space<vmem>>, vector<8x128xf32>,
    } else {
    }
    %c5_i32 = arith.constant 5 : i32
    %c0_i32_167 = arith.constant 0 : i32
    %331 = arith.subi %c5_i32, %c0_i32_167 : i32
    %c7_i32_168 = arith.constant 7 : i32
    %332 = arith.minsi %c5_i32, %c7_i32_168 : i32
    %c8_i32_169 = arith.constant 8 : i32
    %333 = arith.muli %332, %c8_i32_169 : i32
    %334 = tpu.assume_multiple %333, 8 : i32
    %335 = arith.index_cast %334 : i32 to index
    %c0_170 = arith.constant 0 : index
    %336 = vector.load %arg10[%335, %c0_170] : memref<64x128xf32, #tpu.memory_space<vmem>>, vector<8x128xf32>
    %c0_171 = arith.constant 0 : index
    %c0_172 = arith.constant 0 : index
    %337 = vector.load %arg3[%c0_171, %c0_172] : memref<8x128xf32, #tpu.memory_space<vmem>>, vector<8x128xf32>
    %338 = arith.addf %336, %337 : vector<8x128xf32>
    %339 = arith.truncf %295 : vector<8x128xf32> to vector<8x128xbf16>
    %c0_173 = arith.constant 0 : index
    %c0_174 = arith.constant 0 : index
    %340 = vector.load %arg2[%c0_173, %c0_174] : memref<128x128xbf16, #tpu.memory_space<vmem>>, vector<128x128xbf16>
    %cst_175 = arith.constant dense<0.000000e+00> : vector<8x128xf32>
    %341 = tpu.matmul %339, %340, %cst_175 {dimension_numbers = #tpu.dot_dimension_numbers<[1], [0], [0], [1], [0, 0, 1, 1], [], []>} : vector<8x128xbf16>, vector<128x128xbf16>, vector<8x128xf32> -> vector<8x128xf32>
    %342 = arith.addf %338, %341 : vector<8x128xf32>
    %343 = arith.negf %342 : vector<8x128xf32>
    %344 = math.exp %343 : vector<8x128xf32>
    %cst_176 = arith.constant 1.000000e+00 : f32
    %345 = vector.broadcast %cst_176 : f32 to vector<8x128xf32>
    %346 = arith.addf %345, %344 : vector<8x128xf32>
    %347 = arith.divf %345, %346 : vector<8x128xf32>
    %348 = math.tanh %342 : vector<8x128xf32>
    %c96_i32_177 = arith.constant 96 : i32
    %349 = tpu.dynamic_rotate %347 by %c96_i32_177 dim 1 : vector<8x128xf32>, i32 -> vector<8x128xf32>
    %c64_i32_178 = arith.constant 64 : i32
    %350 = tpu.dynamic_rotate %348 by %c64_i32_178 dim 1 : vector<8x128xf32>, i32 -> vector<8x128xf32>
    %c32_i32_179 = arith.constant 32 : i32
    %351 = tpu.dynamic_rotate %347 by %c32_i32_179 dim 1 : vector<8x128xf32>, i32 -> vector<8x128xf32>
    %352 = arith.mulf %349, %296 : vector<8x128xf32>
    %353 = arith.mulf %347, %350 : vector<8x128xf32>
    %354 = arith.addf %352, %353 : vector<8x128xf32>
    %355 = math.tanh %354 : vector<8x128xf32>
    %356 = arith.mulf %351, %355 : vector<8x128xf32>
    %c0_i32_180 = arith.constant 0 : i32
    %357 = arith.cmpi sge, %331, %c0_i32_180 : i32
    %c8_i32_181 = arith.constant 8 : i32
    %358 = arith.cmpi slt, %331, %c8_i32_181 : i32
    %359 = arith.andi %357, %358 : i1
    %360 = arith.select %359, %356, %295 : vector<8x128xf32>
    %361 = arith.select %359, %354, %296 : vector<8x128xf32>
    %c1_i32_182 = arith.constant 1 : i32
    %362 = arith.subi %c5_i32, %c1_i32_182 : i32
    %363 = arith.truncf %295 : vector<8x128xf32> to vector<8x128xbf16>
    %c0_183 = arith.constant 0 : index
    %c0_184 = arith.constant 0 : index
    %364 = vector.load %arg4[%c0_183, %c0_184] : memref<128x128xbf16, #tpu.memory_space<vmem>>, vector<128x128xbf16>
    %cst_185 = arith.constant dense<0.000000e+00> : vector<8x128xf32>
    %365 = tpu.matmul %363, %364, %cst_185 {dimension_numbers = #tpu.dot_dimension_numbers<[1], [0], [0], [1], [0, 0, 1, 1], [], []>} : vector<8x128xbf16>, vector<128x128xbf16>, vector<8x128xf32> -> vector<8x128xf32>
    %c0_186 = arith.constant 0 : index
    %c0_187 = arith.constant 0 : index
    %366 = vector.load %arg6[%c0_186, %c0_187] : memref<8x128xf32, #tpu.memory_space<vmem>>, vector<8x128xf32>
    %367 = arith.addf %365, %366 : vector<8x128xf32>
    %368 = arith.truncf %324 : vector<8x128xf32> to vector<8x128xbf16>
    %c0_188 = arith.constant 0 : index
    %c0_189 = arith.constant 0 : index
    %369 = vector.load %arg5[%c0_188, %c0_189] : memref<128x128xbf16, #tpu.memory_space<vmem>>, vector<128x128xbf16>
    %cst_190 = arith.constant dense<0.000000e+00> : vector<8x128xf32>
    %370 = tpu.matmul %368, %369, %cst_190 {dimension_numbers = #tpu.dot_dimension_numbers<[1], [0], [0], [1], [0, 0, 1, 1], [], []>} : vector<8x128xbf16>, vector<128x128xbf16>, vector<8x128xf32> -> vector<8x128xf32>
    %371 = arith.addf %367, %370 : vector<8x128xf32>
    %372 = arith.negf %371 : vector<8x128xf32>
    %373 = math.exp %372 : vector<8x128xf32>
    %cst_191 = arith.constant 1.000000e+00 : f32
    %374 = vector.broadcast %cst_191 : f32 to vector<8x128xf32>
    %375 = arith.addf %374, %373 : vector<8x128xf32>
    %376 = arith.divf %374, %375 : vector<8x128xf32>
    %377 = math.tanh %371 : vector<8x128xf32>
    %c96_i32_192 = arith.constant 96 : i32
    %378 = tpu.dynamic_rotate %376 by %c96_i32_192 dim 1 : vector<8x128xf32>, i32 -> vector<8x128xf32>
    %c64_i32_193 = arith.constant 64 : i32
    %379 = tpu.dynamic_rotate %377 by %c64_i32_193 dim 1 : vector<8x128xf32>, i32 -> vector<8x128xf32>
    %c32_i32_194 = arith.constant 32 : i32
    %380 = tpu.dynamic_rotate %376 by %c32_i32_194 dim 1 : vector<8x128xf32>, i32 -> vector<8x128xf32>
    %381 = arith.mulf %378, %325 : vector<8x128xf32>
    %382 = arith.mulf %376, %379 : vector<8x128xf32>
    %383 = arith.addf %381, %382 : vector<8x128xf32>
    %384 = math.tanh %383 : vector<8x128xf32>
    %385 = arith.mulf %380, %384 : vector<8x128xf32>
    %c0_i32_195 = arith.constant 0 : i32
    %386 = arith.cmpi sge, %362, %c0_i32_195 : i32
    %c8_i32_196 = arith.constant 8 : i32
    %387 = arith.cmpi slt, %362, %c8_i32_196 : i32
    %388 = arith.andi %386, %387 : i1
    %389 = arith.select %388, %385, %324 : vector<8x128xf32>
    %390 = arith.select %388, %383, %325 : vector<8x128xf32>
    %c4_i32_197 = arith.constant 4 : i32
    %391 = arith.cmpi sge, %362, %c4_i32_197 : i32
    %c8_i32_198 = arith.constant 8 : i32
    %392 = arith.cmpi slt, %362, %c8_i32_198 : i32
    %393 = arith.andi %391, %392 : i1
    %394 = arith.extui %393 : i1 to i32
    %c0_i32_199 = arith.constant 0 : i32
    %395 = arith.cmpi ne, %394, %c0_i32_199 : i32
    scf.if %395 {
      %c4_i32_310 = arith.constant 4 : i32
      %599 = arith.subi %362, %c4_i32_310 : i32
      %c0_i32_311 = arith.constant 0 : i32
      %600 = arith.maxsi %599, %c0_i32_311 : i32
      %c8_i32_312 = arith.constant 8 : i32
      %601 = arith.muli %600, %c8_i32_312 : i32
      %602 = tpu.assume_multiple %601, 8 : i32
      %603 = arith.index_cast %602 : i32 to index
      %c0_313 = arith.constant 0 : index
      %604 = vector.load %arg11[%603, %c0_313] : memref<32x128xf32, #tpu.memory_space<vmem>>, vector<8x128xf32>
      tpu.vector_store %arg11[%603, %c0_313], %389 {strides = array<i32>} : memref<32x128xf32, #tpu.memory_space<vmem>>, vector<8x128xf32>,
    } else {
    }
    %c6_i32 = arith.constant 6 : i32
    %c0_i32_200 = arith.constant 0 : i32
    %396 = arith.subi %c6_i32, %c0_i32_200 : i32
    %c7_i32_201 = arith.constant 7 : i32
    %397 = arith.minsi %c6_i32, %c7_i32_201 : i32
    %c8_i32_202 = arith.constant 8 : i32
    %398 = arith.muli %397, %c8_i32_202 : i32
    %399 = tpu.assume_multiple %398, 8 : i32
    %400 = arith.index_cast %399 : i32 to index
    %c0_203 = arith.constant 0 : index
    %401 = vector.load %arg10[%400, %c0_203] : memref<64x128xf32, #tpu.memory_space<vmem>>, vector<8x128xf32>
    %c0_204 = arith.constant 0 : index
    %c0_205 = arith.constant 0 : index
    %402 = vector.load %arg3[%c0_204, %c0_205] : memref<8x128xf32, #tpu.memory_space<vmem>>, vector<8x128xf32>
    %403 = arith.addf %401, %402 : vector<8x128xf32>
    %404 = arith.truncf %360 : vector<8x128xf32> to vector<8x128xbf16>
    %c0_206 = arith.constant 0 : index
    %c0_207 = arith.constant 0 : index
    %405 = vector.load %arg2[%c0_206, %c0_207] : memref<128x128xbf16, #tpu.memory_space<vmem>>, vector<128x128xbf16>
    %cst_208 = arith.constant dense<0.000000e+00> : vector<8x128xf32>
    %406 = tpu.matmul %404, %405, %cst_208 {dimension_numbers = #tpu.dot_dimension_numbers<[1], [0], [0], [1], [0, 0, 1, 1], [], []>} : vector<8x128xbf16>, vector<128x128xbf16>, vector<8x128xf32> -> vector<8x128xf32>
    %407 = arith.addf %403, %406 : vector<8x128xf32>
    %408 = arith.negf %407 : vector<8x128xf32>
    %409 = math.exp %408 : vector<8x128xf32>
    %cst_209 = arith.constant 1.000000e+00 : f32
    %410 = vector.broadcast %cst_209 : f32 to vector<8x128xf32>
    %411 = arith.addf %410, %409 : vector<8x128xf32>
    %412 = arith.divf %410, %411 : vector<8x128xf32>
    %413 = math.tanh %407 : vector<8x128xf32>
    %c96_i32_210 = arith.constant 96 : i32
    %414 = tpu.dynamic_rotate %412 by %c96_i32_210 dim 1 : vector<8x128xf32>, i32 -> vector<8x128xf32>
    %c64_i32_211 = arith.constant 64 : i32
    %415 = tpu.dynamic_rotate %413 by %c64_i32_211 dim 1 : vector<8x128xf32>, i32 -> vector<8x128xf32>
    %c32_i32_212 = arith.constant 32 : i32
    %416 = tpu.dynamic_rotate %412 by %c32_i32_212 dim 1 : vector<8x128xf32>, i32 -> vector<8x128xf32>
    %417 = arith.mulf %414, %361 : vector<8x128xf32>
    %418 = arith.mulf %412, %415 : vector<8x128xf32>
    %419 = arith.addf %417, %418 : vector<8x128xf32>
    %420 = math.tanh %419 : vector<8x128xf32>
    %421 = arith.mulf %416, %420 : vector<8x128xf32>
    %c0_i32_213 = arith.constant 0 : i32
    %422 = arith.cmpi sge, %396, %c0_i32_213 : i32
    %c8_i32_214 = arith.constant 8 : i32
    %423 = arith.cmpi slt, %396, %c8_i32_214 : i32
    %424 = arith.andi %422, %423 : i1
    %425 = arith.select %424, %421, %360 : vector<8x128xf32>
    %426 = arith.select %424, %419, %361 : vector<8x128xf32>
    %c1_i32_215 = arith.constant 1 : i32
    %427 = arith.subi %c6_i32, %c1_i32_215 : i32
    %428 = arith.truncf %360 : vector<8x128xf32> to vector<8x128xbf16>
    %c0_216 = arith.constant 0 : index
    %c0_217 = arith.constant 0 : index
    %429 = vector.load %arg4[%c0_216, %c0_217] : memref<128x128xbf16, #tpu.memory_space<vmem>>, vector<128x128xbf16>
    %cst_218 = arith.constant dense<0.000000e+00> : vector<8x128xf32>
    %430 = tpu.matmul %428, %429, %cst_218 {dimension_numbers = #tpu.dot_dimension_numbers<[1], [0], [0], [1], [0, 0, 1, 1], [], []>} : vector<8x128xbf16>, vector<128x128xbf16>, vector<8x128xf32> -> vector<8x128xf32>
    %c0_219 = arith.constant 0 : index
    %c0_220 = arith.constant 0 : index
    %431 = vector.load %arg6[%c0_219, %c0_220] : memref<8x128xf32, #tpu.memory_space<vmem>>, vector<8x128xf32>
    %432 = arith.addf %430, %431 : vector<8x128xf32>
    %433 = arith.truncf %389 : vector<8x128xf32> to vector<8x128xbf16>
    %c0_221 = arith.constant 0 : index
    %c0_222 = arith.constant 0 : index
    %434 = vector.load %arg5[%c0_221, %c0_222] : memref<128x128xbf16, #tpu.memory_space<vmem>>, vector<128x128xbf16>
    %cst_223 = arith.constant dense<0.000000e+00> : vector<8x128xf32>
    %435 = tpu.matmul %433, %434, %cst_223 {dimension_numbers = #tpu.dot_dimension_numbers<[1], [0], [0], [1], [0, 0, 1, 1], [], []>} : vector<8x128xbf16>, vector<128x128xbf16>, vector<8x128xf32> -> vector<8x128xf32>
    %436 = arith.addf %432, %435 : vector<8x128xf32>
    %437 = arith.negf %436 : vector<8x128xf32>
    %438 = math.exp %437 : vector<8x128xf32>
    %cst_224 = arith.constant 1.000000e+00 : f32
    %439 = vector.broadcast %cst_224 : f32 to vector<8x128xf32>
    %440 = arith.addf %439, %438 : vector<8x128xf32>
    %441 = arith.divf %439, %440 : vector<8x128xf32>
    %442 = math.tanh %436 : vector<8x128xf32>
    %c96_i32_225 = arith.constant 96 : i32
    %443 = tpu.dynamic_rotate %441 by %c96_i32_225 dim 1 : vector<8x128xf32>, i32 -> vector<8x128xf32>
    %c64_i32_226 = arith.constant 64 : i32
    %444 = tpu.dynamic_rotate %442 by %c64_i32_226 dim 1 : vector<8x128xf32>, i32 -> vector<8x128xf32>
    %c32_i32_227 = arith.constant 32 : i32
    %445 = tpu.dynamic_rotate %441 by %c32_i32_227 dim 1 : vector<8x128xf32>, i32 -> vector<8x128xf32>
    %446 = arith.mulf %443, %390 : vector<8x128xf32>
    %447 = arith.mulf %441, %444 : vector<8x128xf32>
    %448 = arith.addf %446, %447 : vector<8x128xf32>
    %449 = math.tanh %448 : vector<8x128xf32>
    %450 = arith.mulf %445, %449 : vector<8x128xf32>
    %c0_i32_228 = arith.constant 0 : i32
    %451 = arith.cmpi sge, %427, %c0_i32_228 : i32
    %c8_i32_229 = arith.constant 8 : i32
    %452 = arith.cmpi slt, %427, %c8_i32_229 : i32
    %453 = arith.andi %451, %452 : i1
    %454 = arith.select %453, %450, %389 : vector<8x128xf32>
    %455 = arith.select %453, %448, %390 : vector<8x128xf32>
    %c4_i32_230 = arith.constant 4 : i32
    %456 = arith.cmpi sge, %427, %c4_i32_230 : i32
    %c8_i32_231 = arith.constant 8 : i32
    %457 = arith.cmpi slt, %427, %c8_i32_231 : i32
    %458 = arith.andi %456, %457 : i1
    %459 = arith.extui %458 : i1 to i32
    %c0_i32_232 = arith.constant 0 : i32
    %460 = arith.cmpi ne, %459, %c0_i32_232 : i32
    scf.if %460 {
      %c4_i32_310 = arith.constant 4 : i32
      %599 = arith.subi %427, %c4_i32_310 : i32
      %c0_i32_311 = arith.constant 0 : i32
      %600 = arith.maxsi %599, %c0_i32_311 : i32
      %c8_i32_312 = arith.constant 8 : i32
      %601 = arith.muli %600, %c8_i32_312 : i32
      %602 = tpu.assume_multiple %601, 8 : i32
      %603 = arith.index_cast %602 : i32 to index
      %c0_313 = arith.constant 0 : index
      %604 = vector.load %arg11[%603, %c0_313] : memref<32x128xf32, #tpu.memory_space<vmem>>, vector<8x128xf32>
      tpu.vector_store %arg11[%603, %c0_313], %454 {strides = array<i32>} : memref<32x128xf32, #tpu.memory_space<vmem>>, vector<8x128xf32>,
    } else {
    }
    %c7_i32_233 = arith.constant 7 : i32
    %c0_i32_234 = arith.constant 0 : i32
    %461 = arith.subi %c7_i32_233, %c0_i32_234 : i32
    %c7_i32_235 = arith.constant 7 : i32
    %462 = arith.minsi %c7_i32_233, %c7_i32_235 : i32
    %c8_i32_236 = arith.constant 8 : i32
    %463 = arith.muli %462, %c8_i32_236 : i32
    %464 = tpu.assume_multiple %463, 8 : i32
    %465 = arith.index_cast %464 : i32 to index
    %c0_237 = arith.constant 0 : index
    %466 = vector.load %arg10[%465, %c0_237] : memref<64x128xf32, #tpu.memory_space<vmem>>, vector<8x128xf32>
    %c0_238 = arith.constant 0 : index
    %c0_239 = arith.constant 0 : index
    %467 = vector.load %arg3[%c0_238, %c0_239] : memref<8x128xf32, #tpu.memory_space<vmem>>, vector<8x128xf32>
    %468 = arith.addf %466, %467 : vector<8x128xf32>
    %469 = arith.truncf %425 : vector<8x128xf32> to vector<8x128xbf16>
    %c0_240 = arith.constant 0 : index
    %c0_241 = arith.constant 0 : index
    %470 = vector.load %arg2[%c0_240, %c0_241] : memref<128x128xbf16, #tpu.memory_space<vmem>>, vector<128x128xbf16>
    %cst_242 = arith.constant dense<0.000000e+00> : vector<8x128xf32>
    %471 = tpu.matmul %469, %470, %cst_242 {dimension_numbers = #tpu.dot_dimension_numbers<[1], [0], [0], [1], [0, 0, 1, 1], [], []>} : vector<8x128xbf16>, vector<128x128xbf16>, vector<8x128xf32> -> vector<8x128xf32>
    %472 = arith.addf %468, %471 : vector<8x128xf32>
    %473 = arith.negf %472 : vector<8x128xf32>
    %474 = math.exp %473 : vector<8x128xf32>
    %cst_243 = arith.constant 1.000000e+00 : f32
    %475 = vector.broadcast %cst_243 : f32 to vector<8x128xf32>
    %476 = arith.addf %475, %474 : vector<8x128xf32>
    %477 = arith.divf %475, %476 : vector<8x128xf32>
    %478 = math.tanh %472 : vector<8x128xf32>
    %c96_i32_244 = arith.constant 96 : i32
    %479 = tpu.dynamic_rotate %477 by %c96_i32_244 dim 1 : vector<8x128xf32>, i32 -> vector<8x128xf32>
    %c64_i32_245 = arith.constant 64 : i32
    %480 = tpu.dynamic_rotate %478 by %c64_i32_245 dim 1 : vector<8x128xf32>, i32 -> vector<8x128xf32>
    %c32_i32_246 = arith.constant 32 : i32
    %481 = tpu.dynamic_rotate %477 by %c32_i32_246 dim 1 : vector<8x128xf32>, i32 -> vector<8x128xf32>
    %482 = arith.mulf %479, %426 : vector<8x128xf32>
    %483 = arith.mulf %477, %480 : vector<8x128xf32>
    %484 = arith.addf %482, %483 : vector<8x128xf32>
    %485 = math.tanh %484 : vector<8x128xf32>
    %486 = arith.mulf %481, %485 : vector<8x128xf32>
    %c0_i32_247 = arith.constant 0 : i32
    %487 = arith.cmpi sge, %461, %c0_i32_247 : i32
    %c8_i32_248 = arith.constant 8 : i32
    %488 = arith.cmpi slt, %461, %c8_i32_248 : i32
    %489 = arith.andi %487, %488 : i1
    %490 = arith.select %489, %486, %425 : vector<8x128xf32>
    %491 = arith.select %489, %484, %426 : vector<8x128xf32>
    %c1_i32_249 = arith.constant 1 : i32
    %492 = arith.subi %c7_i32_233, %c1_i32_249 : i32
    %493 = arith.truncf %425 : vector<8x128xf32> to vector<8x128xbf16>
    %c0_250 = arith.constant 0 : index
    %c0_251 = arith.constant 0 : index
    %494 = vector.load %arg4[%c0_250, %c0_251] : memref<128x128xbf16, #tpu.memory_space<vmem>>, vector<128x128xbf16>
    %cst_252 = arith.constant dense<0.000000e+00> : vector<8x128xf32>
    %495 = tpu.matmul %493, %494, %cst_252 {dimension_numbers = #tpu.dot_dimension_numbers<[1], [0], [0], [1], [0, 0, 1, 1], [], []>} : vector<8x128xbf16>, vector<128x128xbf16>, vector<8x128xf32> -> vector<8x128xf32>
    %c0_253 = arith.constant 0 : index
    %c0_254 = arith.constant 0 : index
    %496 = vector.load %arg6[%c0_253, %c0_254] : memref<8x128xf32, #tpu.memory_space<vmem>>, vector<8x128xf32>
    %497 = arith.addf %495, %496 : vector<8x128xf32>
    %498 = arith.truncf %454 : vector<8x128xf32> to vector<8x128xbf16>
    %c0_255 = arith.constant 0 : index
    %c0_256 = arith.constant 0 : index
    %499 = vector.load %arg5[%c0_255, %c0_256] : memref<128x128xbf16, #tpu.memory_space<vmem>>, vector<128x128xbf16>
    %cst_257 = arith.constant dense<0.000000e+00> : vector<8x128xf32>
    %500 = tpu.matmul %498, %499, %cst_257 {dimension_numbers = #tpu.dot_dimension_numbers<[1], [0], [0], [1], [0, 0, 1, 1], [], []>} : vector<8x128xbf16>, vector<128x128xbf16>, vector<8x128xf32> -> vector<8x128xf32>
    %501 = arith.addf %497, %500 : vector<8x128xf32>
    %502 = arith.negf %501 : vector<8x128xf32>
    %503 = math.exp %502 : vector<8x128xf32>
    %cst_258 = arith.constant 1.000000e+00 : f32
    %504 = vector.broadcast %cst_258 : f32 to vector<8x128xf32>
    %505 = arith.addf %504, %503 : vector<8x128xf32>
    %506 = arith.divf %504, %505 : vector<8x128xf32>
    %507 = math.tanh %501 : vector<8x128xf32>
    %c96_i32_259 = arith.constant 96 : i32
    %508 = tpu.dynamic_rotate %506 by %c96_i32_259 dim 1 : vector<8x128xf32>, i32 -> vector<8x128xf32>
    %c64_i32_260 = arith.constant 64 : i32
    %509 = tpu.dynamic_rotate %507 by %c64_i32_260 dim 1 : vector<8x128xf32>, i32 -> vector<8x128xf32>
    %c32_i32_261 = arith.constant 32 : i32
    %510 = tpu.dynamic_rotate %506 by %c32_i32_261 dim 1 : vector<8x128xf32>, i32 -> vector<8x128xf32>
    %511 = arith.mulf %508, %455 : vector<8x128xf32>
    %512 = arith.mulf %506, %509 : vector<8x128xf32>
    %513 = arith.addf %511, %512 : vector<8x128xf32>
    %514 = math.tanh %513 : vector<8x128xf32>
    %515 = arith.mulf %510, %514 : vector<8x128xf32>
    %c0_i32_262 = arith.constant 0 : i32
    %516 = arith.cmpi sge, %492, %c0_i32_262 : i32
    %c8_i32_263 = arith.constant 8 : i32
    %517 = arith.cmpi slt, %492, %c8_i32_263 : i32
    %518 = arith.andi %516, %517 : i1
    %519 = arith.select %518, %515, %454 : vector<8x128xf32>
    %520 = arith.select %518, %513, %455 : vector<8x128xf32>
    %c4_i32_264 = arith.constant 4 : i32
    %521 = arith.cmpi sge, %492, %c4_i32_264 : i32
    %c8_i32_265 = arith.constant 8 : i32
    %522 = arith.cmpi slt, %492, %c8_i32_265 : i32
    %523 = arith.andi %521, %522 : i1
    %524 = arith.extui %523 : i1 to i32
    %c0_i32_266 = arith.constant 0 : i32
    %525 = arith.cmpi ne, %524, %c0_i32_266 : i32
    scf.if %525 {
      %c4_i32_310 = arith.constant 4 : i32
      %599 = arith.subi %492, %c4_i32_310 : i32
      %c0_i32_311 = arith.constant 0 : i32
      %600 = arith.maxsi %599, %c0_i32_311 : i32
      %c8_i32_312 = arith.constant 8 : i32
      %601 = arith.muli %600, %c8_i32_312 : i32
      %602 = tpu.assume_multiple %601, 8 : i32
      %603 = arith.index_cast %602 : i32 to index
      %c0_313 = arith.constant 0 : index
      %604 = vector.load %arg11[%603, %c0_313] : memref<32x128xf32, #tpu.memory_space<vmem>>, vector<8x128xf32>
      tpu.vector_store %arg11[%603, %c0_313], %519 {strides = array<i32>} : memref<32x128xf32, #tpu.memory_space<vmem>>, vector<8x128xf32>,
    } else {
    }
    %c8_i32_267 = arith.constant 8 : i32
    %c0_i32_268 = arith.constant 0 : i32
    %526 = arith.subi %c8_i32_267, %c0_i32_268 : i32
    %c7_i32_269 = arith.constant 7 : i32
    %527 = arith.minsi %c8_i32_267, %c7_i32_269 : i32
    %c8_i32_270 = arith.constant 8 : i32
    %528 = arith.muli %527, %c8_i32_270 : i32
    %529 = tpu.assume_multiple %528, 8 : i32
    %530 = arith.index_cast %529 : i32 to index
    %c0_271 = arith.constant 0 : index
    %531 = vector.load %arg10[%530, %c0_271] : memref<64x128xf32, #tpu.memory_space<vmem>>, vector<8x128xf32>
    %c0_272 = arith.constant 0 : index
    %c0_273 = arith.constant 0 : index
    %532 = vector.load %arg3[%c0_272, %c0_273] : memref<8x128xf32, #tpu.memory_space<vmem>>, vector<8x128xf32>
    %533 = arith.addf %531, %532 : vector<8x128xf32>
    %534 = arith.truncf %490 : vector<8x128xf32> to vector<8x128xbf16>
    %c0_274 = arith.constant 0 : index
    %c0_275 = arith.constant 0 : index
    %535 = vector.load %arg2[%c0_274, %c0_275] : memref<128x128xbf16, #tpu.memory_space<vmem>>, vector<128x128xbf16>
    %cst_276 = arith.constant dense<0.000000e+00> : vector<8x128xf32>
    %536 = tpu.matmul %534, %535, %cst_276 {dimension_numbers = #tpu.dot_dimension_numbers<[1], [0], [0], [1], [0, 0, 1, 1], [], []>} : vector<8x128xbf16>, vector<128x128xbf16>, vector<8x128xf32> -> vector<8x128xf32>
    %537 = arith.addf %533, %536 : vector<8x128xf32>
    %538 = arith.negf %537 : vector<8x128xf32>
    %539 = math.exp %538 : vector<8x128xf32>
    %cst_277 = arith.constant 1.000000e+00 : f32
    %540 = vector.broadcast %cst_277 : f32 to vector<8x128xf32>
    %541 = arith.addf %540, %539 : vector<8x128xf32>
    %542 = arith.divf %540, %541 : vector<8x128xf32>
    %543 = math.tanh %537 : vector<8x128xf32>
    %c96_i32_278 = arith.constant 96 : i32
    %544 = tpu.dynamic_rotate %542 by %c96_i32_278 dim 1 : vector<8x128xf32>, i32 -> vector<8x128xf32>
    %c64_i32_279 = arith.constant 64 : i32
    %545 = tpu.dynamic_rotate %543 by %c64_i32_279 dim 1 : vector<8x128xf32>, i32 -> vector<8x128xf32>
    %c32_i32_280 = arith.constant 32 : i32
    %546 = tpu.dynamic_rotate %542 by %c32_i32_280 dim 1 : vector<8x128xf32>, i32 -> vector<8x128xf32>
    %547 = arith.mulf %544, %491 : vector<8x128xf32>
    %548 = arith.mulf %542, %545 : vector<8x128xf32>
    %549 = arith.addf %547, %548 : vector<8x128xf32>
    %550 = math.tanh %549 : vector<8x128xf32>
    %551 = arith.mulf %546, %550 : vector<8x128xf32>
    %c0_i32_281 = arith.constant 0 : i32
    %552 = arith.cmpi sge, %526, %c0_i32_281 : i32
    %c8_i32_282 = arith.constant 8 : i32
    %553 = arith.cmpi slt, %526, %c8_i32_282 : i32
    %554 = arith.andi %552, %553 : i1
    %555 = arith.select %554, %551, %490 : vector<8x128xf32>
    %556 = arith.select %554, %549, %491 : vector<8x128xf32>
    %c1_i32_283 = arith.constant 1 : i32
    %557 = arith.subi %c8_i32_267, %c1_i32_283 : i32
    %558 = arith.truncf %490 : vector<8x128xf32> to vector<8x128xbf16>
    %c0_284 = arith.constant 0 : index
    %c0_285 = arith.constant 0 : index
    %559 = vector.load %arg4[%c0_284, %c0_285] : memref<128x128xbf16, #tpu.memory_space<vmem>>, vector<128x128xbf16>
    %cst_286 = arith.constant dense<0.000000e+00> : vector<8x128xf32>
    %560 = tpu.matmul %558, %559, %cst_286 {dimension_numbers = #tpu.dot_dimension_numbers<[1], [0], [0], [1], [0, 0, 1, 1], [], []>} : vector<8x128xbf16>, vector<128x128xbf16>, vector<8x128xf32> -> vector<8x128xf32>
    %c0_287 = arith.constant 0 : index
    %c0_288 = arith.constant 0 : index
    %561 = vector.load %arg6[%c0_287, %c0_288] : memref<8x128xf32, #tpu.memory_space<vmem>>, vector<8x128xf32>
    %562 = arith.addf %560, %561 : vector<8x128xf32>
    %563 = arith.truncf %519 : vector<8x128xf32> to vector<8x128xbf16>
    %c0_289 = arith.constant 0 : index
    %c0_290 = arith.constant 0 : index
    %564 = vector.load %arg5[%c0_289, %c0_290] : memref<128x128xbf16, #tpu.memory_space<vmem>>, vector<128x128xbf16>
    %cst_291 = arith.constant dense<0.000000e+00> : vector<8x128xf32>
    %565 = tpu.matmul %563, %564, %cst_291 {dimension_numbers = #tpu.dot_dimension_numbers<[1], [0], [0], [1], [0, 0, 1, 1], [], []>} : vector<8x128xbf16>, vector<128x128xbf16>, vector<8x128xf32> -> vector<8x128xf32>
    %566 = arith.addf %562, %565 : vector<8x128xf32>
    %567 = arith.negf %566 : vector<8x128xf32>
    %568 = math.exp %567 : vector<8x128xf32>
    %cst_292 = arith.constant 1.000000e+00 : f32
    %569 = vector.broadcast %cst_292 : f32 to vector<8x128xf32>
    %570 = arith.addf %569, %568 : vector<8x128xf32>
    %571 = arith.divf %569, %570 : vector<8x128xf32>
    %572 = math.tanh %566 : vector<8x128xf32>
    %c96_i32_293 = arith.constant 96 : i32
    %573 = tpu.dynamic_rotate %571 by %c96_i32_293 dim 1 : vector<8x128xf32>, i32 -> vector<8x128xf32>
    %c64_i32_294 = arith.constant 64 : i32
    %574 = tpu.dynamic_rotate %572 by %c64_i32_294 dim 1 : vector<8x128xf32>, i32 -> vector<8x128xf32>
    %c32_i32_295 = arith.constant 32 : i32
    %575 = tpu.dynamic_rotate %571 by %c32_i32_295 dim 1 : vector<8x128xf32>, i32 -> vector<8x128xf32>
    %576 = arith.mulf %573, %520 : vector<8x128xf32>
    %577 = arith.mulf %571, %574 : vector<8x128xf32>
    %578 = arith.addf %576, %577 : vector<8x128xf32>
    %579 = math.tanh %578 : vector<8x128xf32>
    %580 = arith.mulf %575, %579 : vector<8x128xf32>
    %c0_i32_296 = arith.constant 0 : i32
    %581 = arith.cmpi sge, %557, %c0_i32_296 : i32
    %c8_i32_297 = arith.constant 8 : i32
    %582 = arith.cmpi slt, %557, %c8_i32_297 : i32
    %583 = arith.andi %581, %582 : i1
    %584 = arith.select %583, %580, %519 : vector<8x128xf32>
    %585 = arith.select %583, %578, %520 : vector<8x128xf32>
    %c4_i32_298 = arith.constant 4 : i32
    %586 = arith.cmpi sge, %557, %c4_i32_298 : i32
    %c8_i32_299 = arith.constant 8 : i32
    %587 = arith.cmpi slt, %557, %c8_i32_299 : i32
    %588 = arith.andi %586, %587 : i1
    %589 = arith.extui %588 : i1 to i32
    %c0_i32_300 = arith.constant 0 : i32
    %590 = arith.cmpi ne, %589, %c0_i32_300 : i32
    scf.if %590 {
      %c4_i32_310 = arith.constant 4 : i32
      %599 = arith.subi %557, %c4_i32_310 : i32
      %c0_i32_311 = arith.constant 0 : i32
      %600 = arith.maxsi %599, %c0_i32_311 : i32
      %c8_i32_312 = arith.constant 8 : i32
      %601 = arith.muli %600, %c8_i32_312 : i32
      %602 = tpu.assume_multiple %601, 8 : i32
      %603 = arith.index_cast %602 : i32 to index
      %c0_313 = arith.constant 0 : index
      %604 = vector.load %arg11[%603, %c0_313] : memref<32x128xf32, #tpu.memory_space<vmem>>, vector<8x128xf32>
      tpu.vector_store %arg11[%603, %c0_313], %584 {strides = array<i32>} : memref<32x128xf32, #tpu.memory_space<vmem>>, vector<8x128xf32>,
    } else {
    }
    %c9_i32 = arith.constant 9 : i32
    %c0_301 = arith.constant 0 : index
    %c0_302 = arith.constant 0 : index
    %591 = vector.load %arg11[%c0_301, %c0_302] : memref<32x128xf32, #tpu.memory_space<vmem>>, vector<32x128xf32>
    %592 = arith.truncf %591 : vector<32x128xf32> to vector<32x128xbf16>
    %c0_303 = arith.constant 0 : index
    %c0_304 = arith.constant 0 : index
    %593 = vector.load %arg7[%c0_303, %c0_304] : memref<128x128xbf16, #tpu.memory_space<vmem>>, vector<128x128xbf16>
    %cst_305 = arith.constant dense<0.000000e+00> : vector<32x128xf32>
    %594 = tpu.matmul %592, %593, %cst_305 {dimension_numbers = #tpu.dot_dimension_numbers<[1], [0], [0], [1], [0, 0, 1, 1], [], []>} : vector<32x128xbf16>, vector<128x128xbf16>, vector<32x128xf32> -> vector<32x128xf32>
    %c0_306 = arith.constant 0 : index
    %c0_307 = arith.constant 0 : index
    %595 = vector.load %arg8[%c0_306, %c0_307] : memref<1x128xf32, #tpu.memory_space<vmem>>, vector<1x128xf32>
    %596 = vector.broadcast %595 : vector<1x128xf32> to vector<32x128xf32>
    %597 = arith.addf %594, %596 : vector<32x128xf32>
    %c0_308 = arith.constant 0 : index
    %c0_309 = arith.constant 0 : index
    %598 = vector.load %arg9[%c0_308, %c0_309] : memref<32x128xf32, #tpu.memory_space<vmem>>, vector<32x128xf32>
    tpu.vector_store %arg9[%c0_308, %c0_309], %597 {strides = array<i32>} : memref<32x128xf32, #tpu.memory_space<vmem>>, vector<32x128xf32>,
    return
  }
}

</mosaic_0001>

<bundles_post_ra>
// kernel: rnn_forward.1
= control target key start
LH: loop header
LB: loop body
LE: loop exit
PB: predicated region body
PF: predicated region fallthrough
CT: control target
= control target key end

     0   :  { %14 = vsyncpa [#allocation5], 0  ;;  %s4530_s0 = inlined_call_operand.vmem [shape: bf16[64,128], index: 0, kind: input, shape index: {}]   ;;  %s4531_s1 = inlined_call_operand.vmem [shape: bf16[128,128], index: 1, kind: input, shape index: {}]   ;;  %s4532_s2 = inlined_call_operand.hbm [shape: bf16[128,128], index: 2, kind: input, shape index: {}]   ;;  %s4533_s3 = inlined_call_operand.vmem [shape: f32[8,128], index: 3, kind: input, shape index: {}]   ;;  %s4534_s4 = inlined_call_operand.vmem [shape: bf16[128,128], index: 4, kind: input, shape index: {}]   ;;  %s4535_s5 = inlined_call_operand.hbm [shape: bf16[128,128], index: 5, kind: input, shape index: {}]   ;;  %s4536_s6 = inlined_call_operand.vmem [shape: f32[8,128], index: 6, kind: input, shape index: {}]   ;;  %s4537_s7 = inlined_call_operand.hbm [shape: bf16[128,128], index: 7, kind: input, shape index: {}]   ;;  %s4538_s8 = inlined_call_operand.hbm [shape: f32[1,128], index: 8, kind: input, shape index: {}]   ;;  %s4539_s9 = inlined_call_operand.vmem [shape: f32[32,128], index: 9, kind: output, shape index: {}]  }
   0x1   :  { %15 = vsyncpa [#allocation7], 0 }
   0x2   :  { %16 = vsyncpa [#allocation10], 0  ;;  %s3689_s30 = smov [#allocation6]   ;;  %s3690_s11 = smov [#allocation4]  }
   0x3   :  { %s42_s10 = sshll.u32 %s3689_s30, 4  ;;  %s26_s12 = sshll.u32 %s3690_s11, 4  ;;  %s43_s10 = int_to_ptr.vmem [resolvable:$true] %s42_s10  ;;  %s3750_s12 = int_to_ptr.vmem [resolvable:$true] %s26_s12 }
   0x4   :  { %s3595_s15 = scalar_lea.hbm %s4535_s5, 1024 }
   0x5   :  { %p3596_p0 = scmp.ne.s32.totalorder %s4535_s5, %s3595_s15  ;;  %p3599_p1 = scmp.lt.u32.totalorder %s3595_s15, %s4535_s5 }
   0x7   :  { %p3601_p2 = pnand %p3599_p1, %p3596_p0 }
   0x9   :  { %3604 = shalt.err (!%p3601_p2)
}
   0xa   :  { %s3605_s20 = scalar_lea.vmem %s43_s10, 1024  ;;  %p3610_p4 = scmp.lt.s32.totalorder %s43_s10, %s43_s10 }
   0xb   :  { %p3606_p3 = scmp.ne.s32.totalorder %s43_s10, %s3605_s20  ;;  %p3611_p5 = scmp.lt.s32.totalorder %s3605_s20, %s3605_s20 }
   0xd   :  { %p3612_p6 = por %p3611_p5, %p3610_p4 }
   0xf   :  { %p3613_p7 = pnand %p3612_p6, %p3606_p3 }
  0x11   :  { %3616 = shalt.err (!%p3613_p7)
}
  0x12   :  { %s3691_s21 = smov 64   ;;  %s3692_s22 = smov 4  }
  0x13   :  { %48 = dma.hbm_to_vmem [thread:$0]  %s4535_s5, 1024, %s43_s10, [#allocation7], %s3691_s21, %s3691_s21, %s3692_s22  }
  0x14   :  { %s3617_s27 = scalar_lea.hbm %s4532_s2, 1024 }
  0x15   :  { %p3618_p8 = scmp.ne.s32.totalorder %s4532_s2, %s3617_s27  ;;  %p3621_p9 = scmp.lt.u32.totalorder %s3617_s27, %s4532_s2 }
  0x17   :  { %p3623_p10 = pnand %p3621_p9, %p3618_p8 }
  0x19   :  { %3626 = shalt.err (!%p3623_p10)
}
  0x1a   :  { %s3627_s13 = scalar_lea.vmem %s3750_s12, 1024  ;;  %p3632_p12 = scmp.lt.s32.totalorder %s3750_s12, %s3750_s12 }
  0x1b   :  { %p3628_p11 = scmp.ne.s32.totalorder %s3750_s12, %s3627_s13  ;;  %p3633_p13 = scmp.lt.s32.totalorder %s3627_s13, %s3627_s13 }
  0x1d   :  { %p3634_p0 = por %p3633_p13, %p3632_p12 }
  0x1f   :  { %p3635_p1 = pnand %p3634_p0, %p3628_p11 }
  0x21   :  { %3638 = shalt.err (!%p3635_p1)
}
  0x22   :  { %32 = dma.hbm_to_vmem [thread:$0]  %s4532_s2, 1024, %s3750_s12, [#allocation5], %s3691_s21, %s3691_s21, %s3692_s22  }
  0x23   :  { %s3693_s14 = smov [#allocation8]   ;;  %s3694_s16 = smov [#allocation9]  }
  0x24   :  { %s56_s15 = sshll.u32 %s3693_s14, 4  ;;  %s69_s17 = sshll.u32 %s3694_s16, 4  ;;  %s57_s15 = int_to_ptr.vmem [resolvable:$true] %s56_s15  ;;  %s70_s17 = int_to_ptr.vmem [resolvable:$true] %s69_s17 }
  0x25   :  { %s3639_s20 = scalar_lea.hbm %s4537_s7, 1024 }
  0x26   :  { %p3640_p2 = scmp.ne.s32.totalorder %s4537_s7, %s3639_s20  ;;  %p3643_p3 = scmp.lt.u32.totalorder %s3639_s20, %s4537_s7 }
  0x28   :  { %p3645_p4 = pnand %p3643_p3, %p3640_p2 }
  0x2a   :  { %3648 = shalt.err (!%p3645_p4)
}
  0x2b   :  { %s3649_s2 = scalar_lea.vmem %s57_s15, 1024  ;;  %p3654_p6 = scmp.lt.s32.totalorder %s57_s15, %s57_s15 }
  0x2c   :  { %p3650_p5 = scmp.ne.s32.totalorder %s57_s15, %s3649_s2  ;;  %p3655_p7 = scmp.lt.s32.totalorder %s3649_s2, %s3649_s2 }
  0x2e   :  { %p3656_p8 = por %p3655_p7, %p3654_p6 }
  0x30   :  { %p3657_p9 = pnand %p3656_p8, %p3650_p5 }
  0x32   :  { %3660 = shalt.err (!%p3657_p9)
}
  0x33   :  { %62 = dma.hbm_to_vmem [thread:$0]  %s4537_s7, 1024, %s57_s15, [#allocation7], %s3691_s21, %s3691_s21, %s3692_s22  }
  0x34   :  { %s3661_s30 = scalar_lea.hbm %s4538_s8, 16 }
  0x35   :  { %p3662_p10 = scmp.ne.s32.totalorder %s4538_s8, %s3661_s30  ;;  %p3665_p11 = scmp.lt.u32.totalorder %s3661_s30, %s4538_s8 }
  0x37   :  { %p3667_p12 = pnand %p3665_p11, %p3662_p10 }
  0x39   :  { %3670 = shalt.err (!%p3667_p12)
}
  0x3a   :  { %s3671_s14 = scalar_lea.vmem %s70_s17, 16  ;;  %s3675_s16 = scalar_lea.vmem %s70_s17, 32 }
  0x3b   :  { %p3672_p13 = scmp.ne.s32.totalorder %s70_s17, %s3671_s14  ;;  %p3676_p0 = scmp.lt.s32.totalorder %s70_s17, %s70_s17 }
  0x3c   :  { %p3677_p1 = scmp.lt.s32.totalorder %s3675_s16, %s3671_s14 }
  0x3e   :  { %p3678_p2 = por %p3677_p1, %p3676_p0 }
  0x40   :  { %p3679_p3 = pnand %p3678_p2, %p3672_p13 }
  0x42   :  { %3682 = shalt.err (!%p3679_p3)
}
  0x43   :  { %72 = dma.hbm_to_vmem [thread:$0]  %s4538_s8, 16, %s70_s17, [#allocation10]  }
  0x44   :  { %3683 = dma.done.wait [#allocation5], 1024  }
  0x45   :  { %3684 = vsyncadd [#allocation5], 4294966272 }
  0x46   :  { %3685 = dma.done.wait [#allocation7], 2048  }
  0x47   :  { %3686 = vsyncadd [#allocation7], 4294965248 }
  0x48   :  { %3687 = dma.done.wait [#allocation10], 16  }
  0x49   :  { %3688 = vsyncadd [#allocation10], 4294967280  ;;  %v3695_v0 = vmov 0.0   ;;  %vm3696_vm0 = vmmov 0   ;;  %v3350_v1 = vld [vmem:[%s4531_s1] sm:$0xff]   ;;  %v3352_v3 = vld [vmem:[%s4531_s1 + $0x8] sm:$0xff]  }
  0x4a   :  { %2799 = vmatprep.subr.bf16.mxu1 %v3695_v0  ;;  %2815 = vmatprep.mubr.msk.bf16.mxu1 %vm3696_vm0, %v3695_v0  ;;  %v3820_v2 = vld [vmem:[#allocation4] sm:$0xff]   ;;  %v3826_v4 = vld [vmem:[#allocation4 + $0x8] sm:$0xff]   ;;  %v3354_v5 = vld [vmem:[%s4531_s1 + $0x10] sm:$0xff]   ;;  %v3697_v19 = vmov 0   ;;  %s3698_s30 = smov 32   ;;  %s3699_s11 = smov 96  }
  0x4b   :  { %2775 = vmatprep.subr.bf16.mxu0 %v3350_v1  ;;  %2800 = vmatpush3.bf16.msra.mxu1 %v3820_v2  ;;  %v3833_v6 = vld [vmem:[#allocation4 + $0x10] sm:$0xff]   ;;  %v3356_v7 = vld [vmem:[%s4531_s1 + $0x18] sm:$0xff]   ;;  %v3358_v9 = vld [vmem:[%s4531_s1 + $0x20] sm:$0xff]  }
  0x4c   :  { %2776 = vmatpush3.bf16.msra.mxu0 %v3350_v1  ;;  %2801 = vmatprep.subr.bf16.mxu1 %v3695_v0  ;;  %v3840_v8 = vld [vmem:[#allocation4 + $0x18] sm:$0xff]   ;;  %v3846_v10 = vld [vmem:[#allocation4 + $0x20] sm:$0xff]   ;;  %v3360_v11 = vld [vmem:[%s4531_s1 + $0x28] sm:$0xff]  }
  0x4d   :  { %2777 = vmatprep.subr.bf16.mxu0 %v3352_v3  ;;  %v3366_v12 = vld [vmem:[%s4530_s0] sm:$0xff]   ;;  %v3856_v13 = vld [vmem:[#allocation4 + $0x28] sm:$0xff]   ;;  %v3362_v14 = vld [vmem:[%s4531_s1 + $0x30] sm:$0xff]  }
  0x4e   :  { %2791 = vmatprep.mubr.bf16.mxu0 %v3366_v12  ;;  %v3863_v15 = vld [vmem:[#allocation4 + $0x30] sm:$0xff]   ;;  %v3364_v16 = vld [vmem:[%s4531_s1 + $0x38] sm:$0xff]   ;;  %v3367_v18 = vld [vmem:[%s4530_s0 + $0x8] sm:$0xff]  }
  0x4f   :  { %2802 = vmatpush3.bf16.msra.mxu1 %v3826_v4  ;;  %v3870_v17 = vld [vmem:[#allocation4 + $0x38] sm:$0xff]   ;;  %v3902_v20 = vld [vmem:[%s4534_s4] sm:$0xff]   ;;  %v3908_v21 = vld [vmem:[%s4534_s4 + $0x8] sm:$0xff]  }
  0x50   :  { %2778 = vmatpush3.bf16.msra.mxu0 %v3352_v3  ;;  %2803 = vmatprep.subr.bf16.mxu1 %v3695_v0  ;;  %v3915_v22 = vld [vmem:[%s4534_s4 + $0x10] sm:$0xff]   ;;  %v3923_v23 = vld [vmem:[%s4533_s3] sm:$0xff]  ;;  %v3935_v37 = vld [vmem:[%s4534_s4 + $0x18] sm:$0xff]  }
  0x51   :  { %2779 = vmatprep.subr.bf16.mxu0 %v3354_v5  ;;  %v3942_v38 = vld [vmem:[%s4534_s4 + $0x20] sm:$0xff]   ;;  %v3373_v39 = vld [vmem:[%s4530_s0 + $0x10] sm:$0xff]   ;;  %v3952_v40 = vld [vmem:[%s4534_s4 + $0x28] sm:$0xff]  }
  0x52   :  { %v3375_v41 = vld [vmem:[%s4530_s0 + $0x18] sm:$0xff]   ;;  %v3961_v42 = vld [vmem:[%s4534_s4 + $0x30] sm:$0xff]   ;;  %v3981_v54 = vld [vmem:[#allocation6] sm:$0xff]  }
  0x53   :  { %2804 = vmatpush3.bf16.msra.mxu1 %v3833_v6  ;;  %v3972_v44 = vld [vmem:[%s4534_s4 + $0x38] sm:$0xff]   ;;  %v3984_v56 = vld [vmem:[#allocation6 + $0x8] sm:$0xff]   ;;  %v3994_v57 = vld [vmem:[#allocation6 + $0x10] sm:$0xff]  }
  0x54   :  { %2780 = vmatpush3.bf16.msra.mxu0 %v3354_v5  ;;  %2805 = vmatprep.subr.bf16.mxu1 %v3695_v0  ;;  %v4000_v58 = vld [vmem:[#allocation6 + $0x18] sm:$0xff]   ;;  %v4006_v59 = vld [vmem:[#allocation6 + $0x20] sm:$0xff]   ;;  %v4012_v60 = vld [vmem:[#allocation6 + $0x28] sm:$0xff]  }
  0x55   :  { %2781 = vmatprep.subr.bf16.mxu0 %v3356_v7  ;;  %v4018_v61 = vld [vmem:[#allocation6 + $0x30] sm:$0xff]   ;;  %v4024_v62 = vld [vmem:[#allocation6 + $0x38] sm:$0xff]  }
  0x57   :  { %2806 = vmatpush3.bf16.msra.mxu1 %v3840_v8 }
  0x58   :  { %2782 = vmatpush3.bf16.msra.mxu0 %v3356_v7  ;;  %2807 = vmatprep.subr.bf16.mxu1 %v3695_v0 }
  0x59   :  { %2783 = vmatprep.subr.bf16.mxu0 %v3358_v9 }
  0x5b   :  { %2808 = vmatpush3.bf16.msra.mxu1 %v3846_v10 }
  0x5c   :  { %2784 = vmatpush3.bf16.msra.mxu0 %v3358_v9  ;;  %2809 = vmatprep.subr.bf16.mxu1 %v3695_v0 }
  0x5d   :  { %2785 = vmatprep.subr.bf16.mxu0 %v3360_v11 }
  0x5f   :  { %2810 = vmatpush3.bf16.msra.mxu1 %v3856_v13 }
  0x60   :  { %2786 = vmatpush3.bf16.msra.mxu0 %v3360_v11  ;;  %2811 = vmatprep.subr.bf16.mxu1 %v3695_v0 }
  0x61   :  { %2787 = vmatprep.subr.bf16.mxu0 %v3362_v14 }
  0x63   :  { %2812 = vmatpush3.bf16.msra.mxu1 %v3863_v15 }
  0x64   :  { %2788 = vmatpush3.bf16.msra.mxu0 %v3362_v14  ;;  %2813 = vmatprep.subr.bf16.mxu1 %v3695_v0 }
  0x65   :  { %2789 = vmatprep.subr.bf16.mxu0 %v3364_v16 }
  0x67   :  { %2814 = vmatpush3.bf16.msra.mxu1 %v3870_v17 }
  0x68   :  { %2790 = vmatpush3.bf16.msra.mxu0 %v3364_v16  ;;  %2839 = vmatprep.subr.bf16.mxu1 %v3695_v0 }
  0x69   :  { %2819 = vmatprep.subr.bf16.mxu0 %v3695_v0 }
  0x6a   :  { %2816 = vmatmul.mubr.bf16.vlgmr.msra.gmra.mrb[0].mxu1 %v3697_v19 }
  0x6b   :  { %2792 = vmatmul.mubr.bf16.vlgmr.msra.gmra.mrb[0].mxu0 %v3367_v18  ;;  %2855 = vmatprep.mubr.msk.bf16.mxu1 %vm3696_vm0, %v3695_v0 }
  0x6c   :  { %2820 = vmatpush3.bf16.msra.mxu0 %v3820_v2  ;;  %2840 = vmatpush3.bf16.msra.mxu1 %v3902_v20 }
  0x6d   :  { %2821 = vmatprep.subr.bf16.mxu0 %v3695_v0  ;;  %2841 = vmatprep.subr.bf16.mxu1 %v3695_v0 }
  0x6e   :  { %2795 = vmatprep.mubr.bf16.mxu0 %v3373_v39 }
  0x70   :  { %2822 = vmatpush3.bf16.msra.mxu0 %v3826_v4  ;;  %2842 = vmatpush3.bf16.msra.mxu1 %v3908_v21 }
  0x71   :  { %2823 = vmatprep.subr.bf16.mxu0 %v3695_v0  ;;  %2843 = vmatprep.subr.bf16.mxu1 %v3695_v0 }
  0x73   :  { %2796 = vmatmul.mubr.bf16.gmra.mrb[4].mxu0 %v3375_v41 }
  0x74   :  { %2824 = vmatpush3.bf16.msra.mxu0 %v3833_v6  ;;  %2844 = vmatpush3.bf16.msra.mxu1 %v3915_v22 }
  0x75   :  { %2825 = vmatprep.subr.bf16.mxu0 %v3695_v0  ;;  %2845 = vmatprep.subr.bf16.mxu1 %v3695_v0 }
  0x76   :  { %2835 = vmatprep.mubr.msk.bf16.mxu0 %vm3696_vm0, %v3695_v0 }
  0x78   :  { %2826 = vmatpush3.bf16.msra.mxu0 %v3840_v8  ;;  %2846 = vmatpush3.bf16.msra.mxu1 %v3935_v37 }
  0x79   :  { %2827 = vmatprep.subr.bf16.mxu0 %v3695_v0  ;;  %2847 = vmatprep.subr.bf16.mxu1 %v3695_v0 }
  0x7c   :  { %2828 = vmatpush3.bf16.msra.mxu0 %v3846_v10  ;;  %2848 = vmatpush3.bf16.msra.mxu1 %v3942_v38 }
  0x7d   :  { %2829 = vmatprep.subr.bf16.mxu0 %v3695_v0  ;;  %2849 = vmatprep.subr.bf16.mxu1 %v3695_v0 }
  0x80   :  { %2830 = vmatpush3.bf16.msra.mxu0 %v3856_v13  ;;  %2850 = vmatpush3.bf16.msra.mxu1 %v3952_v40 }
  0x81   :  { %2831 = vmatprep.subr.bf16.mxu0 %v3695_v0  ;;  %2851 = vmatprep.subr.bf16.mxu1 %v3695_v0 }
  0x84   :  { %2832 = vmatpush3.bf16.msra.mxu0 %v3863_v15  ;;  %2852 = vmatpush3.bf16.msra.mxu1 %v3961_v42 }
  0x85   :  { %2833 = vmatprep.subr.bf16.mxu0 %v3695_v0  ;;  %2853 = vmatprep.subr.bf16.mxu1 %v3695_v0 }
  0x88   :  { %2834 = vmatpush3.bf16.msra.mxu0 %v3870_v17  ;;  %2854 = vmatpush3.bf16.msra.mxu1 %v3972_v44 }
  0x89   :  { %2879 = vmatprep.subr.bf16.mxu0 %v3695_v0  ;;  %2859 = vmatprep.subr.bf16.mxu1 %v3695_v0 }
 0x13d   :  { %v356_v25 = vpop.f32.mrb[0].mxu1 }
 0x13e   :  { %v3925_v24 = vpop.f32.mrb[0].mxu0  ;;  %v2817_v27 = vpop.f32.mrb[1].mxu1 }
 0x13f   :  { %v216_v26 = vpop.f32.mrb[1].mxu0  ;;  %v359_v30 = vpop.f32.mrb[2].mxu1 }
 0x140   :  { %v257_v28 = vadd.f32 %v3923_v23, %v216_v26  ;;  %v3928_v29 = vpop.f32.mrb[2].mxu0  ;;  %v2818_v32 = vpop.f32.mrb[3].mxu1 }
 0x141   :  { %v3930_v31 = vpop.f32.mrb[3].mxu0 }
 0x142   :  { %v362_v33 = vadd.f32 %v356_v25, %v257_v28  ;;  %v383_v7 = vadd.f32 %v3923_v23, %v3930_v31  ;;  %v4067_v28 = vld [vmem:[%s4536_s6] sm:$0xff] }
 0x144   :  { %v2432_v34 = vmul.f32 -1.442695, %v362_v33 }
 0x146   :  { %3458 = vpow2.f32 %v2432_v34  ;;  %v4052_v63 = vpop.f32.mrb[4].mxu0 }
 0x147   :  { %v4054_v1 = vpop.f32.mrb[5].mxu0 }
 0x148   :  { %v4056_v3 = vpop.f32.mrb[6].mxu0 }
 0x149   :  { %v4058_v5 = vpop.f32.mrb[7].mxu0 }
 0x150   :  { %v3459_v35 = vpop.eup %3458 }
 0x151   :  { %v366_v36 = vadd.f32 1.0, %v3459_v35 }
 0x153   :  { %3460 = vrcp.f32 %v366_v36 }
 0x154   :  { %3462 = vtanh.f32 %v362_v33 }
 0x15d   :  { %v3461_v43 = vpop.eup %3460 }
 0x15e   :  { %374 = vrot.lane.b32.xlu1 %v3461_v43, %s3698_s30  ;;  %370 = vrot.lane.b32.xlu0 %v3461_v43, %s3699_s11  ;;  %v3463_v45 = vpop.eup %3462 }
 0x162   :  { %372 = vrot.lane.b32.xlu0 %v3463_v45, %s3691_s21 }
 0x1d0   :  { %v371_v46 = vpop.permute.xlu0 %370  ;;  %v375_v52 = vpop.permute.xlu1 %374 }
 0x1d1   :  { %v376_v48 = vmul.f32 0.0, %v371_v46 }
 0x1d4   :  { %v373_v47 = vpop.permute.xlu0 %372 }
 0x1d5   :  { %v377_v49 = vmul.f32 %v3461_v43, %v373_v47 }
 0x1d7   :  { %v3978_v50 = vadd.f32 %v377_v49, %v376_v48 }
 0x1d9   :  { %3464 = vtanh.f32 %v3978_v50 }
 0x1e3   :  { %v3465_v51 = vpop.eup %3464 }
 0x1e4   :  { %v380_v53 = vmul.f32 %v3465_v51, %v375_v52 }
 0x1e6   :  { %v384_v55 = vpack.c.bf16 %v380_v53, %v380_v53 }
 0x1e8   :  { %2836 = vmatmul.mubr.bf16.vlgmr.msra.gmra.mrb[8].mxu0 %v384_v55  ;;  %2856 = vmatmul.mubr.bf16.vlgmr.msra.gmra.mrb[4].mxu1 %v384_v55 }
 0x1e9   :  { %2860 = vmatpush3.bf16.msra.mxu1 %v3981_v54  ;;  %2875 = vmatprep.mubr.msk.bf16.mxu1 %vm3696_vm0, %v3695_v0 }
 0x1ea   :  { %2861 = vmatprep.subr.bf16.mxu1 %v3695_v0  ;;  %2880 = vmatpush3.bf16.msra.mxu0 %v3820_v2 }
 0x1eb   :  { %2881 = vmatprep.subr.bf16.mxu0 %v3695_v0  ;;  %2895 = vmatprep.mubr.msk.bf16.mxu0 %vm3696_vm0, %v3695_v0 }
 0x1ed   :  { %2862 = vmatpush3.bf16.msra.mxu1 %v3984_v56 }
 0x1ee   :  { %2863 = vmatprep.subr.bf16.mxu1 %v3695_v0  ;;  %2882 = vmatpush3.bf16.msra.mxu0 %v3826_v4 }
 0x1ef   :  { %2883 = vmatprep.subr.bf16.mxu0 %v3695_v0 }
 0x1f1   :  { %2864 = vmatpush3.bf16.msra.mxu1 %v3994_v57 }
 0x1f2   :  { %2865 = vmatprep.subr.bf16.mxu1 %v3695_v0  ;;  %2884 = vmatpush3.bf16.msra.mxu0 %v3833_v6 }
 0x1f3   :  { %2885 = vmatprep.subr.bf16.mxu0 %v3695_v0 }
 0x1f5   :  { %2866 = vmatpush3.bf16.msra.mxu1 %v4000_v58 }
 0x1f6   :  { %2867 = vmatprep.subr.bf16.mxu1 %v3695_v0  ;;  %2886 = vmatpush3.bf16.msra.mxu0 %v3840_v8 }
 0x1f7   :  { %2887 = vmatprep.subr.bf16.mxu0 %v3695_v0 }
 0x1f9   :  { %2868 = vmatpush3.bf16.msra.mxu1 %v4006_v59 }
 0x1fa   :  { %2869 = vmatprep.subr.bf16.mxu1 %v3695_v0  ;;  %2888 = vmatpush3.bf16.msra.mxu0 %v3846_v10 }
 0x1fb   :  { %2889 = vmatprep.subr.bf16.mxu0 %v3695_v0 }
 0x1fd   :  { %2870 = vmatpush3.bf16.msra.mxu1 %v4012_v60 }
 0x1fe   :  { %2871 = vmatprep.subr.bf16.mxu1 %v3695_v0  ;;  %2890 = vmatpush3.bf16.msra.mxu0 %v3856_v13 }
 0x1ff   :  { %2891 = vmatprep.subr.bf16.mxu0 %v3695_v0 }
 0x201   :  { %2872 = vmatpush3.bf16.msra.mxu1 %v4018_v61 }
 0x202   :  { %2873 = vmatprep.subr.bf16.mxu1 %v3695_v0  ;;  %2892 = vmatpush3.bf16.msra.mxu0 %v3863_v15 }
 0x203   :  { %2893 = vmatprep.subr.bf16.mxu0 %v3695_v0 }
 0x205   :  { %2874 = vmatpush3.bf16.msra.mxu1 %v4024_v62 }
 0x206   :  { %2894 = vmatpush3.bf16.msra.mxu0 %v3870_v17  ;;  %2939 = vmatprep.subr.bf16.mxu1 %v3695_v0 }
 0x207   :  { %2899 = vmatprep.subr.bf16.mxu0 %v3695_v0 }
 0x208   :  { %2876 = vmatmul.mubr.bf16.vlgmr.msra.gmra.mrb[4].mxu1 %v3697_v19 }
 0x209   :  { %2940 = vmatpush3.bf16.msra.mxu1 %v3820_v2  ;;  %2955 = vmatprep.mubr.msk.bf16.mxu1 %vm3696_vm0, %v3695_v0 }
 0x20a   :  { %2941 = vmatprep.subr.bf16.mxu1 %v3695_v0 }
 0x20d   :  { %2942 = vmatpush3.bf16.msra.mxu1 %v3826_v4 }
 0x20e   :  { %2943 = vmatprep.subr.bf16.mxu1 %v3695_v0 }
 0x211   :  { %2944 = vmatpush3.bf16.msra.mxu1 %v3833_v6 }
 0x212   :  { %2945 = vmatprep.subr.bf16.mxu1 %v3695_v0 }
 0x215   :  { %2946 = vmatpush3.bf16.msra.mxu1 %v3840_v8 }
 0x216   :  { %2947 = vmatprep.subr.bf16.mxu1 %v3695_v0 }
 0x219   :  { %2948 = vmatpush3.bf16.msra.mxu1 %v3846_v10 }
 0x21a   :  { %2949 = vmatprep.subr.bf16.mxu1 %v3695_v0 }
 0x21d   :  { %2950 = vmatpush3.bf16.msra.mxu1 %v3856_v13 }
 0x21e   :  { %2951 = vmatprep.subr.bf16.mxu1 %v3695_v0 }
 0x221   :  { %2952 = vmatpush3.bf16.msra.mxu1 %v3863_v15 }
 0x222   :  { %2953 = vmatprep.subr.bf16.mxu1 %v3695_v0 }
 0x225   :  { %2954 = vmatpush3.bf16.msra.mxu1 %v3870_v17 }
 0x226   :  { %2959 = vmatprep.subr.bf16.mxu1 %v3695_v0 }
 0x2bb   :  { %v419_v9 = vpop.f32.mrb[8].mxu0 }
 0x2bc   :  { %v425_v11 = vadd.f32 %v419_v9, %v383_v7  ;;  %v2837_v12 = vpop.f32.mrb[9].mxu0 }
 0x2bd   :  { %v422_v14 = vpop.f32.mrb[10].mxu0 }
 0x2be   :  { %v2433_v16 = vmul.f32 -1.442695, %v425_v11  ;;  %3466 = vtanh.f32 %v425_v11  ;;  %v2838_v18 = vpop.f32.mrb[11].mxu0 }
 0x2c0   :  { %3468 = vpow2.f32 %v2433_v16 }
 0x2c8   :  { %v3467_v19 = vpop.eup %3466 }
 0x2c9   :  { %435 = vrot.lane.b32.xlu0 %v3467_v19, %s3691_s21 }
 0x2ca   :  { %v3469_v25 = vpop.eup %3468 }
 0x2cb   :  { %v429_v26 = vadd.f32 1.0, %v3469_v25 }
 0x2cd   :  { %3470 = vrcp.f32 %v429_v26 }
 0x2d7   :  { %v3471_v27 = vpop.eup %3470 }
 0x2d8   :  { %433 = vrot.lane.b32.xlu1 %v3471_v27, %s3699_s11 }
 0x2db   :  { %v647_v30 = vpop.f32.mrb[4].mxu1 }
 0x2dc   :  { %v3299_v31 = vadd.f32 %v647_v30, %v4067_v28  ;;  %v2877_v32 = vpop.f32.mrb[5].mxu1  ;;  %437 = vrot.lane.b32.xlu1 %v3471_v27, %s3698_s30 }
 0x2dd   :  { %v650_v33 = vpop.f32.mrb[6].mxu1 }
 0x2de   :  { %v2450_v34 = vmul.f32 -1.442695, %v3299_v31  ;;  %3472 = vtanh.f32 %v3299_v31  ;;  %v2878_v35 = vpop.f32.mrb[7].mxu1 }
 0x2e0   :  { %3474 = vpow2.f32 %v2450_v34 }
 0x2e8   :  { %v3473_v36 = vpop.eup %3472 }
 0x2e9   :  { %663 = vrot.lane.b32.xlu1 %v3473_v36, %s3691_s21 }
 0x2ea   :  { %v3475_v39 = vpop.eup %3474 }
 0x2eb   :  { %v657_v41 = vadd.f32 1.0, %v3475_v39 }
 0x2ed   :  { %3476 = vrcp.f32 %v657_v41 }
 0x2f7   :  { %v3477_v43 = vpop.eup %3476 }
 0x2f8   :  { %661 = vrot.lane.b32.xlu0 %v3477_v43, %s3699_s11 }
 0x2fc   :  { %665 = vrot.lane.b32.xlu0 %v3477_v43, %s3698_s30 }
 0x33b   :  { %v436_v45 = vpop.permute.xlu0 %435 }
 0x33c   :  { %v440_v47 = vmul.f32 %v3471_v27, %v436_v45 }
 0x34a   :  { %v434_v46 = vpop.permute.xlu1 %433 }
 0x34b   :  { %v439_v48 = vmul.f32 %v434_v46, %v3978_v50 }
 0x34d   :  { %v4075_v49 = vadd.f32 %v440_v47, %v439_v48 }
 0x34e   :  { %v438_v52 = vpop.permute.xlu1 %437 }
 0x34f   :  { %3478 = vtanh.f32 %v4075_v49 }
 0x359   :  { %v3479_v51 = vpop.eup %3478 }
 0x35a   :  { %v443_v53 = vmul.f32 %v3479_v51, %v438_v52 }
 0x35b   :  { %v664_v7 = vpop.permute.xlu1 %663 }
 0x35c   :  { %v675_v55 = vpack.c.bf16 %v443_v53, %v443_v53  ;;  %v668_v11 = vmul.f32 %v3477_v43, %v664_v7 }
 0x35e   :  { %2896 = vmatmul.mubr.bf16.vlgmr.msra.gmra.mrb[12].mxu0 %v675_v55 }
 0x35f   :  { %2900 = vmatpush3.bf16.msra.mxu0 %v3902_v20  ;;  %2915 = vmatprep.mubr.msk.bf16.mxu0 %vm3696_vm0, %v3695_v0 }
 0x360   :  { %2901 = vmatprep.subr.bf16.mxu0 %v3695_v0 }
 0x363   :  { %2902 = vmatpush3.bf16.msra.mxu0 %v3908_v21 }
 0x364   :  { %2903 = vmatprep.subr.bf16.mxu0 %v3695_v0 }
 0x367   :  { %2904 = vmatpush3.bf16.msra.mxu0 %v3915_v22 }
 0x368   :  { %2905 = vmatprep.subr.bf16.mxu0 %v3695_v0 }
 0x36a   :  { %v662_v50 = vpop.permute.xlu0 %661 }
 0x36b   :  { %2906 = vmatpush3.bf16.msra.mxu0 %v3935_v37  ;;  %v667_v9 = vmul.f32 0.0, %v662_v50 }
 0x36c   :  { %2907 = vmatprep.subr.bf16.mxu0 %v3695_v0 }
 0x36d   :  { %v4102_v12 = vadd.f32 %v668_v11, %v667_v9 }
 0x36e   :  { %v666_v16 = vpop.permute.xlu0 %665 }
 0x36f   :  { %2908 = vmatpush3.bf16.msra.mxu0 %v3942_v38  ;;  %3480 = vtanh.f32 %v4102_v12 }
 0x370   :  { %2909 = vmatprep.subr.bf16.mxu0 %v3695_v0 }
 0x373   :  { %2910 = vmatpush3.bf16.msra.mxu0 %v3952_v40 }
 0x374   :  { %2911 = vmatprep.subr.bf16.mxu0 %v3695_v0 }
 0x377   :  { %2912 = vmatpush3.bf16.msra.mxu0 %v3961_v42 }
 0x378   :  { %2913 = vmatprep.subr.bf16.mxu0 %v3695_v0 }
 0x379   :  { %v3481_v14 = vpop.eup %3480 }
 0x37a   :  { %v671_v18 = vmul.f32 %v3481_v14, %v666_v16 }
 0x37b   :  { %2914 = vmatpush3.bf16.msra.mxu0 %v3972_v44 }
 0x37c   :  { %2919 = vmatprep.subr.bf16.mxu0 %v3695_v0  ;;  %v775_v19 = vpack.c.bf16 %v671_v18, %v671_v18 }
 0x37e   :  { %2916 = vmatmul.mubr.bf16.vlgmr.msra.gmra.mrb[16].mxu0 %v675_v55 }
 0x37f   :  { %2920 = vmatpush3.bf16.msra.mxu0 %v3981_v54  ;;  %2935 = vmatprep.mubr.msk.bf16.mxu0 %vm3696_vm0, %v3695_v0 }
 0x380   :  { %2921 = vmatprep.subr.bf16.mxu0 %v3695_v0 }
 0x383   :  { %2922 = vmatpush3.bf16.msra.mxu0 %v3984_v56 }
 0x384   :  { %2923 = vmatprep.subr.bf16.mxu0 %v3695_v0 }
 0x387   :  { %2924 = vmatpush3.bf16.msra.mxu0 %v3994_v57 }
 0x388   :  { %2925 = vmatprep.subr.bf16.mxu0 %v3695_v0 }
 0x38b   :  { %2926 = vmatpush3.bf16.msra.mxu0 %v4000_v58 }
 0x38c   :  { %2927 = vmatprep.subr.bf16.mxu0 %v3695_v0 }
 0x38f   :  { %2928 = vmatpush3.bf16.msra.mxu0 %v4006_v59 }
 0x390   :  { %2929 = vmatprep.subr.bf16.mxu0 %v3695_v0 }
 0x393   :  { %2930 = vmatpush3.bf16.msra.mxu0 %v4012_v60 }
 0x394   :  { %2931 = vmatprep.subr.bf16.mxu0 %v3695_v0 }
 0x397   :  { %2932 = vmatpush3.bf16.msra.mxu0 %v4018_v61 }
 0x398   :  { %2933 = vmatprep.subr.bf16.mxu0 %v3695_v0 }
 0x39b   :  { %2934 = vmatpush3.bf16.msra.mxu0 %v4024_v62 }
 0x39c   :  { %2999 = vmatprep.subr.bf16.mxu0 %v3695_v0 }
 0x39e   :  { %2936 = vmatmul.mubr.bf16.vlgmr.msra.gmra.mrb[16].mxu0 %v775_v19  ;;  %v3586_v19 = vld [vmem:[#allocation4] sm:$0xff]  }
 0x39f   :  { %3000 = vmatpush3.bf16.msra.mxu0 %v3820_v2  ;;  %3015 = vmatprep.mubr.msk.bf16.mxu0 %vm3696_vm0, %v3695_v0  ;;  %v674_v2 = vadd.f32 %v3925_v24, %v3923_v23 }
 0x3a0   :  { %3001 = vmatprep.subr.bf16.mxu0 %v3695_v0 }
 0x3a3   :  { %3002 = vmatpush3.bf16.msra.mxu0 %v3826_v4 }
 0x3a4   :  { %3003 = vmatprep.subr.bf16.mxu0 %v3695_v0 }
 0x3a7   :  { %3004 = vmatpush3.bf16.msra.mxu0 %v3833_v6 }
 0x3a8   :  { %3005 = vmatprep.subr.bf16.mxu0 %v3695_v0 }
 0x3ab   :  { %3006 = vmatpush3.bf16.msra.mxu0 %v3840_v8 }
 0x3ac   :  { %3007 = vmatprep.subr.bf16.mxu0 %v3695_v0 }
 0x3af   :  { %3008 = vmatpush3.bf16.msra.mxu0 %v3846_v10 }
 0x3b0   :  { %3009 = vmatprep.subr.bf16.mxu0 %v3695_v0 }
 0x3b3   :  { %3010 = vmatpush3.bf16.msra.mxu0 %v3856_v13 }
 0x3b4   :  { %3011 = vmatprep.subr.bf16.mxu0 %v3695_v0 }
 0x3b7   :  { %3012 = vmatpush3.bf16.msra.mxu0 %v3863_v15 }
 0x3b8   :  { %3013 = vmatprep.subr.bf16.mxu0 %v3695_v0 }
 0x3bb   :  { %3014 = vmatpush3.bf16.msra.mxu0 %v3870_v17 }
 0x3bc   :  { %3019 = vmatprep.subr.bf16.mxu0 %v3695_v0 }
 0x431   :  { %v710_v4 = vpop.f32.mrb[12].mxu0 }
 0x432   :  { %v716_v6 = vadd.f32 %v710_v4, %v674_v2  ;;  %v2897_v8 = vpop.f32.mrb[13].mxu0  ;;  %v3587_v2 = vld [vmem:[#allocation4 + $0x8] sm:$0xff]   ;;  %v3588_v4 = vld [vmem:[#allocation4 + $0x10] sm:$0xff]  }
 0x433   :  { %v713_v10 = vpop.f32.mrb[14].mxu0  ;;  %v3590_v8 = vld [vmem:[#allocation4 + $0x20] sm:$0xff]  }
 0x434   :  { %v2451_v25 = vmul.f32 -1.442695, %v716_v6  ;;  %3482 = vtanh.f32 %v716_v6  ;;  %v2898_v13 = vpop.f32.mrb[15].mxu0  ;;  %v3589_v6 = vld [vmem:[#allocation4 + $0x18] sm:$0xff]   ;;  %v3591_v10 = vld [vmem:[#allocation4 + $0x28] sm:$0xff]  }
 0x435   :  { %v3593_v13 = vld [vmem:[#allocation4 + $0x38] sm:$0xff]  }
 0x436   :  { %3484 = vpow2.f32 %v2451_v25  ;;  %v3592_v25 = vld [vmem:[#allocation4 + $0x30] sm:$0xff]  }
 0x43e   :  { %v3483_v26 = vpop.eup %3482 }
 0x43f   :  { %726 = vrot.lane.b32.xlu0 %v3483_v26, %s3691_s21  ;;  %v837_v26 = vadd.f32 %v3928_v29, %v3923_v23 }
 0x440   :  { %v3485_v15 = vpop.eup %3484 }
 0x441   :  { %v720_v27 = vadd.f32 1.0, %v3485_v15 }
 0x443   :  { %3486 = vrcp.f32 %v720_v27 }
 0x44d   :  { %v3487_v17 = vpop.eup %3486 }
 0x44e   :  { %724 = vrot.lane.b32.xlu1 %v3487_v17, %s3699_s11 }
 0x452   :  { %728 = vrot.lane.b32.xlu1 %v3487_v17, %s3698_s30 }
 0x471   :  { %v810_v24 = vpop.f32.mrb[16].mxu0 }
 0x472   :  { %v3300_v30 = vadd.f32 %v810_v24, %v4067_v28  ;;  %v2937_v31 = vpop.f32.mrb[17].mxu0 }
 0x473   :  { %v813_v32 = vpop.f32.mrb[18].mxu0 }
 0x474   :  { %v2452_v33 = vmul.f32 -1.442695, %v3300_v30  ;;  %3488 = vtanh.f32 %v3300_v30  ;;  %v2938_v34 = vpop.f32.mrb[19].mxu0 }
 0x476   :  { %3490 = vpow2.f32 %v2452_v33 }
 0x47e   :  { %v3489_v35 = vpop.eup %3488 }
 0x47f   :  { %826 = vrot.lane.b32.xlu1 %v3489_v35, %s3691_s21 }
 0x480   :  { %v3491_v36 = vpop.eup %3490 }
 0x481   :  { %v820_v39 = vadd.f32 1.0, %v3491_v36 }
 0x483   :  { %3492 = vrcp.f32 %v820_v39 }
 0x48d   :  { %v3493_v41 = vpop.eup %3492 }
 0x48e   :  { %824 = vrot.lane.b32.xlu0 %v3493_v41, %s3699_s11 }
 0x492   :  { %828 = vrot.lane.b32.xlu0 %v3493_v41, %s3698_s30 }
 0x4b1   :  { %v727_v43 = vpop.permute.xlu0 %726 }
 0x4b2   :  { %v731_v46 = vmul.f32 %v3487_v17, %v727_v43 }
 0x4c0   :  { %v725_v45 = vpop.permute.xlu1 %724 }
 0x4c1   :  { %v730_v47 = vmul.f32 %v725_v45, %v4075_v49 }
 0x4c3   :  { %v4145_v48 = vadd.f32 %v731_v46, %v730_v47 }
 0x4c4   :  { %v729_v52 = vpop.permute.xlu1 %728 }
 0x4c5   :  { %3494 = vtanh.f32 %v4145_v48 }
 0x4cf   :  { %v3495_v51 = vpop.eup %3494 }
 0x4d0   :  { %v734_v53 = vmul.f32 %v3495_v51, %v729_v52 }
 0x4d2   :  { %v838_v55 = vpack.c.bf16 %v734_v53, %v734_v53 }
 0x4d4   :  { %2956 = vmatmul.mubr.bf16.vlgmr.msra.gmra.mrb[8].mxu1 %v838_v55 }
 0x4d5   :  { %2960 = vmatpush3.bf16.msra.mxu1 %v3902_v20  ;;  %2975 = vmatprep.mubr.msk.bf16.mxu1 %vm3696_vm0, %v3695_v0 }
 0x4d6   :  { %2961 = vmatprep.subr.bf16.mxu1 %v3695_v0 }
 0x4d9   :  { %2962 = vmatpush3.bf16.msra.mxu1 %v3908_v21 }
 0x4da   :  { %2963 = vmatprep.subr.bf16.mxu1 %v3695_v0 }
 0x4dd   :  { %2964 = vmatpush3.bf16.msra.mxu1 %v3915_v22 }
 0x4de   :  { %2965 = vmatprep.subr.bf16.mxu1 %v3695_v0 }
 0x4e1   :  { %2966 = vmatpush3.bf16.msra.mxu1 %v3935_v37 }
 0x4e2   :  { %2967 = vmatprep.subr.bf16.mxu1 %v3695_v0 }
 0x4e5   :  { %2968 = vmatpush3.bf16.msra.mxu1 %v3942_v38 }
 0x4e6   :  { %2969 = vmatprep.subr.bf16.mxu1 %v3695_v0 }
 0x4e9   :  { %2970 = vmatpush3.bf16.msra.mxu1 %v3952_v40 }
 0x4ea   :  { %2971 = vmatprep.subr.bf16.mxu1 %v3695_v0 }
 0x4ed   :  { %2972 = vmatpush3.bf16.msra.mxu1 %v3961_v42 }
 0x4ee   :  { %2973 = vmatprep.subr.bf16.mxu1 %v3695_v0 }
 0x4f1   :  { %2974 = vmatpush3.bf16.msra.mxu1 %v3972_v44  ;;  %v827_v49 = vpop.permute.xlu1 %826 }
 0x4f2   :  { %2979 = vmatprep.subr.bf16.mxu1 %v3695_v0  ;;  %v831_v7 = vmul.f32 %v3493_v41, %v827_v49 }
 0x4f4   :  { %2976 = vmatmul.mubr.bf16.vlgmr.msra.gmra.mrb[12].mxu1 %v838_v55 }
 0x4f5   :  { %2980 = vmatpush3.bf16.msra.mxu1 %v3981_v54  ;;  %2995 = vmatprep.mubr.msk.bf16.mxu1 %vm3696_vm0, %v3695_v0 }
 0x4f6   :  { %2981 = vmatprep.subr.bf16.mxu1 %v3695_v0 }
 0x4f9   :  { %2982 = vmatpush3.bf16.msra.mxu1 %v3984_v56 }
 0x4fa   :  { %2983 = vmatprep.subr.bf16.mxu1 %v3695_v0 }
 0x4fd   :  { %2984 = vmatpush3.bf16.msra.mxu1 %v3994_v57 }
 0x4fe   :  { %2985 = vmatprep.subr.bf16.mxu1 %v3695_v0 }
 0x500   :  { %v825_v50 = vpop.permute.xlu0 %824 }
 0x501   :  { %v830_v9 = vmul.f32 %v825_v50, %v4102_v12  ;;  %2986 = vmatpush3.bf16.msra.mxu1 %v4000_v58 }
 0x502   :  { %2987 = vmatprep.subr.bf16.mxu1 %v3695_v0 }
 0x503   :  { %v4177_v11 = vadd.f32 %v831_v7, %v830_v9 }
 0x504   :  { %v829_v14 = vpop.permute.xlu0 %828 }
 0x505   :  { %3496 = vtanh.f32 %v4177_v11  ;;  %2988 = vmatpush3.bf16.msra.mxu1 %v4006_v59 }
 0x506   :  { %2989 = vmatprep.subr.bf16.mxu1 %v3695_v0 }
 0x509   :  { %2990 = vmatpush3.bf16.msra.mxu1 %v4012_v60 }
 0x50a   :  { %2991 = vmatprep.subr.bf16.mxu1 %v3695_v0 }
 0x50d   :  { %2992 = vmatpush3.bf16.msra.mxu1 %v4018_v61 }
 0x50e   :  { %2993 = vmatprep.subr.bf16.mxu1 %v3695_v0 }
 0x50f   :  { %v3497_v12 = vpop.eup %3496 }
 0x510   :  { %v834_v16 = vmul.f32 %v3497_v12, %v829_v14 }
 0x511   :  { %2994 = vmatpush3.bf16.msra.mxu1 %v4024_v62 }
 0x512   :  { %v938_v18 = vpack.c.bf16 %v834_v16, %v834_v16  ;;  %3059 = vmatprep.subr.bf16.mxu1 %v3695_v0 }
 0x514   :  { %2996 = vmatmul.mubr.bf16.vlgmr.msra.gmra.mrb[12].mxu1 %v938_v18 }
 0x515   :  { %3060 = vmatpush3.bf16.msra.mxu1 %v3586_v19  ;;  %3075 = vmatprep.mubr.msk.bf16.mxu1 %vm3696_vm0, %v3695_v0 }
 0x516   :  { %3061 = vmatprep.subr.bf16.mxu1 %v3695_v0 }
 0x519   :  { %3062 = vmatpush3.bf16.msra.mxu1 %v3587_v2 }
 0x51a   :  { %3063 = vmatprep.subr.bf16.mxu1 %v3695_v0 }
 0x51d   :  { %3064 = vmatpush3.bf16.msra.mxu1 %v3588_v4 }
 0x51e   :  { %3065 = vmatprep.subr.bf16.mxu1 %v3695_v0 }
 0x521   :  { %3066 = vmatpush3.bf16.msra.mxu1 %v3589_v6 }
 0x522   :  { %3067 = vmatprep.subr.bf16.mxu1 %v3695_v0 }
 0x525   :  { %3068 = vmatpush3.bf16.msra.mxu1 %v3590_v8 }
 0x526   :  { %3069 = vmatprep.subr.bf16.mxu1 %v3695_v0 }
 0x529   :  { %3070 = vmatpush3.bf16.msra.mxu1 %v3591_v10 }
 0x52a   :  { %3071 = vmatprep.subr.bf16.mxu1 %v3695_v0 }
 0x52d   :  { %3072 = vmatpush3.bf16.msra.mxu1 %v3592_v25  ;;  %v1000_v25 = vadd.f32 %v3923_v23, %v4054_v1 }
 0x52e   :  { %3073 = vmatprep.subr.bf16.mxu1 %v3695_v0 }
 0x531   :  { %3074 = vmatpush3.bf16.msra.mxu1 %v3593_v13 }
 0x532   :  { %3079 = vmatprep.subr.bf16.mxu1 %v3695_v0 }
 0x5a7   :  { %v873_v15 = vpop.f32.mrb[8].mxu1 }
 0x5a8   :  { %v879_v27 = vadd.f32 %v873_v15, %v837_v26  ;;  %v2957_v17 = vpop.f32.mrb[9].mxu1 }
 0x5a9   :  { %v876_v24 = vpop.f32.mrb[10].mxu1 }
 0x5aa   :  { %v2453_v30 = vmul.f32 -1.442695, %v879_v27  ;;  %3498 = vtanh.f32 %v879_v27  ;;  %v2958_v31 = vpop.f32.mrb[11].mxu1 }
 0x5ac   :  { %3500 = vpow2.f32 %v2453_v30 }
 0x5b4   :  { %v3499_v32 = vpop.eup %3498 }
 0x5b5   :  { %889 = vrot.lane.b32.xlu0 %v3499_v32, %s3691_s21 }
 0x5b6   :  { %v3501_v33 = vpop.eup %3500 }
 0x5b7   :  { %v883_v34 = vadd.f32 1.0, %v3501_v33 }
 0x5b9   :  { %3502 = vrcp.f32 %v883_v34 }
 0x5c3   :  { %v3503_v35 = vpop.eup %3502 }
 0x5c4   :  { %887 = vrot.lane.b32.xlu1 %v3503_v35, %s3699_s11 }
 0x5c8   :  { %891 = vrot.lane.b32.xlu1 %v3503_v35, %s3698_s30 }
 0x5e7   :  { %v973_v29 = vpop.f32.mrb[12].mxu1 }
 0x5e8   :  { %v3301_v36 = vadd.f32 %v973_v29, %v4067_v28  ;;  %v2997_v39 = vpop.f32.mrb[13].mxu1 }
 0x5e9   :  { %v976_v41 = vpop.f32.mrb[14].mxu1 }
 0x5ea   :  { %v2454_v43 = vmul.f32 -1.442695, %v3301_v36  ;;  %3504 = vtanh.f32 %v3301_v36  ;;  %v2998_v45 = vpop.f32.mrb[15].mxu1 }
 0x5ec   :  { %3506 = vpow2.f32 %v2454_v43 }
 0x5f4   :  { %v3505_v46 = vpop.eup %3504 }
 0x5f5   :  { %989 = vrot.lane.b32.xlu1 %v3505_v46, %s3691_s21 }
 0x5f6   :  { %v3507_v47 = vpop.eup %3506 }
 0x5f7   :  { %v983_v51 = vadd.f32 1.0, %v3507_v47 }
 0x5f9   :  { %3508 = vrcp.f32 %v983_v51 }
 0x603   :  { %v3509_v52 = vpop.eup %3508 }
 0x604   :  { %987 = vrot.lane.b32.xlu0 %v3509_v52, %s3699_s11 }
 0x608   :  { %991 = vrot.lane.b32.xlu0 %v3509_v52, %s3698_s30 }
 0x627   :  { %v890_v53 = vpop.permute.xlu0 %889 }
 0x628   :  { %v894_v49 = vmul.f32 %v3503_v35, %v890_v53 }
 0x636   :  { %v888_v55 = vpop.permute.xlu1 %887 }
 0x637   :  { %v893_v50 = vmul.f32 %v888_v55, %v4145_v48 }
 0x639   :  { %v4208_v7 = vadd.f32 %v894_v49, %v893_v50 }
 0x63a   :  { %v892_v12 = vpop.permute.xlu1 %891 }
 0x63b   :  { %3510 = vtanh.f32 %v4208_v7 }
 0x645   :  { %v3511_v9 = vpop.eup %3510 }
 0x646   :  { %v897_v14 = vmul.f32 %v3511_v9, %v892_v12 }
 0x648   :  { %v1001_v16 = vpack.c.bf16 %v897_v14, %v897_v14  ;;  %v3387_v14 = vld [vmem:[#allocation4 + $0x8] sm:$0xff]  }
 0x64a   :  { %3016 = vmatmul.mubr.bf16.vlgmr.msra.gmra.mrb[20].mxu0 %v1001_v16 }
 0x64b   :  { %3020 = vmatpush3.bf16.msra.mxu0 %v3902_v20  ;;  %3035 = vmatprep.mubr.msk.bf16.mxu0 %vm3696_vm0, %v3695_v0 }
 0x64c   :  { %3021 = vmatprep.subr.bf16.mxu0 %v3695_v0 }
 0x64f   :  { %3022 = vmatpush3.bf16.msra.mxu0 %v3908_v21 }
 0x650   :  { %3023 = vmatprep.subr.bf16.mxu0 %v3695_v0 }
 0x653   :  { %3024 = vmatpush3.bf16.msra.mxu0 %v3915_v22 }
 0x654   :  { %3025 = vmatprep.subr.bf16.mxu0 %v3695_v0 }
 0x657   :  { %3026 = vmatpush3.bf16.msra.mxu0 %v3935_v37 }
 0x658   :  { %3027 = vmatprep.subr.bf16.mxu0 %v3695_v0 }
 0x65b   :  { %3028 = vmatpush3.bf16.msra.mxu0 %v3942_v38 }
 0x65c   :  { %3029 = vmatprep.subr.bf16.mxu0 %v3695_v0 }
 0x65f   :  { %3030 = vmatpush3.bf16.msra.mxu0 %v3952_v40 }
 0x660   :  { %3031 = vmatprep.subr.bf16.mxu0 %v3695_v0 }
 0x663   :  { %3032 = vmatpush3.bf16.msra.mxu0 %v3961_v42 }
 0x664   :  { %3033 = vmatprep.subr.bf16.mxu0 %v3695_v0 }
 0x667   :  { %3034 = vmatpush3.bf16.msra.mxu0 %v3972_v44  ;;  %v990_v48 = vpop.permute.xlu1 %989 }
 0x668   :  { %3039 = vmatprep.subr.bf16.mxu0 %v3695_v0  ;;  %v994_v19 = vmul.f32 %v3509_v52, %v990_v48  ;;  %v3389_v48 = vld [vmem:[#allocation4 + $0x18] sm:$0xff]  }
 0x66a   :  { %3036 = vmatmul.mubr.bf16.vlgmr.msra.gmra.mrb[24].mxu0 %v1001_v16  ;;  %v3388_v16 = vld [vmem:[#allocation4 + $0x10] sm:$0xff]  }
 0x66b   :  { %3040 = vmatpush3.bf16.msra.mxu0 %v3981_v54  ;;  %3055 = vmatprep.mubr.msk.bf16.mxu0 %vm3696_vm0, %v3695_v0 }
 0x66c   :  { %3041 = vmatprep.subr.bf16.mxu0 %v3695_v0 }
 0x66f   :  { %3042 = vmatpush3.bf16.msra.mxu0 %v3984_v56 }
 0x670   :  { %3043 = vmatprep.subr.bf16.mxu0 %v3695_v0 }
 0x673   :  { %3044 = vmatpush3.bf16.msra.mxu0 %v3994_v57 }
 0x674   :  { %3045 = vmatprep.subr.bf16.mxu0 %v3695_v0 }
 0x676   :  { %v988_v18 = vpop.permute.xlu0 %987 }
 0x677   :  { %v993_v2 = vmul.f32 %v988_v18, %v4177_v11  ;;  %3046 = vmatpush3.bf16.msra.mxu0 %v4000_v58 }
 0x678   :  { %3047 = vmatprep.subr.bf16.mxu0 %v3695_v0 }
 0x679   :  { %v4240_v4 = vadd.f32 %v994_v19, %v993_v2  ;;  %v3390_v2 = vld [vmem:[#allocation4 + $0x20] sm:$0xff]  }
 0x67a   :  { %v992_v6 = vpop.permute.xlu0 %991 }
 0x67b   :  { %3512 = vtanh.f32 %v4240_v4  ;;  %3048 = vmatpush3.bf16.msra.mxu0 %v4006_v59 }
 0x67c   :  { %3049 = vmatprep.subr.bf16.mxu0 %v3695_v0 }
 0x67f   :  { %3050 = vmatpush3.bf16.msra.mxu0 %v4012_v60 }
 0x680   :  { %3051 = vmatprep.subr.bf16.mxu0 %v3695_v0 }
 0x683   :  { %3052 = vmatpush3.bf16.msra.mxu0 %v4018_v61 }
 0x684   :  { %3053 = vmatprep.subr.bf16.mxu0 %v3695_v0 }
 0x685   :  { %v3513_v11 = vpop.eup %3512 }
 0x686   :  { %v997_v8 = vmul.f32 %v3513_v11, %v992_v6  ;;  %v3392_v11 = vld [vmem:[#allocation4 + $0x30] sm:$0xff]  }
 0x687   :  { %3054 = vmatpush3.bf16.msra.mxu0 %v4024_v62 }
 0x688   :  { %v1101_v10 = vpack.c.bf16 %v997_v8, %v997_v8  ;;  %3119 = vmatprep.subr.bf16.mxu0 %v3695_v0  ;;  %v3393_v8 = vld [vmem:[#allocation4 + $0x38] sm:$0xff]  }
 0x68a   :  { %3056 = vmatmul.mubr.bf16.vlgmr.msra.gmra.mrb[24].mxu0 %v1101_v10 }
 0x68b   :  { %3135 = vmatprep.mubr.msk.bf16.mxu0 %vm3696_vm0, %v3695_v0 }
 0x71d   :  { %v1036_v13 = vpop.f32.mrb[20].mxu0 }
 0x71e   :  { %v1042_v26 = vadd.f32 %v1036_v13, %v1000_v25  ;;  %v3017_v15 = vpop.f32.mrb[21].mxu0 }
 0x71f   :  { %v1039_v27 = vpop.f32.mrb[22].mxu0 }
 0x720   :  { %v2455_v17 = vmul.f32 -1.442695, %v1042_v26  ;;  %3514 = vtanh.f32 %v1042_v26  ;;  %v3018_v24 = vpop.f32.mrb[23].mxu0 }
 0x722   :  { %3516 = vpow2.f32 %v2455_v17 }
 0x72a   :  { %v3515_v30 = vpop.eup %3514 }
 0x72b   :  { %1052 = vrot.lane.b32.xlu0 %v3515_v30, %s3691_s21 }
 0x72c   :  { %v3517_v31 = vpop.eup %3516 }
 0x72d   :  { %v1046_v32 = vadd.f32 1.0, %v3517_v31 }
 0x72f   :  { %3518 = vrcp.f32 %v1046_v32 }
 0x739   :  { %v3519_v33 = vpop.eup %3518 }
 0x73a   :  { %1050 = vrot.lane.b32.xlu1 %v3519_v33, %s3699_s11 }
 0x73e   :  { %1054 = vrot.lane.b32.xlu1 %v3519_v33, %s3698_s30 }
 0x75d   :  { %v1136_v23 = vpop.f32.mrb[24].mxu0 }
 0x75e   :  { %v3302_v1 = vadd.f32 %v1136_v23, %v4067_v28  ;;  %v3057_v34 = vpop.f32.mrb[25].mxu0 }
 0x75f   :  { %v1139_v35 = vpop.f32.mrb[26].mxu0 }
 0x760   :  { %v2456_v29 = vmul.f32 -1.442695, %v3302_v1  ;;  %3520 = vtanh.f32 %v3302_v1  ;;  %v3058_v36 = vpop.f32.mrb[27].mxu0 }
 0x761   :  { %v3394_v36 = vld [vmem:[%s4534_s4] sm:$0xff]  }
 0x762   :  { %3522 = vpow2.f32 %v2456_v29 }
 0x76a   :  { %v3521_v39 = vpop.eup %3520 }
 0x76b   :  { %1152 = vrot.lane.b32.xlu1 %v3521_v39, %s3691_s21 }
 0x76c   :  { %v3523_v41 = vpop.eup %3522 }
 0x76d   :  { %v1146_v43 = vadd.f32 1.0, %v3523_v41  ;;  %v3395_v41 = vld [vmem:[%s4534_s4 + $0x8] sm:$0xff]  }
 0x76f   :  { %3524 = vrcp.f32 %v1146_v43  ;;  %v3396_v43 = vld [vmem:[%s4534_s4 + $0x10] sm:$0xff]  }
 0x779   :  { %v3525_v45 = vpop.eup %3524 }
 0x77a   :  { %1150 = vrot.lane.b32.xlu0 %v3525_v45, %s3699_s11 }
 0x77e   :  { %1154 = vrot.lane.b32.xlu0 %v3525_v45, %s3698_s30 }
 0x79d   :  { %v1053_v46 = vpop.permute.xlu0 %1052 }
 0x79e   :  { %v1057_v51 = vmul.f32 %v3519_v33, %v1053_v46  ;;  %v3398_v46 = vld [vmem:[%s4534_s4 + $0x20] sm:$0xff]  }
 0x7ac   :  { %v1051_v47 = vpop.permute.xlu1 %1050 }
 0x7ad   :  { %v1056_v52 = vmul.f32 %v1051_v47, %v4208_v7  ;;  %v3399_v47 = vld [vmem:[%s4534_s4 + $0x28] sm:$0xff]  }
 0x7af   :  { %v4263_v53 = vadd.f32 %v1057_v51, %v1056_v52  ;;  %v3400_v51 = vld [vmem:[%s4534_s4 + $0x30] sm:$0xff]   ;;  %v3401_v52 = vld [vmem:[%s4534_s4 + $0x38] sm:$0xff]  }
 0x7b0   :  { %v1055_v49 = vpop.permute.xlu1 %1054 }
 0x7b1   :  { %3526 = vtanh.f32 %v4263_v53 }
 0x7bb   :  { %v3527_v55 = vpop.eup %3526 }
 0x7bc   :  { %v1060_v50 = vmul.f32 %v3527_v55, %v1055_v49  ;;  %v3403_v55 = vld [vmem:[#allocation6 + $0x8] sm:$0xff]   ;;  %v3404_v49 = vld [vmem:[#allocation6 + $0x10] sm:$0xff]  }
 0x7be   :  { %v1164_v9 = vpack.c.bf16 %v1060_v50, %v1060_v50  ;;  %v3405_v50 = vld [vmem:[#allocation6 + $0x18] sm:$0xff]  }
 0x7c0   :  { %3076 = vmatmul.mubr.bf16.vlgmr.msra.gmra.mrb[16].mxu1 %v1164_v9 }
 0x7c1   :  { %3080 = vmatpush3.bf16.msra.mxu1 %v3902_v20  ;;  %3095 = vmatprep.mubr.msk.bf16.mxu1 %vm3696_vm0, %v3695_v0 }
 0x7c2   :  { %3081 = vmatprep.subr.bf16.mxu1 %v3695_v0 }
 0x7c5   :  { %3082 = vmatpush3.bf16.msra.mxu1 %v3908_v21 }
 0x7c6   :  { %3083 = vmatprep.subr.bf16.mxu1 %v3695_v0 }
 0x7c9   :  { %3084 = vmatpush3.bf16.msra.mxu1 %v3915_v22 }
 0x7ca   :  { %3085 = vmatprep.subr.bf16.mxu1 %v3695_v0 }
 0x7cd   :  { %3086 = vmatpush3.bf16.msra.mxu1 %v3935_v37 }
 0x7ce   :  { %3087 = vmatprep.subr.bf16.mxu1 %v3695_v0 }
 0x7d1   :  { %3088 = vmatpush3.bf16.msra.mxu1 %v3942_v38 }
 0x7d2   :  { %3089 = vmatprep.subr.bf16.mxu1 %v3695_v0 }
 0x7d5   :  { %3090 = vmatpush3.bf16.msra.mxu1 %v3952_v40 }
 0x7d6   :  { %3091 = vmatprep.subr.bf16.mxu1 %v3695_v0 }
 0x7d9   :  { %3092 = vmatpush3.bf16.msra.mxu1 %v3961_v42 }
 0x7da   :  { %3093 = vmatprep.subr.bf16.mxu1 %v3695_v0 }
 0x7dd   :  { %3094 = vmatpush3.bf16.msra.mxu1 %v3972_v44  ;;  %v1153_v20 = vpop.permute.xlu1 %1152 }
 0x7de   :  { %3099 = vmatprep.subr.bf16.mxu1 %v3695_v0  ;;  %v1157_v22 = vmul.f32 %v3525_v45, %v1153_v20  ;;  %v3397_v45 = vld [vmem:[%s4534_s4 + $0x18] sm:$0xff]  }
 0x7e0   :  { %3096 = vmatmul.mubr.bf16.vlgmr.msra.gmra.mrb[20].mxu1 %v1164_v9 }
 0x7e1   :  { %3100 = vmatpush3.bf16.msra.mxu1 %v3981_v54  ;;  %3115 = vmatprep.mubr.msk.bf16.mxu1 %vm3696_vm0, %v3695_v0 }
 0x7e2   :  { %3101 = vmatprep.subr.bf16.mxu1 %v3695_v0 }
 0x7e5   :  { %3102 = vmatpush3.bf16.msra.mxu1 %v3984_v56  ;;  %v4311_v56 = vld [vmem:[%s4533_s3] sm:$0xff] }
 0x7e6   :  { %3103 = vmatprep.subr.bf16.mxu1 %v3695_v0 }
 0x7e9   :  { %3104 = vmatpush3.bf16.msra.mxu1 %v3994_v57  ;;  %v1163_v57 = vadd.f32 %v4311_v56, %v4058_v5 }
 0x7ea   :  { %3105 = vmatprep.subr.bf16.mxu1 %v3695_v0 }
 0x7ec   :  { %v1151_v21 = vpop.permute.xlu0 %1150 }
 0x7ed   :  { %v1156_v37 = vmul.f32 %v1151_v21, %v4240_v4  ;;  %3106 = vmatpush3.bf16.msra.mxu1 %v4000_v58  ;;  %v3391_v4 = vld [vmem:[#allocation4 + $0x28] sm:$0xff]  }
 0x7ee   :  { %3107 = vmatprep.subr.bf16.mxu1 %v3695_v0 }
 0x7ef   :  { %v4295_v38 = vadd.f32 %v1157_v22, %v1156_v37  ;;  %v3406_v37 = vld [vmem:[#allocation6 + $0x20] sm:$0xff]  }
 0x7f0   :  { %v1155_v42 = vpop.permute.xlu0 %1154 }
 0x7f1   :  { %3528 = vtanh.f32 %v4295_v38  ;;  %3108 = vmatpush3.bf16.msra.mxu1 %v4006_v59 }
 0x7f2   :  { %3109 = vmatprep.subr.bf16.mxu1 %v3695_v0 }
 0x7f5   :  { %3110 = vmatpush3.bf16.msra.mxu1 %v4012_v60 }
 0x7f6   :  { %3111 = vmatprep.subr.bf16.mxu1 %v3695_v0 }
 0x7f9   :  { %3112 = vmatpush3.bf16.msra.mxu1 %v4018_v61  ;;  %v3386_v61 = vld [vmem:[#allocation4] sm:$0xff]  }
 0x7fa   :  { %3113 = vmatprep.subr.bf16.mxu1 %v3695_v0  ;;  %3120 = vmatpush3.bf16.msra.mxu0 %v3386_v61 }
 0x7fb   :  { %v3529_v40 = vpop.eup %3528  ;;  %3121 = vmatprep.subr.bf16.mxu0 %v3695_v0 }
 0x7fc   :  { %v1160_v44 = vmul.f32 %v3529_v40, %v1155_v42  ;;  %v3407_v42 = vld [vmem:[#allocation6 + $0x28] sm:$0xff]  }
 0x7fd   :  { %3114 = vmatpush3.bf16.msra.mxu1 %v4024_v62 }
 0x7fe   :  { %v1264_v54 = vpack.c.bf16 %v1160_v44, %v1160_v44  ;;  %3179 = vmatprep.subr.bf16.mxu1 %v3695_v0  ;;  %3122 = vmatpush3.bf16.msra.mxu0 %v3387_v14  ;;  %v3408_v44 = vld [vmem:[#allocation6 + $0x30] sm:$0xff]  }
 0x7ff   :  { %3123 = vmatprep.subr.bf16.mxu0 %v3695_v0 }
 0x800   :  { %3116 = vmatmul.mubr.bf16.vlgmr.msra.gmra.mrb[20].mxu1 %v1264_v54  ;;  %v3409_v54 = vld [vmem:[#allocation6 + $0x38] sm:$0xff]  }
 0x801   :  { %3195 = vmatprep.mubr.msk.bf16.mxu1 %vm3696_vm0, %v3695_v0 }
 0x802   :  { %3124 = vmatpush3.bf16.msra.mxu0 %v3388_v16 }
 0x803   :  { %3125 = vmatprep.subr.bf16.mxu0 %v3695_v0 }
 0x806   :  { %3126 = vmatpush3.bf16.msra.mxu0 %v3389_v48 }
 0x807   :  { %3127 = vmatprep.subr.bf16.mxu0 %v3695_v0 }
 0x80a   :  { %3128 = vmatpush3.bf16.msra.mxu0 %v3390_v2 }
 0x80b   :  { %3129 = vmatprep.subr.bf16.mxu0 %v3695_v0 }
 0x80e   :  { %3130 = vmatpush3.bf16.msra.mxu0 %v3391_v4 }
 0x80f   :  { %3131 = vmatprep.subr.bf16.mxu0 %v3695_v0 }
 0x812   :  { %3132 = vmatpush3.bf16.msra.mxu0 %v3392_v11  ;;  %v3414_v11 = vld [vmem:[#allocation4 + $0x20] sm:$0xff]  }
 0x813   :  { %3133 = vmatprep.subr.bf16.mxu0 %v3695_v0 }
 0x816   :  { %3134 = vmatpush3.bf16.msra.mxu0 %v3393_v8  ;;  %v3416_v8 = vld [vmem:[#allocation4 + $0x30] sm:$0xff]  }
 0x817   :  { %3139 = vmatprep.subr.bf16.mxu0 %v3695_v0 }
 0x893   :  { %v1199_v58 = vpop.f32.mrb[16].mxu1 }
 0x894   :  { %v1205_v59 = vadd.f32 %v1199_v58, %v1163_v57  ;;  %v3077_v60 = vpop.f32.mrb[17].mxu1 }
 0x895   :  { %v1202_v62 = vpop.f32.mrb[18].mxu1  ;;  %v1328_v60 = vadd.f32 %v4311_v56, %v4052_v63 }
 0x896   :  { %v2457_v7 = vmul.f32 -1.442695, %v1205_v59  ;;  %3530 = vtanh.f32 %v1205_v59  ;;  %v3078_v12 = vpop.f32.mrb[19].mxu1 }
 0x897   :  { %v3410_v12 = vld [vmem:[#allocation4] sm:$0xff]  }
 0x898   :  { %3532 = vpow2.f32 %v2457_v7  ;;  %3180 = vmatpush3.bf16.msra.mxu1 %v3410_v12 }
 0x899   :  { %3181 = vmatprep.subr.bf16.mxu1 %v3695_v0 }
 0x8a0   :  { %v3531_v5 = vpop.eup %3530 }
 0x8a1   :  { %1215 = vrot.lane.b32.xlu0 %v3531_v5, %s3691_s21  ;;  %v3411_v5 = vld [vmem:[#allocation4 + $0x8] sm:$0xff]  }
 0x8a2   :  { %v3533_v18 = vpop.eup %3532  ;;  %3182 = vmatpush3.bf16.msra.mxu1 %v3411_v5 }
 0x8a3   :  { %v1209_v19 = vadd.f32 1.0, %v3533_v18  ;;  %v3412_v18 = vld [vmem:[#allocation4 + $0x10] sm:$0xff]   ;;  %3183 = vmatprep.subr.bf16.mxu1 %v3695_v0 }
 0x8a5   :  { %3534 = vrcp.f32 %v1209_v19  ;;  %v3413_v19 = vld [vmem:[#allocation4 + $0x18] sm:$0xff]  }
 0x8a6   :  { %3184 = vmatpush3.bf16.msra.mxu1 %v3412_v18  ;;  %v3434_v18 = vld [vmem:[%s4534_s4] sm:$0xff]  }
 0x8a7   :  { %3185 = vmatprep.subr.bf16.mxu1 %v3695_v0 }
 0x8aa   :  { %3186 = vmatpush3.bf16.msra.mxu1 %v3413_v19 }
 0x8ab   :  { %3187 = vmatprep.subr.bf16.mxu1 %v3695_v0 }
 0x8ae   :  { %3188 = vmatpush3.bf16.msra.mxu1 %v3414_v11  ;;  %v3437_v11 = vld [vmem:[%s4534_s4 + $0x18] sm:$0xff]  }
 0x8af   :  { %v3535_v6 = vpop.eup %3534  ;;  %3189 = vmatprep.subr.bf16.mxu1 %v3695_v0 }
 0x8b0   :  { %1213 = vrot.lane.b32.xlu1 %v3535_v6, %s3699_s11 }
 0x8b4   :  { %1217 = vrot.lane.b32.xlu1 %v3535_v6, %s3698_s30 }
 0x8d3   :  { %v1299_v10 = vpop.f32.mrb[20].mxu1 }
 0x8d4   :  { %v3303_v25 = vadd.f32 %v1299_v10, %v4067_v28  ;;  %v3117_v13 = vpop.f32.mrb[21].mxu1 }
 0x8d5   :  { %v1302_v26 = vpop.f32.mrb[22].mxu1  ;;  %v4404_v13 = vld [vmem:[%s4536_s6] sm:$0xff] }
 0x8d6   :  { %v2458_v15 = vmul.f32 -1.442695, %v3303_v25  ;;  %3536 = vtanh.f32 %v3303_v25  ;;  %v3118_v27 = vpop.f32.mrb[23].mxu1  ;;  %v3417_v25 = vld [vmem:[#allocation4 + $0x38] sm:$0xff]  }
 0x8d8   :  { %3538 = vpow2.f32 %v2458_v15 }
 0x8e0   :  { %v3537_v17 = vpop.eup %3536 }
 0x8e1   :  { %1315 = vrot.lane.b32.xlu1 %v3537_v17, %s3691_s21 }
 0x8e2   :  { %v3539_v24 = vpop.eup %3538 }
 0x8e3   :  { %v1309_v30 = vadd.f32 1.0, %v3539_v24 }
 0x8e5   :  { %3540 = vrcp.f32 %v1309_v30 }
 0x8ef   :  { %v3541_v31 = vpop.eup %3540 }
 0x8f0   :  { %1313 = vrot.lane.b32.xlu0 %v3541_v31, %s3699_s11 }
 0x8f4   :  { %1317 = vrot.lane.b32.xlu0 %v3541_v31, %s3698_s30 }
 0x913   :  { %v1216_v32 = vpop.permute.xlu0 %1215 }
 0x914   :  { %v1220_v28 = vmul.f32 %v3535_v6, %v1216_v32  ;;  %v3415_v6 = vld [vmem:[#allocation4 + $0x28] sm:$0xff]  }
 0x915   :  { %3190 = vmatpush3.bf16.msra.mxu1 %v3415_v6 }
 0x916   :  { %3191 = vmatprep.subr.bf16.mxu1 %v3695_v0 }
 0x919   :  { %3192 = vmatpush3.bf16.msra.mxu1 %v3416_v8  ;;  %v3438_v8 = vld [vmem:[%s4534_s4 + $0x20] sm:$0xff]  }
 0x91a   :  { %3193 = vmatprep.subr.bf16.mxu1 %v3695_v0 }
 0x91d   :  { %3194 = vmatpush3.bf16.msra.mxu1 %v3417_v25  ;;  %v3440_v25 = vld [vmem:[%s4534_s4 + $0x30] sm:$0xff]  }
 0x91e   :  { %3199 = vmatprep.subr.bf16.mxu1 %v3695_v0 }
 0x922   :  { %v1214_v33 = vpop.permute.xlu1 %1213 }
 0x923   :  { %v1219_v23 = vmul.f32 %v1214_v33, %v4263_v53  ;;  %v3402_v53 = vld [vmem:[#allocation6] sm:$0xff]  }
 0x925   :  { %v4331_v1 = vadd.f32 %v1220_v28, %v1219_v23 }
 0x926   :  { %v1218_v35 = vpop.permute.xlu1 %1217 }
 0x927   :  { %3542 = vtanh.f32 %v4331_v1 }
 0x931   :  { %v3543_v34 = vpop.eup %3542 }
 0x932   :  { %v1223_v29 = vmul.f32 %v3543_v34, %v1218_v35 }
 0x934   :  { %v1329_v39 = vpack.c.bf16 %v1223_v29, %v1223_v29 }
 0x936   :  { %3136 = vmatmul.mubr.bf16.vlgmr.msra.gmra.mrb[28].mxu0 %v1329_v39 }
 0x937   :  { %3140 = vmatpush3.bf16.msra.mxu0 %v3394_v36  ;;  %3155 = vmatprep.mubr.msk.bf16.mxu0 %vm3696_vm0, %v3695_v0 }
 0x938   :  { %3141 = vmatprep.subr.bf16.mxu0 %v3695_v0 }
 0x93b   :  { %3142 = vmatpush3.bf16.msra.mxu0 %v3395_v41 }
 0x93c   :  { %3143 = vmatprep.subr.bf16.mxu0 %v3695_v0 }
 0x93f   :  { %3144 = vmatpush3.bf16.msra.mxu0 %v3396_v43 }
 0x940   :  { %3145 = vmatprep.subr.bf16.mxu0 %v3695_v0 }
 0x943   :  { %3146 = vmatpush3.bf16.msra.mxu0 %v3397_v45  ;;  %v3418_v45 = vld [vmem:[%s4534_s4] sm:$0xff]  }
 0x944   :  { %3147 = vmatprep.subr.bf16.mxu0 %v3695_v0 }
 0x947   :  { %3148 = vmatpush3.bf16.msra.mxu0 %v3398_v46 }
 0x948   :  { %3149 = vmatprep.subr.bf16.mxu0 %v3695_v0 }
 0x94b   :  { %3150 = vmatpush3.bf16.msra.mxu0 %v3399_v47  ;;  %v3419_v47 = vld [vmem:[%s4534_s4 + $0x8] sm:$0xff]  }
 0x94c   :  { %3151 = vmatprep.subr.bf16.mxu0 %v3695_v0 }
 0x94f   :  { %3152 = vmatpush3.bf16.msra.mxu0 %v3400_v51  ;;  %v3421_v51 = vld [vmem:[%s4534_s4 + $0x18] sm:$0xff]  }
 0x950   :  { %3153 = vmatprep.subr.bf16.mxu0 %v3695_v0 }
 0x953   :  { %3154 = vmatpush3.bf16.msra.mxu0 %v3401_v52  ;;  %v1316_v9 = vpop.permute.xlu1 %1315  ;;  %v3422_v52 = vld [vmem:[%s4534_s4 + $0x20] sm:$0xff]  }
 0x954   :  { %3159 = vmatprep.subr.bf16.mxu0 %v3695_v0  ;;  %v1320_v21 = vmul.f32 %v3541_v31, %v1316_v9  ;;  %v3427_v9 = vld [vmem:[#allocation6 + $0x8] sm:$0xff]  }
 0x956   :  { %3156 = vmatmul.mubr.bf16.vlgmr.msra.gmra.mrb[32].mxu0 %v1329_v39 }
 0x957   :  { %3160 = vmatpush3.bf16.msra.mxu0 %v3402_v53  ;;  %3175 = vmatprep.mubr.msk.bf16.mxu0 %vm3696_vm0, %v3695_v0  ;;  %v3423_v53 = vld [vmem:[%s4534_s4 + $0x28] sm:$0xff]  }
 0x958   :  { %3161 = vmatprep.subr.bf16.mxu0 %v3695_v0 }
 0x95b   :  { %3162 = vmatpush3.bf16.msra.mxu0 %v3403_v55  ;;  %v3424_v55 = vld [vmem:[%s4534_s4 + $0x30] sm:$0xff]  }
 0x95c   :  { %3163 = vmatprep.subr.bf16.mxu0 %v3695_v0 }
 0x95f   :  { %3164 = vmatpush3.bf16.msra.mxu0 %v3404_v49  ;;  %v3425_v49 = vld [vmem:[%s4534_s4 + $0x38] sm:$0xff]  }
 0x960   :  { %3165 = vmatprep.subr.bf16.mxu0 %v3695_v0 }
 0x962   :  { %v1314_v20 = vpop.permute.xlu0 %1313 }
 0x963   :  { %v1319_v22 = vmul.f32 %v1314_v20, %v4295_v38  ;;  %3166 = vmatpush3.bf16.msra.mxu0 %v3405_v50  ;;  %v3426_v50 = vld [vmem:[#allocation6] sm:$0xff]   ;;  %v3428_v20 = vld [vmem:[#allocation6 + $0x10] sm:$0xff]  }
 0x964   :  { %3167 = vmatprep.subr.bf16.mxu0 %v3695_v0 }
 0x965   :  { %v4375_v40 = vadd.f32 %v1320_v21, %v1319_v22  ;;  %v3429_v21 = vld [vmem:[#allocation6 + $0x18] sm:$0xff]  }
 0x966   :  { %v1318_v57 = vpop.permute.xlu0 %1317 }
 0x967   :  { %3544 = vtanh.f32 %v4375_v40  ;;  %3168 = vmatpush3.bf16.msra.mxu0 %v3406_v37 }
 0x968   :  { %3169 = vmatprep.subr.bf16.mxu0 %v3695_v0 }
 0x96b   :  { %3170 = vmatpush3.bf16.msra.mxu0 %v3407_v42 }
 0x96c   :  { %3171 = vmatprep.subr.bf16.mxu0 %v3695_v0 }
 0x96f   :  { %3172 = vmatpush3.bf16.msra.mxu0 %v3408_v44 }
 0x970   :  { %3173 = vmatprep.subr.bf16.mxu0 %v3695_v0 }
 0x971   :  { %v3545_v38 = vpop.eup %3544 }
 0x972   :  { %v4381_v58 = vmul.f32 %v3545_v38, %v1318_v57  ;;  %v3431_v57 = vld [vmem:[#allocation6 + $0x28] sm:$0xff]  }
 0x973   :  { %3174 = vmatpush3.bf16.msra.mxu0 %v3409_v54  ;;  %v3430_v54 = vld [vmem:[#allocation6 + $0x20] sm:$0xff]  }
 0x974   :  { %v1558_v59 = vpack.c.bf16 %v4381_v58, %v4381_v58  ;;  %3239 = vmatprep.subr.bf16.mxu0 %v3695_v0 }
 0x976   :  { %3176 = vmatmul.mubr.bf16.vlgmr.msra.gmra.mrb[32].mxu0 %v1558_v59  ;;  %v3432_v59 = vld [vmem:[#allocation6 + $0x30] sm:$0xff]  }
 0x977   :  { %3255 = vmatprep.mubr.msk.bf16.mxu0 %vm3696_vm0, %v3695_v0  ;;  %3240 = vmatpush3.bf16.msra.mxu0 %v3434_v18  ;;  %v3454_v18 = vld [vmem:[#allocation8 + $0x20] sm:$0xff]  }
 0x978   :  { %3241 = vmatprep.subr.bf16.mxu0 %v3695_v0 }
 0xa09   :  { %v1428_v61 = vpop.f32.mrb[28].mxu0 }
 0xa0a   :  { %v1434_v62 = vadd.f32 %v1428_v61, %v1328_v60  ;;  %v3137_v7 = vpop.f32.mrb[29].mxu0  ;;  %v3433_v60 = vld [vmem:[#allocation6 + $0x38] sm:$0xff]  }
 0xa0b   :  { %v1431_v14 = vpop.f32.mrb[30].mxu0 }
 0xa0c   :  { %v2467_v16 = vmul.f32 -1.442695, %v1434_v62  ;;  %3546 = vtanh.f32 %v1434_v62  ;;  %v3138_v48 = vpop.f32.mrb[31].mxu0  ;;  %v1687_v14 = vadd.f32 %v4311_v56, %v4056_v3  ;;  %v3436_v3 = vld [vmem:[%s4534_s4 + $0x10] sm:$0xff]  }
 0xa0e   :  { %3548 = vpow2.f32 %v2467_v16 }
 0xa16   :  { %v3547_v63 = vpop.eup %3546 }
 0xa17   :  { %1444 = vrot.lane.b32.xlu0 %v3547_v63, %s3691_s21 }
 0xa18   :  { %v3549_v2 = vpop.eup %3548 }
 0xa19   :  { %v1438_v4 = vadd.f32 1.0, %v3549_v2 }
 0xa1b   :  { %3550 = vrcp.f32 %v1438_v4 }
 0xa25   :  { %v3551_v10 = vpop.eup %3550 }
 0xa26   :  { %1442 = vrot.lane.b32.xlu1 %v3551_v10, %s3699_s11 }
 0xa2a   :  { %1446 = vrot.lane.b32.xlu1 %v3551_v10, %s3698_s30 }
 0xa49   :  { %v1657_v26 = vpop.f32.mrb[32].mxu0 }
 0xa4a   :  { %v3304_v15 = vadd.f32 %v1657_v26, %v4404_v13  ;;  %v3177_v27 = vpop.f32.mrb[33].mxu0 }
 0xa4b   :  { %v1660_v17 = vpop.f32.mrb[34].mxu0 }
 0xa4c   :  { %v2484_v24 = vmul.f32 -1.442695, %v3304_v15  ;;  %3552 = vtanh.f32 %v3304_v15  ;;  %v3178_v30 = vpop.f32.mrb[35].mxu0  ;;  %v3441_v15 = vld [vmem:[%s4534_s4 + $0x38] sm:$0xff]  }
 0xa4e   :  { %3554 = vpow2.f32 %v2484_v24 }
 0xa56   :  { %v3553_v31 = vpop.eup %3552 }
 0xa57   :  { %1673 = vrot.lane.b32.xlu1 %v3553_v31, %s3691_s21 }
 0xa58   :  { %v3555_v32 = vpop.eup %3554 }
 0xa59   :  { %v1667_v33 = vadd.f32 1.0, %v3555_v32 }
 0xa5b   :  { %3556 = vrcp.f32 %v1667_v33 }
 0xa65   :  { %v3557_v28 = vpop.eup %3556 }
 0xa66   :  { %1671 = vrot.lane.b32.xlu0 %v3557_v28, %s3699_s11 }
 0xa6a   :  { %1675 = vrot.lane.b32.xlu0 %v3557_v28, %s3698_s30 }
 0xa89   :  { %v1445_v23 = vpop.permute.xlu0 %1444 }
 0xa8a   :  { %v1449_v35 = vmul.f32 %v3551_v10, %v1445_v23  ;;  %v3439_v10 = vld [vmem:[%s4534_s4 + $0x28] sm:$0xff]  }
 0xa98   :  { %v1443_v34 = vpop.permute.xlu1 %1442 }
 0xa99   :  { %v1448_v29 = vmul.f32 %v1443_v34, %v4331_v1  ;;  %v3420_v1 = vld [vmem:[%s4534_s4 + $0x10] sm:$0xff]  }
 0xa9b   :  { %v4411_v36 = vadd.f32 %v1449_v35, %v1448_v29 }
 0xa9c   :  { %v1447_v41 = vpop.permute.xlu1 %1446 }
 0xa9d   :  { %3558 = vtanh.f32 %v4411_v36 }
 0xaa7   :  { %v3559_v39 = vpop.eup %3558 }
 0xaa8   :  { %v1452_v43 = vmul.f32 %v3559_v39, %v1447_v41 }
 0xaaa   :  { %v1688_v46 = vpack.c.bf16 %v1452_v43, %v1452_v43 }
 0xaac   :  { %3196 = vmatmul.mubr.bf16.vlgmr.msra.gmra.mrb[24].mxu1 %v1688_v46 }
 0xaad   :  { %3200 = vmatpush3.bf16.msra.mxu1 %v3418_v45  ;;  %3215 = vmatprep.mubr.msk.bf16.mxu1 %vm3696_vm0, %v3695_v0 }
 0xaae   :  { %3201 = vmatprep.subr.bf16.mxu1 %v3695_v0 }
 0xab1   :  { %3202 = vmatpush3.bf16.msra.mxu1 %v3419_v47 }
 0xab2   :  { %3203 = vmatprep.subr.bf16.mxu1 %v3695_v0 }
 0xab5   :  { %3204 = vmatpush3.bf16.msra.mxu1 %v3420_v1  ;;  %v3442_v1 = vld [vmem:[#allocation6] sm:$0xff]  }
 0xab6   :  { %3205 = vmatprep.subr.bf16.mxu1 %v3695_v0 }
 0xab9   :  { %3206 = vmatpush3.bf16.msra.mxu1 %v3421_v51 }
 0xaba   :  { %3207 = vmatprep.subr.bf16.mxu1 %v3695_v0 }
 0xabd   :  { %3208 = vmatpush3.bf16.msra.mxu1 %v3422_v52  ;;  %v3443_v52 = vld [vmem:[#allocation6 + $0x8] sm:$0xff]  }
 0xabe   :  { %3209 = vmatprep.subr.bf16.mxu1 %v3695_v0 }
 0xac1   :  { %3210 = vmatpush3.bf16.msra.mxu1 %v3423_v53  ;;  %v3444_v53 = vld [vmem:[#allocation6 + $0x10] sm:$0xff]  }
 0xac2   :  { %3211 = vmatprep.subr.bf16.mxu1 %v3695_v0 }
 0xac5   :  { %3212 = vmatpush3.bf16.msra.mxu1 %v3424_v55  ;;  %v3446_v55 = vld [vmem:[#allocation6 + $0x20] sm:$0xff]  }
 0xac6   :  { %3213 = vmatprep.subr.bf16.mxu1 %v3695_v0 }
 0xac9   :  { %3214 = vmatpush3.bf16.msra.mxu1 %v3425_v49  ;;  %v1674_v22 = vpop.permute.xlu1 %1673  ;;  %v3447_v49 = vld [vmem:[#allocation6 + $0x28] sm:$0xff]  }
 0xaca   :  { %3219 = vmatprep.subr.bf16.mxu1 %v3695_v0  ;;  %v1678_v42 = vmul.f32 %v3557_v28, %v1674_v22 }
 0xacc   :  { %3216 = vmatmul.mubr.bf16.vlgmr.msra.gmra.mrb[28].mxu1 %v1688_v46 }
 0xacd   :  { %3220 = vmatpush3.bf16.msra.mxu1 %v3426_v50  ;;  %3235 = vmatprep.mubr.msk.bf16.mxu1 %vm3696_vm0, %v3695_v0  ;;  %v3448_v50 = vld [vmem:[#allocation6 + $0x30] sm:$0xff]  }
 0xace   :  { %3221 = vmatprep.subr.bf16.mxu1 %v3695_v0 }
 0xad1   :  { %3222 = vmatpush3.bf16.msra.mxu1 %v3427_v9  ;;  %v3449_v9 = vld [vmem:[#allocation6 + $0x38] sm:$0xff]  }
 0xad2   :  { %3223 = vmatprep.subr.bf16.mxu1 %v3695_v0 }
 0xad5   :  { %3224 = vmatpush3.bf16.msra.mxu1 %v3428_v20 }
 0xad6   :  { %3225 = vmatprep.subr.bf16.mxu1 %v3695_v0 }
 0xad8   :  { %v1672_v37 = vpop.permute.xlu0 %1671 }
 0xad9   :  { %v1677_v44 = vmul.f32 %v1672_v37, %v4375_v40  ;;  %3226 = vmatpush3.bf16.msra.mxu1 %v3429_v21 }
 0xada   :  { %3227 = vmatprep.subr.bf16.mxu1 %v3695_v0 }
 0xadb   :  { %v4455_v38 = vadd.f32 %v1678_v42, %v1677_v44 }
 0xadc   :  { %v1676_v61 = vpop.permute.xlu0 %1675 }
 0xadd   :  { %3560 = vtanh.f32 %v4455_v38  ;;  %3228 = vmatpush3.bf16.msra.mxu1 %v3430_v54 }
 0xade   :  { %3229 = vmatprep.subr.bf16.mxu1 %v3695_v0 }
 0xae1   :  { %3230 = vmatpush3.bf16.msra.mxu1 %v3431_v57 }
 0xae2   :  { %3231 = vmatprep.subr.bf16.mxu1 %v3695_v0 }
 0xae5   :  { %3232 = vmatpush3.bf16.msra.mxu1 %v3432_v59 }
 0xae6   :  { %3233 = vmatprep.subr.bf16.mxu1 %v3695_v0 }
 0xae7   :  { %v3561_v40 = vpop.eup %3560 }
 0xae8   :  { %v1681_v62 = vmul.f32 %v3561_v40, %v1676_v61 }
 0xae9   :  { %3234 = vmatpush3.bf16.msra.mxu1 %v3433_v60 }
 0xaea   :  { %v1917_v7 = vpack.c.bf16 %v1681_v62, %v1681_v62  ;;  %v2279_v12 = vpack.c.bf16 %v1681_v62, %v4381_v58  ;;  %v3435_v58 = vld [vmem:[%s4534_s4 + $0x8] sm:$0xff]   ;;  %v3450_v62 = vld [vmem:[#allocation8] sm:$0xff]  }
 0xaeb   :  { %3242 = vmatpush3.bf16.msra.mxu0 %v3435_v58  ;;  %3279 = vmatprep.subr.bf16.mxu1 %v3450_v62  ;;  %v3457_v58 = vld [vmem:[#allocation8 + $0x38] sm:$0xff]  }
 0xaec   :  { %3236 = vmatmul.mubr.bf16.vlgmr.msra.gmra.mrb[28].mxu1 %v1917_v7  ;;  %3243 = vmatprep.subr.bf16.mxu0 %v3695_v0  ;;  %v3451_v7 = vld [vmem:[#allocation8 + $0x8] sm:$0xff]  }
 0xaed   :  { %3295 = vmatprep.mubr.bf16.mxu1 %v2279_v12  ;;  %3280 = vmatpush3.bf16.msra.mxu1 %v3450_v62 }
 0xaee   :  { %3281 = vmatprep.subr.bf16.mxu1 %v3451_v7 }
 0xaef   :  { %3244 = vmatpush3.bf16.msra.mxu0 %v3436_v3 }
 0xaf0   :  { %3245 = vmatprep.subr.bf16.mxu0 %v3695_v0 }
 0xaf1   :  { %3282 = vmatpush3.bf16.msra.mxu1 %v3451_v7 }
 0xaf3   :  { %3246 = vmatpush3.bf16.msra.mxu0 %v3437_v11 }
 0xaf4   :  { %3247 = vmatprep.subr.bf16.mxu0 %v3695_v0 }
 0xaf7   :  { %3248 = vmatpush3.bf16.msra.mxu0 %v3438_v8 }
 0xaf8   :  { %3249 = vmatprep.subr.bf16.mxu0 %v3695_v0 }
 0xafb   :  { %3250 = vmatpush3.bf16.msra.mxu0 %v3439_v10 }
 0xafc   :  { %3251 = vmatprep.subr.bf16.mxu0 %v3695_v0 }
 0xaff   :  { %3252 = vmatpush3.bf16.msra.mxu0 %v3440_v25 }
 0xb00   :  { %3253 = vmatprep.subr.bf16.mxu0 %v3695_v0 }
 0xb03   :  { %3254 = vmatpush3.bf16.msra.mxu0 %v3441_v15  ;;  %v2528_v15 = vld [vmem:[#allocation9] ss:$0 sm:$0xff] }
 0xb04   :  { %3259 = vmatprep.subr.bf16.mxu0 %v3695_v0 }
 0xb7f   :  { %v1787_v16 = vpop.f32.mrb[24].mxu1 }
 0xb80   :  { %v1793_v48 = vadd.f32 %v1787_v16, %v1687_v14  ;;  %v3197_v5 = vpop.f32.mrb[25].mxu1  ;;  %v3453_v16 = vld [vmem:[#allocation8 + $0x18] sm:$0xff]  }
 0xb81   :  { %v1790_v19 = vpop.f32.mrb[26].mxu1 }
 0xb82   :  { %v2493_v63 = vmul.f32 -1.442695, %v1793_v48  ;;  %3562 = vtanh.f32 %v1793_v48  ;;  %v3198_v2 = vpop.f32.mrb[27].mxu1  ;;  %v3455_v19 = vld [vmem:[#allocation8 + $0x28] sm:$0xff]  }
 0xb84   :  { %3564 = vpow2.f32 %v2493_v63  ;;  %v3456_v63 = vld [vmem:[#allocation8 + $0x30] sm:$0xff]  }
 0xb8c   :  { %v3563_v56 = vpop.eup %3562 }
 0xb8d   :  { %1803 = vrot.lane.b32.xlu0 %v3563_v56, %s3691_s21 }
 0xb8e   :  { %v3565_v4 = vpop.eup %3564 }
 0xb8f   :  { %v1797_v6 = vadd.f32 1.0, %v3565_v4 }
 0xb91   :  { %3566 = vrcp.f32 %v1797_v6 }
 0xb9b   :  { %v3567_v26 = vpop.eup %3566 }
 0xb9c   :  { %1801 = vrot.lane.b32.xlu1 %v3567_v26, %s3699_s11 }
 0xba0   :  { %1805 = vrot.lane.b32.xlu1 %v3567_v26, %s3698_s30 }
 0xbbf   :  { %v2016_v27 = vpop.f32.mrb[28].mxu1 }
 0xbc0   :  { %v3305_v17 = vadd.f32 %v2016_v27, %v4404_v13  ;;  %v3237_v24 = vpop.f32.mrb[29].mxu1 }
 0xbc1   :  { %v2019_v30 = vpop.f32.mrb[30].mxu1 }
 0xbc2   :  { %v2510_v31 = vmul.f32 -1.442695, %v3305_v17  ;;  %3568 = vtanh.f32 %v3305_v17  ;;  %v3238_v32 = vpop.f32.mrb[31].mxu1 }
 0xbc4   :  { %3570 = vpow2.f32 %v2510_v31 }
 0xbcc   :  { %v3569_v33 = vpop.eup %3568 }
 0xbcd   :  { %2032 = vrot.lane.b32.xlu1 %v3569_v33, %s3691_s21 }
 0xbce   :  { %v3571_v28 = vpop.eup %3570 }
 0xbcf   :  { %v2026_v23 = vadd.f32 1.0, %v3571_v28 }
 0xbd1   :  { %3572 = vrcp.f32 %v2026_v23 }
 0xbdb   :  { %v3573_v34 = vpop.eup %3572 }
 0xbdc   :  { %2030 = vrot.lane.b32.xlu0 %v3573_v34, %s3699_s11 }
 0xbe0   :  { %2034 = vrot.lane.b32.xlu0 %v3573_v34, %s3698_s30 }
 0xbff   :  { %v1804_v35 = vpop.permute.xlu0 %1803 }
 0xc00   :  { %v1808_v39 = vmul.f32 %v3567_v26, %v1804_v35 }
 0xc0e   :  { %v1802_v29 = vpop.permute.xlu1 %1801 }
 0xc0f   :  { %v1807_v41 = vmul.f32 %v1802_v29, %v4411_v36  ;;  %v3445_v36 = vld [vmem:[#allocation6 + $0x18] sm:$0xff]  }
 0xc11   :  { %v1809_v43 = vadd.f32 %v1808_v39, %v1807_v41 }
 0xc12   :  { %v1806_v46 = vpop.permute.xlu1 %1805 }
 0xc13   :  { %3574 = vtanh.f32 %v1809_v43 }
 0xc1d   :  { %v3575_v45 = vpop.eup %3574 }
 0xc1e   :  { %v1811_v47 = vmul.f32 %v3575_v45, %v1806_v46 }
 0xc20   :  { %v2043_v51 = vpack.c.bf16 %v1811_v47, %v1811_v47 }
 0xc22   :  { %3256 = vmatmul.mubr.bf16.vlgmr.msra.gmra.mrb[36].mxu0 %v2043_v51 }
 0xc23   :  { %3260 = vmatpush3.bf16.msra.mxu0 %v3442_v1  ;;  %3275 = vmatprep.mubr.msk.bf16.mxu0 %vm3696_vm0, %v3695_v0 }
 0xc24   :  { %3261 = vmatprep.subr.bf16.mxu0 %v3695_v0 }
 0xc27   :  { %3262 = vmatpush3.bf16.msra.mxu0 %v3443_v52 }
 0xc28   :  { %3263 = vmatprep.subr.bf16.mxu0 %v3695_v0 }
 0xc2b   :  { %3264 = vmatpush3.bf16.msra.mxu0 %v3444_v53 }
 0xc2c   :  { %3265 = vmatprep.subr.bf16.mxu0 %v3695_v0 }
 0xc2f   :  { %3266 = vmatpush3.bf16.msra.mxu0 %v3445_v36 }
 0xc30   :  { %3267 = vmatprep.subr.bf16.mxu0 %v3695_v0 }
 0xc33   :  { %3268 = vmatpush3.bf16.msra.mxu0 %v3446_v55 }
 0xc34   :  { %3269 = vmatprep.subr.bf16.mxu0 %v3695_v0 }
 0xc37   :  { %3270 = vmatpush3.bf16.msra.mxu0 %v3447_v49 }
 0xc38   :  { %3271 = vmatprep.subr.bf16.mxu0 %v3695_v0 }
 0xc3b   :  { %3272 = vmatpush3.bf16.msra.mxu0 %v3448_v50 }
 0xc3c   :  { %3273 = vmatprep.subr.bf16.mxu0 %v3695_v0 }
 0xc3f   :  { %3274 = vmatpush3.bf16.msra.mxu0 %v3449_v9  ;;  %v2033_v20 = vpop.permute.xlu1 %2032 }
 0xc40   :  { %v2037_v22 = vmul.f32 %v3573_v34, %v2033_v20 }
 0xc4e   :  { %v2031_v21 = vpop.permute.xlu0 %2030 }
 0xc4f   :  { %v2036_v37 = vmul.f32 %v2031_v21, %v4455_v38  ;;  %v3452_v38 = vld [vmem:[#allocation8 + $0x10] sm:$0xff]  }
 0xc50   :  { %3283 = vmatprep.subr.bf16.mxu1 %v3452_v38 }
 0xc51   :  { %v2038_v42 = vadd.f32 %v2037_v22, %v2036_v37  ;;  %3284 = vmatpush3.bf16.msra.mxu1 %v3452_v38 }
 0xc52   :  { %v2035_v54 = vpop.permute.xlu0 %2034  ;;  %3285 = vmatprep.subr.bf16.mxu1 %v3453_v16 }
 0xc53   :  { %3576 = vtanh.f32 %v2038_v42 }
 0xc55   :  { %3286 = vmatpush3.bf16.msra.mxu1 %v3453_v16 }
 0xc56   :  { %3287 = vmatprep.subr.bf16.mxu1 %v3454_v18 }
 0xc59   :  { %3288 = vmatpush3.bf16.msra.mxu1 %v3454_v18 }
 0xc5a   :  { %3289 = vmatprep.subr.bf16.mxu1 %v3455_v19 }
 0xc5d   :  { %v3577_v44 = vpop.eup %3576  ;;  %3290 = vmatpush3.bf16.msra.mxu1 %v3455_v19 }
 0xc5e   :  { %v2040_v57 = vmul.f32 %v3577_v44, %v2035_v54  ;;  %3291 = vmatprep.subr.bf16.mxu1 %v3456_v63 }
 0xc60   :  { %v2149_v59 = vpack.c.bf16 %v2040_v57, %v2040_v57 }
 0xc61   :  { %3292 = vmatpush3.bf16.msra.mxu1 %v3456_v63 }
 0xc62   :  { %3276 = vmatmul.mubr.bf16.vlgmr.msra.gmra.mrb[36].mxu0 %v2149_v59  ;;  %3293 = vmatprep.subr.bf16.mxu1 %v3457_v58 }
 0xc65   :  { %3294 = vmatpush3.bf16.msra.mxu1 %v3457_v58 }
 0xd35   :  { %v2248_v60 = vpop.f32.mrb[36].mxu0 }
 0xd36   :  { %v3306_v40 = vadd.f32 %v2248_v60, %v4404_v13  ;;  %v3277_v61 = vpop.f32.mrb[37].mxu0 }
 0xd37   :  { %v2251_v0 = vpop.f32.mrb[38].mxu0 }
 0xd38   :  { %v2527_v12 = vmul.f32 -1.442695, %v3306_v40  ;;  %3578 = vtanh.f32 %v3306_v40  ;;  %v3278_v14 = vpop.f32.mrb[39].mxu0 }
 0xd3a   :  { %3580 = vpow2.f32 %v2527_v12 }
 0xd42   :  { %v3579_v48 = vpop.eup %3578 }
 0xd43   :  { %2264 = vrot.lane.b32.xlu0 %v3579_v48, %s3691_s21 }
 0xd44   :  { %v3581_v13 = vpop.eup %3580 }
 0xd45   :  { %v2258_v5 = vadd.f32 1.0, %v3581_v13 }
 0xd47   :  { %3582 = vrcp.f32 %v2258_v5 }
 0xd51   :  { %v3583_v2 = vpop.eup %3582 }
 0xd52   :  { %2262 = vrot.lane.b32.xlu1 %v3583_v2, %s3699_s11 }
 0xd56   :  { %2266 = vrot.lane.b32.xlu1 %v3583_v2, %s3698_s30 }
 0xdb5   :  { %v2265_v3 = vpop.permute.xlu0 %2264 }
 0xdb6   :  { %v2269_v4 = vmul.f32 %v3583_v2, %v2265_v3 }
 0xdc4   :  { %v2263_v56 = vpop.permute.xlu1 %2262 }
 0xdc5   :  { %v2268_v11 = vmul.f32 %v2263_v56, %v2038_v42 }
 0xdc7   :  { %v2270_v6 = vadd.f32 %v2269_v4, %v2268_v11 }
 0xdc8   :  { %v2267_v10 = vpop.permute.xlu1 %2266 }
 0xdc9   :  { %3584 = vtanh.f32 %v2270_v6 }
 0xdd3   :  { %v3585_v8 = vpop.eup %3584 }
 0xdd4   :  { %v2272_v25 = vmul.f32 %v3585_v8, %v2267_v10 }
 0xdd6   :  { %v2280_v26 = vpack.c.bf16 %v2272_v25, %v2040_v57 }
 0xdd8   :  { %3296 = vmatmul.mubr.bf16.vlgmr.msra.gmra.mrb[32].mxu1 %v2280_v26 }
 0xeab   :  { %v3297_v27 = vpop.f32.mrb[32].mxu1 }
 0xeac   :  { %v2395_v17 = vadd.f32 %v3297_v27, %v2528_v15  ;;  %v2386_v24 = vpop.f32.mrb[33].mxu1 }
 0xead   :  { %v2387_v30 = vadd.f32 %v2528_v15, %v2386_v24  ;;  %v3298_v31 = vpop.f32.mrb[34].mxu1 }
 0xeae   :  { %2403 = vst [vmem:[%s4539_s9 + $0x10] sm:$0xff] %v2395_v17  ;;  %v2398_v32 = vadd.f32 %v3298_v31, %v2528_v15  ;;  %v2389_v33 = vpop.f32.mrb[35].mxu1 }
 0xeaf   :  { %2401 = vst [vmem:[%s4539_s9] sm:$0xff] %v2387_v30  ;;  %v2390_v28 = vadd.f32 %v2528_v15, %v2389_v33 }
 0xeb0   :  { %2404 = vst [vmem:[%s4539_s9 + $0x18] sm:$0xff] %v2398_v32 }
 0xeb1   :  { %2402 = vst [vmem:[%s4539_s9 + $0x8] sm:$0xff] %v2390_v28 }
 0xeb2   :  { %2409 = vsyncpa [#allocation5], 1 }
 0xeb3   :  { %2410 = vsyncpa [#allocation7], 1 }
 0xeb4   :  { %2411 = vsyncpa [#allocation10], 1 }

</bundles_post_ra>
